<compile_context>
chip_gen: v7x
topology: tpu7x:2x2x1
jax: 0.10.0
libtpu: 0.0.40
codegen_flags: <defaults>
</compile_context>

<pallas_src>
import numpy as np

import jax
import jax.numpy as jnp
from jax.experimental import pallas as pl
from jax.experimental.pallas import tpu as pltpu


def cnn_kernel(xc_ref, t1_ref, b1_ref, w2_ref, b2_ref, wfc_ref, fcb_ref, out_ref):
    bt = out_ref.shape[0]
    bf16 = jnp.bfloat16

    def dot(a, b):
        return jnp.dot(a, b, preferred_element_type=jnp.float32)

    # ---- conv1 (Toeplitz over kw, ow split by parity) + maxpool1 ------------
    # xc rows: r*(6*bt) + u*bt + b  with oh = 4u + r ; cols: kh*28 + iw
    xc = xc_ref[...]                                             # (24*bt, 140)
    yw = jnp.maximum(dot(xc, t1_ref[0]), dot(xc, t1_ref[1]))     # W-pool (ow parity)
    nb = 6 * bt
    b1 = b1_ref[...]                                             # (1, 192)
    # H-pool: (r=0,1) -> h1 even, (r=2,3) -> h1 odd; then bias + ReLU.
    p1e = jnp.maximum(jnp.maximum(yw[:nb], yw[nb:2 * nb]) + b1, 0.0)
    p1o = jnp.maximum(jnp.maximum(yw[2 * nb:3 * nb], yw[3 * nb:]) + b1, 0.0)
    p1 = (p1e.astype(bf16), p1o.astype(bf16))    # rows u*bt+b ; cols w1*16+ci

    # ---- conv2: 5 kh taps, each tap's rows are contiguous slices of p1e/p1o.
    # Both output-row parities (oh2 = 2m+q) are stacked along rows; the two
    # ow2 parities live in the two 128-wide column halves for the W-pool.
    acc = None
    for kh in range(5):
        rows = []
        for q in (0, 1):
            s = q + kh                         # h1 = 2m + q + kh = 2*(s//2 + m) + s%2
            rows.append(p1[s % 2][(s // 2) * bt:(s // 2 + 4) * bt, :])
        z = dot(jnp.concatenate(rows, axis=0), w2_ref[kh])       # (8*bt, 256)
        acc = z if acc is None else acc + z
    hq0, hq1 = acc[:4 * bt], acc[4 * bt:]
    pooled = jnp.maximum(jnp.maximum(hq0[:, :128], hq0[:, 128:]),
                         jnp.maximum(hq1[:, :128], hq1[:, 128:]))
    a2 = jnp.maximum(pooled + b2_ref[...], 0.0).astype(bf16)     # (4*bt, 128)

    # ---- flatten (folded into wfc layout) + fc: 4 lane-dense matmuls --------
    out = dot(a2[:bt], wfc_ref[0])
    for m in range(1, 4):
        out = out + dot(a2[m * bt:(m + 1) * bt], wfc_ref[m])
    out_ref[...] = out + fcb_ref[...]                            # (bt, 128)


def cnn_forward(x_nchw, params, *, block_b=32):
    """Layout plumbing (grouped im2col / parity-split Toeplitz weights) + pallas_call."""
    assert block_b % 8 == 0, "block_b must be a multiple of 8"
    B = x_nchw.shape[0]
    BT = block_b
    B_pad = ((B + BT - 1) // BT) * BT
    G = B_pad // BT
    f32, bf16 = jnp.float32, jnp.bfloat16

    # ---- activations: rows grouped as (g, r=oh%4, u=oh//4, b, kh*28+iw) -----
    x = x_nchw[:, 0].astype(f32)                                 # (B, 28, 28)
    if B_pad != B:
        x = jnp.pad(x, ((0, B_pad - B), (0, 0), (0, 0)))
    h_idx = (4 * np.arange(6)[None, :, None] + np.arange(4)[:, None, None]
             + np.arange(5)[None, None, :])                      # (4,6,5): 4u+r+kh
    xc = x[:, h_idx, :]                                          # (B_pad,4,6,5,28)
    xc = xc.reshape(G, BT, 4, 6, 5, 28).transpose(0, 2, 3, 1, 4, 5)
    xc = xc.reshape(24 * B_pad, 140).astype(bf16)

    # ---- conv1 weights: Toeplitz over kw, split by ow parity ----------------
    w1 = params["w1"].astype(f32)[:, 0]                          # (16,5,5) [c,kh,kw]
    ind1 = (np.arange(28)[None, :, None, None] ==
            (2 * np.arange(12)[None, None, :, None]
             + np.arange(2)[:, None, None, None]
             + np.arange(5)[None, None, None, :])).astype(np.float32)   # (2,28,12,5)
    t1 = jnp.einsum("pink,chk->phinc", jnp.asarray(ind1), w1)
    t1 = t1.reshape(2, 140, 192).astype(bf16)        # rows kh*28+iw ; cols n*16+c
    b1 = jnp.tile(params["b1"].astype(f32), 12).reshape(1, 192)

    # ---- conv2 weights: Toeplitz over kw, both ow2 parities along columns ---
    w2 = params["w2"].astype(f32)                                # (32,16,5,5) [co,ci,kh,kw]
    ind2 = (np.arange(12)[None, :, None, None] ==
            (2 * np.arange(4)[None, None, :, None]
             + np.arange(2)[:, None, None, None]
             + np.arange(5)[None, None, None, :])).astype(np.float32)   # (2,12,4,5)
    w2k = jnp.einsum("pwnk,oihk->hwipno", jnp.asarray(ind2), w2)
    w2k = w2k.reshape(5, 192, 256).astype(bf16)   # rows w1*16+ci ; cols wp*128+n2*32+co
    b2 = jnp.tile(params["b2"].astype(f32), 4).reshape(1, 128)

    # ---- fc: PyTorch (C,H,W) flatten folded into the weight layout; padded
    #      to 128 output lanes for a lane-dense store --------------------------
    wfc = jnp.transpose(params["fcw"].astype(f32).reshape(10, 32, 4, 4),
                        (2, 3, 1, 0)).reshape(4, 128, 10)        # [m, n2*32+co, k]
    wfc = jnp.pad(wfc, ((0, 0), (0, 0), (0, 118))).astype(bf16)  # (4,128,128)
    fcb = jnp.pad(params["fcb"].astype(f32), (0, 118)).reshape(1, 128)

    def const_spec(shape):
        zeros = (0,) * len(shape)
        return pl.BlockSpec(shape, lambda g, _z=zeros: _z)

    flops_per_img = 2 * (2 * 24 * 140 * 192 + 5 * 8 * 192 * 256 + 4 * 128 * 128)
    const_bytes = (t1.size + w2k.size + wfc.size) * 2 + (b1.size + b2.size + fcb.size) * 4
    cost = pl.CostEstimate(flops=int(B_pad * flops_per_img), transcendentals=0,
                           bytes_accessed=int(const_bytes + B_pad * (6720 + 512)))

    out = pl.pallas_call(
        cnn_kernel,
        out_shape=jax.ShapeDtypeStruct((B_pad, 128), f32),
        grid=(G,),
        in_specs=[
            pl.BlockSpec((24 * BT, 140), lambda g: (g, 0)),      # activations
            const_spec((2, 140, 192)), const_spec((1, 192)),     # conv1
            const_spec((5, 192, 256)), const_spec((1, 128)),     # conv2
            const_spec((4, 128, 128)), const_spec((1, 128)),     # fc
        ],
        out_specs=pl.BlockSpec((BT, 128), lambda g: (g, 0)),
        compiler_params=pltpu.CompilerParams(
            dimension_semantics=("parallel",)),
        cost_estimate=cost,
    )(xc, t1, b1, w2k, b2, wfc, fcb)
    return out[:B, :10]


def torch_reference(x, params):
    """Plain-JAX re-implementation of the PyTorch forward (NCHW), high precision."""
    prec = jax.lax.Precision.HIGHEST

    def conv(inp, w, b):
        out = jax.lax.conv_general_dilated(
            inp, w, window_strides=(1, 1), padding="VALID",
            dimension_numbers=("NCHW", "OIHW", "NCHW"), precision=prec)
        return out + b[None, :, None, None]

    def maxpool2(inp):
        return jax.lax.reduce_window(
            inp, -jnp.inf, jax.lax.max,
            window_dimensions=(1, 1, 2, 2), window_strides=(1, 1, 2, 2),
            padding="VALID")

    out = jnp.maximum(conv(x, params["w1"], params["b1"]), 0.0)
    out = maxpool2(out)
    out = jnp.maximum(conv(out, params["w2"], params["b2"]), 0.0)
    out = maxpool2(out)
    out = out.reshape(out.shape[0], -1)            # (B, 512), (C,H,W) order
    return jnp.dot(out, params["fcw"].T, precision=prec) + params["fcb"]


if __name__ == "__main__":
    key = jax.random.PRNGKey(0)
    ks = jax.random.split(key, 7)
    # Deterministic synthetic parameters, shapes from CNN_Model.__init__
    params = {
        "w1": jax.random.normal(ks[0], (16, 1, 5, 5), jnp.float32) * 0.10,
        "b1": jax.random.normal(ks[1], (16,), jnp.float32) * 0.10,
        "w2": jax.random.normal(ks[2], (32, 16, 5, 5), jnp.float32) * 0.05,
        "b2": jax.random.normal(ks[3], (32,), jnp.float32) * 0.10,
        "fcw": jax.random.normal(ks[4], (10, 512), jnp.float32) * 0.05,
        "fcb": jax.random.normal(ks[5], (10,), jnp.float32) * 0.10,
    }
    # fc1 = Linear(32*4*4, 10) pins the spatial size to 28x28; batch = 2.
    x = jax.random.normal(ks[6], (2, 1, 28, 28), jnp.float32)

    y = jax.block_until_ready(cnn_forward(x, params))
    assert y.shape == (2, 10), y.shape
    assert bool(jnp.all(jnp.isfinite(y)))

    y_ref = jax.block_until_ready(torch_reference(x, params))
    # bf16 MXU operands with f32 accumulation: operand-rounding error for this
    # 3-layer net stays well inside 2e-2.
    assert jnp.allclose(y, y_ref, atol=2e-2, rtol=2e-2), (y, y_ref)

    print("KERNEL_OK")
</pallas_src>

<mosaic_0001>
module attributes {stable_mosaic.version = 11 : i64} {
  func.func @cnn_kernel(%arg0: i32, %arg1: memref<768x140xbf16, #tpu.memory_space<vmem>>, %arg2: memref<2x140x192xbf16, #tpu.memory_space<vmem>>, %arg3: memref<1x192xf32, #tpu.memory_space<vmem>>, %arg4: memref<5x192x256xbf16, #tpu.memory_space<vmem>>, %arg5: memref<1x128xf32, #tpu.memory_space<vmem>>, %arg6: memref<4x128x128xbf16, #tpu.memory_space<vmem>>, %arg7: memref<1x128xf32, #tpu.memory_space<vmem>>, %arg8: memref<32x128xf32, #tpu.memory_space<vmem>>) attributes {dimension_semantics = [#tpu.dimension_semantics<parallel>], iteration_bounds = array<i64: 1>, scalar_prefetch = 0 : i64, scratch_operands = 0 : i64, tpu.core_type = #tpu.core_type<tc>, window_params = [{transform_indices = @transform_0, window_bounds = array<i64: 768, 140>}, {pipeline_mode = #tpu.pipeline_mode<synchronous>, transform_indices = @transform_1, window_bounds = array<i64: 2, 140, 192>}, {pipeline_mode = #tpu.pipeline_mode<synchronous>, transform_indices = @transform_2, window_bounds = array<i64: 1, 192>}, {pipeline_mode = #tpu.pipeline_mode<synchronous>, transform_indices = @transform_3, window_bounds = array<i64: 5, 192, 256>}, {pipeline_mode = #tpu.pipeline_mode<synchronous>, transform_indices = @transform_4, window_bounds = array<i64: 1, 128>}, {pipeline_mode = #tpu.pipeline_mode<synchronous>, transform_indices = @transform_5, window_bounds = array<i64: 4, 128, 128>}, {pipeline_mode = #tpu.pipeline_mode<synchronous>, transform_indices = @transform_6, window_bounds = array<i64: 1, 128>}, {transform_indices = @transform_7, window_bounds = array<i64: 32, 128>}]} {
    %c0 = arith.constant 0 : index
    %c0_0 = arith.constant 0 : index
    %0 = vector.load %arg1[%c0, %c0_0] : memref<768x140xbf16, #tpu.memory_space<vmem>>, vector<768x140xbf16>
    %c0_1 = arith.constant 0 : index
    %c0_2 = arith.constant 0 : index
    %c0_3 = arith.constant 0 : index
    %1 = vector.load %arg2[%c0_1, %c0_2, %c0_3] : memref<2x140x192xbf16, #tpu.memory_space<vmem>>, vector<1x140x192xbf16>
    %2 = vector.shape_cast %1 : vector<1x140x192xbf16> to vector<140x192xbf16>
    %cst = arith.constant dense<0.000000e+00> : vector<768x192xf32>
    %3 = tpu.matmul %0, %2, %cst {dimension_numbers = #tpu.dot_dimension_numbers<[1], [0], [0], [1], [0, 0, 1, 1], [], []>} : vector<768x140xbf16>, vector<140x192xbf16>, vector<768x192xf32> -> vector<768x192xf32>
    %c1 = arith.constant 1 : index
    %c0_4 = arith.constant 0 : index
    %c0_5 = arith.constant 0 : index
    %4 = vector.load %arg2[%c1, %c0_4, %c0_5] : memref<2x140x192xbf16, #tpu.memory_space<vmem>>, vector<1x140x192xbf16>
    %5 = vector.shape_cast %4 : vector<1x140x192xbf16> to vector<140x192xbf16>
    %cst_6 = arith.constant dense<0.000000e+00> : vector<768x192xf32>
    %6 = tpu.matmul %0, %5, %cst_6 {dimension_numbers = #tpu.dot_dimension_numbers<[1], [0], [0], [1], [0, 0, 1, 1], [], []>} : vector<768x140xbf16>, vector<140x192xbf16>, vector<768x192xf32> -> vector<768x192xf32>
    %7 = arith.maximumf %3, %6 : vector<768x192xf32>
    %c0_7 = arith.constant 0 : index
    %c0_8 = arith.constant 0 : index
    %8 = vector.load %arg3[%c0_7, %c0_8] : memref<1x192xf32, #tpu.memory_space<vmem>>, vector<1x192xf32>
    %9 = vector.extract_strided_slice %7 {offsets = [0, 0], sizes = [192, 192], strides = [1, 1]} : vector<768x192xf32> to vector<192x192xf32>
    %10 = vector.extract_strided_slice %7 {offsets = [192, 0], sizes = [192, 192], strides = [1, 1]} : vector<768x192xf32> to vector<192x192xf32>
    %11 = arith.maximumf %9, %10 : vector<192x192xf32>
    %12 = vector.broadcast %8 : vector<1x192xf32> to vector<192x192xf32>
    %13 = arith.addf %11, %12 : vector<192x192xf32>
    %cst_9 = arith.constant 0.000000e+00 : f32
    %14 = vector.broadcast %cst_9 : f32 to vector<192x192xf32>
    %15 = arith.maximumf %13, %14 : vector<192x192xf32>
    %16 = vector.extract_strided_slice %7 {offsets = [384, 0], sizes = [192, 192], strides = [1, 1]} : vector<768x192xf32> to vector<192x192xf32>
    %17 = vector.extract_strided_slice %7 {offsets = [576, 0], sizes = [192, 192], strides = [1, 1]} : vector<768x192xf32> to vector<192x192xf32>
    %18 = arith.maximumf %16, %17 : vector<192x192xf32>
    %19 = vector.broadcast %8 : vector<1x192xf32> to vector<192x192xf32>
    %20 = arith.addf %18, %19 : vector<192x192xf32>
    %cst_10 = arith.constant 0.000000e+00 : f32
    %21 = vector.broadcast %cst_10 : f32 to vector<192x192xf32>
    %22 = arith.maximumf %20, %21 : vector<192x192xf32>
    %23 = arith.truncf %15 : vector<192x192xf32> to vector<192x192xbf16>
    %24 = arith.truncf %22 : vector<192x192xf32> to vector<192x192xbf16>
    %25 = vector.extract_strided_slice %23 {offsets = [0, 0], sizes = [128, 192], strides = [1, 1]} : vector<192x192xbf16> to vector<128x192xbf16>
    %26 = vector.extract_strided_slice %24 {offsets = [0, 0], sizes = [128, 192], strides = [1, 1]} : vector<192x192xbf16> to vector<128x192xbf16>
    %27 = tpu.concatenate %25, %26 in 0 : vector<128x192xbf16>, vector<128x192xbf16> -> vector<256x192xbf16>
    %c0_11 = arith.constant 0 : index
    %c0_12 = arith.constant 0 : index
    %c0_13 = arith.constant 0 : index
    %28 = vector.load %arg4[%c0_11, %c0_12, %c0_13] : memref<5x192x256xbf16, #tpu.memory_space<vmem>>, vector<1x192x256xbf16>
    %29 = vector.shape_cast %28 : vector<1x192x256xbf16> to vector<192x256xbf16>
    %cst_14 = arith.constant dense<0.000000e+00> : vector<256x256xf32>
    %30 = tpu.matmul %27, %29, %cst_14 {dimension_numbers = #tpu.dot_dimension_numbers<[1], [0], [0], [1], [0, 0, 1, 1], [], []>} : vector<256x192xbf16>, vector<192x256xbf16>, vector<256x256xf32> -> vector<256x256xf32>
    %31 = vector.extract_strided_slice %24 {offsets = [0, 0], sizes = [128, 192], strides = [1, 1]} : vector<192x192xbf16> to vector<128x192xbf16>
    %32 = vector.extract_strided_slice %23 {offsets = [32, 0], sizes = [128, 192], strides = [1, 1]} : vector<192x192xbf16> to vector<128x192xbf16>
    %33 = tpu.concatenate %31, %32 in 0 : vector<128x192xbf16>, vector<128x192xbf16> -> vector<256x192xbf16>
    %c1_15 = arith.constant 1 : index
    %c0_16 = arith.constant 0 : index
    %c0_17 = arith.constant 0 : index
    %34 = vector.load %arg4[%c1_15, %c0_16, %c0_17] : memref<5x192x256xbf16, #tpu.memory_space<vmem>>, vector<1x192x256xbf16>
    %35 = vector.shape_cast %34 : vector<1x192x256xbf16> to vector<192x256xbf16>
    %cst_18 = arith.constant dense<0.000000e+00> : vector<256x256xf32>
    %36 = tpu.matmul %33, %35, %cst_18 {dimension_numbers = #tpu.dot_dimension_numbers<[1], [0], [0], [1], [0, 0, 1, 1], [], []>} : vector<256x192xbf16>, vector<192x256xbf16>, vector<256x256xf32> -> vector<256x256xf32>
    %37 = arith.addf %30, %36 : vector<256x256xf32>
    %38 = vector.extract_strided_slice %23 {offsets = [32, 0], sizes = [128, 192], strides = [1, 1]} : vector<192x192xbf16> to vector<128x192xbf16>
    %39 = vector.extract_strided_slice %24 {offsets = [32, 0], sizes = [128, 192], strides = [1, 1]} : vector<192x192xbf16> to vector<128x192xbf16>
    %40 = tpu.concatenate %38, %39 in 0 : vector<128x192xbf16>, vector<128x192xbf16> -> vector<256x192xbf16>
    %c2 = arith.constant 2 : index
    %c0_19 = arith.constant 0 : index
    %c0_20 = arith.constant 0 : index
    %41 = vector.load %arg4[%c2, %c0_19, %c0_20] : memref<5x192x256xbf16, #tpu.memory_space<vmem>>, vector<1x192x256xbf16>
    %42 = vector.shape_cast %41 : vector<1x192x256xbf16> to vector<192x256xbf16>
    %cst_21 = arith.constant dense<0.000000e+00> : vector<256x256xf32>
    %43 = tpu.matmul %40, %42, %cst_21 {dimension_numbers = #tpu.dot_dimension_numbers<[1], [0], [0], [1], [0, 0, 1, 1], [], []>} : vector<256x192xbf16>, vector<192x256xbf16>, vector<256x256xf32> -> vector<256x256xf32>
    %44 = arith.addf %37, %43 : vector<256x256xf32>
    %45 = vector.extract_strided_slice %24 {offsets = [32, 0], sizes = [128, 192], strides = [1, 1]} : vector<192x192xbf16> to vector<128x192xbf16>
    %46 = vector.extract_strided_slice %23 {offsets = [64, 0], sizes = [128, 192], strides = [1, 1]} : vector<192x192xbf16> to vector<128x192xbf16>
    %47 = tpu.concatenate %45, %46 in 0 : vector<128x192xbf16>, vector<128x192xbf16> -> vector<256x192xbf16>
    %c3 = arith.constant 3 : index
    %c0_22 = arith.constant 0 : index
    %c0_23 = arith.constant 0 : index
    %48 = vector.load %arg4[%c3, %c0_22, %c0_23] : memref<5x192x256xbf16, #tpu.memory_space<vmem>>, vector<1x192x256xbf16>
    %49 = vector.shape_cast %48 : vector<1x192x256xbf16> to vector<192x256xbf16>
    %cst_24 = arith.constant dense<0.000000e+00> : vector<256x256xf32>
    %50 = tpu.matmul %47, %49, %cst_24 {dimension_numbers = #tpu.dot_dimension_numbers<[1], [0], [0], [1], [0, 0, 1, 1], [], []>} : vector<256x192xbf16>, vector<192x256xbf16>, vector<256x256xf32> -> vector<256x256xf32>
    %51 = arith.addf %44, %50 : vector<256x256xf32>
    %52 = vector.extract_strided_slice %23 {offsets = [64, 0], sizes = [128, 192], strides = [1, 1]} : vector<192x192xbf16> to vector<128x192xbf16>
    %53 = vector.extract_strided_slice %24 {offsets = [64, 0], sizes = [128, 192], strides = [1, 1]} : vector<192x192xbf16> to vector<128x192xbf16>
    %54 = tpu.concatenate %52, %53 in 0 : vector<128x192xbf16>, vector<128x192xbf16> -> vector<256x192xbf16>
    %c4 = arith.constant 4 : index
    %c0_25 = arith.constant 0 : index
    %c0_26 = arith.constant 0 : index
    %55 = vector.load %arg4[%c4, %c0_25, %c0_26] : memref<5x192x256xbf16, #tpu.memory_space<vmem>>, vector<1x192x256xbf16>
    %56 = vector.shape_cast %55 : vector<1x192x256xbf16> to vector<192x256xbf16>
    %cst_27 = arith.constant dense<0.000000e+00> : vector<256x256xf32>
    %57 = tpu.matmul %54, %56, %cst_27 {dimension_numbers = #tpu.dot_dimension_numbers<[1], [0], [0], [1], [0, 0, 1, 1], [], []>} : vector<256x192xbf16>, vector<192x256xbf16>, vector<256x256xf32> -> vector<256x256xf32>
    %58 = arith.addf %51, %57 : vector<256x256xf32>
    %59 = vector.extract_strided_slice %58 {offsets = [0, 0], sizes = [128, 256], strides = [1, 1]} : vector<256x256xf32> to vector<128x256xf32>
    %60 = vector.extract_strided_slice %58 {offsets = [128, 0], sizes = [128, 256], strides = [1, 1]} : vector<256x256xf32> to vector<128x256xf32>
    %61 = vector.extract_strided_slice %59 {offsets = [0, 0], sizes = [128, 128], strides = [1, 1]} : vector<128x256xf32> to vector<128x128xf32>
    %62 = vector.extract_strided_slice %59 {offsets = [0, 128], sizes = [128, 128], strides = [1, 1]} : vector<128x256xf32> to vector<128x128xf32>
    %63 = arith.maximumf %61, %62 : vector<128x128xf32>
    %64 = vector.extract_strided_slice %60 {offsets = [0, 0], sizes = [128, 128], strides = [1, 1]} : vector<128x256xf32> to vector<128x128xf32>
    %65 = vector.extract_strided_slice %60 {offsets = [0, 128], sizes = [128, 128], strides = [1, 1]} : vector<128x256xf32> to vector<128x128xf32>
    %66 = arith.maximumf %64, %65 : vector<128x128xf32>
    %67 = arith.maximumf %63, %66 : vector<128x128xf32>
    %c0_28 = arith.constant 0 : index
    %c0_29 = arith.constant 0 : index
    %68 = vector.load %arg5[%c0_28, %c0_29] : memref<1x128xf32, #tpu.memory_space<vmem>>, vector<1x128xf32>
    %69 = vector.broadcast %68 : vector<1x128xf32> to vector<128x128xf32>
    %70 = arith.addf %67, %69 : vector<128x128xf32>
    %cst_30 = arith.constant 0.000000e+00 : f32
    %71 = vector.broadcast %cst_30 : f32 to vector<128x128xf32>
    %72 = arith.maximumf %70, %71 : vector<128x128xf32>
    %73 = arith.truncf %72 : vector<128x128xf32> to vector<128x128xbf16>
    %74 = vector.extract_strided_slice %73 {offsets = [0, 0], sizes = [32, 128], strides = [1, 1]} : vector<128x128xbf16> to vector<32x128xbf16>
    %c0_31 = arith.constant 0 : index
    %c0_32 = arith.constant 0 : index
    %c0_33 = arith.constant 0 : index
    %75 = vector.load %arg6[%c0_31, %c0_32, %c0_33] : memref<4x128x128xbf16, #tpu.memory_space<vmem>>, vector<1x128x128xbf16>
    %76 = vector.shape_cast %75 : vector<1x128x128xbf16> to vector<128x128xbf16>
    %cst_34 = arith.constant dense<0.000000e+00> : vector<32x128xf32>
    %77 = tpu.matmul %74, %76, %cst_34 {dimension_numbers = #tpu.dot_dimension_numbers<[1], [0], [0], [1], [0, 0, 1, 1], [], []>} : vector<32x128xbf16>, vector<128x128xbf16>, vector<32x128xf32> -> vector<32x128xf32>
    %78 = vector.extract_strided_slice %73 {offsets = [32, 0], sizes = [32, 128], strides = [1, 1]} : vector<128x128xbf16> to vector<32x128xbf16>
    %c1_35 = arith.constant 1 : index
    %c0_36 = arith.constant 0 : index
    %c0_37 = arith.constant 0 : index
    %79 = vector.load %arg6[%c1_35, %c0_36, %c0_37] : memref<4x128x128xbf16, #tpu.memory_space<vmem>>, vector<1x128x128xbf16>
    %80 = vector.shape_cast %79 : vector<1x128x128xbf16> to vector<128x128xbf16>
    %cst_38 = arith.constant dense<0.000000e+00> : vector<32x128xf32>
    %81 = tpu.matmul %78, %80, %cst_38 {dimension_numbers = #tpu.dot_dimension_numbers<[1], [0], [0], [1], [0, 0, 1, 1], [], []>} : vector<32x128xbf16>, vector<128x128xbf16>, vector<32x128xf32> -> vector<32x128xf32>
    %82 = arith.addf %77, %81 : vector<32x128xf32>
    %83 = vector.extract_strided_slice %73 {offsets = [64, 0], sizes = [32, 128], strides = [1, 1]} : vector<128x128xbf16> to vector<32x128xbf16>
    %c2_39 = arith.constant 2 : index
    %c0_40 = arith.constant 0 : index
    %c0_41 = arith.constant 0 : index
    %84 = vector.load %arg6[%c2_39, %c0_40, %c0_41] : memref<4x128x128xbf16, #tpu.memory_space<vmem>>, vector<1x128x128xbf16>
    %85 = vector.shape_cast %84 : vector<1x128x128xbf16> to vector<128x128xbf16>
    %cst_42 = arith.constant dense<0.000000e+00> : vector<32x128xf32>
    %86 = tpu.matmul %83, %85, %cst_42 {dimension_numbers = #tpu.dot_dimension_numbers<[1], [0], [0], [1], [0, 0, 1, 1], [], []>} : vector<32x128xbf16>, vector<128x128xbf16>, vector<32x128xf32> -> vector<32x128xf32>
    %87 = arith.addf %82, %86 : vector<32x128xf32>
    %88 = vector.extract_strided_slice %73 {offsets = [96, 0], sizes = [32, 128], strides = [1, 1]} : vector<128x128xbf16> to vector<32x128xbf16>
    %c3_43 = arith.constant 3 : index
    %c0_44 = arith.constant 0 : index
    %c0_45 = arith.constant 0 : index
    %89 = vector.load %arg6[%c3_43, %c0_44, %c0_45] : memref<4x128x128xbf16, #tpu.memory_space<vmem>>, vector<1x128x128xbf16>
    %90 = vector.shape_cast %89 : vector<1x128x128xbf16> to vector<128x128xbf16>
    %cst_46 = arith.constant dense<0.000000e+00> : vector<32x128xf32>
    %91 = tpu.matmul %88, %90, %cst_46 {dimension_numbers = #tpu.dot_dimension_numbers<[1], [0], [0], [1], [0, 0, 1, 1], [], []>} : vector<32x128xbf16>, vector<128x128xbf16>, vector<32x128xf32> -> vector<32x128xf32>
    %92 = arith.addf %87, %91 : vector<32x128xf32>
    %c0_47 = arith.constant 0 : index
    %c0_48 = arith.constant 0 : index
    %93 = vector.load %arg7[%c0_47, %c0_48] : memref<1x128xf32, #tpu.memory_space<vmem>>, vector<1x128xf32>
    %94 = vector.broadcast %93 : vector<1x128xf32> to vector<32x128xf32>
    %95 = arith.addf %92, %94 : vector<32x128xf32>
    %c0_49 = arith.constant 0 : index
    %c0_50 = arith.constant 0 : index
    %96 = vector.load %arg8[%c0_49, %c0_50] : memref<32x128xf32, #tpu.memory_space<vmem>>, vector<32x128xf32>
    tpu.vector_store %arg8[%c0_49, %c0_50], %95 {strides = array<i32>} : memref<32x128xf32, #tpu.memory_space<vmem>>, vector<32x128xf32>,
    return
  }
  func.func @transform_0(%arg0: i32) -> (i32, i32) {
    %c0_i32 = arith.constant 0 : i32
    %c0_i32_0 = arith.constant 0 : i32
    return %arg0, %c0_i32 : i32, i32
  }
  func.func @transform_1(%arg0: i32) -> (i32, i32, i32) {
    %c0_i32 = arith.constant 0 : i32
    %c0_i32_0 = arith.constant 0 : i32
    %c0_i32_1 = arith.constant 0 : i32
    %c0_i32_2 = arith.constant 0 : i32
    return %c0_i32, %c0_i32_0, %c0_i32_1 : i32, i32, i32
  }
  func.func @transform_2(%arg0: i32) -> (i32, i32) {
    %c0_i32 = arith.constant 0 : i32
    %c0_i32_0 = arith.constant 0 : i32
    %c0_i32_1 = arith.constant 0 : i32
    return %c0_i32, %c0_i32_0 : i32, i32
  }
  func.func @transform_3(%arg0: i32) -> (i32, i32, i32) {
    %c0_i32 = arith.constant 0 : i32
    %c0_i32_0 = arith.constant 0 : i32
    %c0_i32_1 = arith.constant 0 : i32
    %c0_i32_2 = arith.constant 0 : i32
    return %c0_i32, %c0_i32_0, %c0_i32_1 : i32, i32, i32
  }
  func.func @transform_4(%arg0: i32) -> (i32, i32) {
    %c0_i32 = arith.constant 0 : i32
    %c0_i32_0 = arith.constant 0 : i32
    %c0_i32_1 = arith.constant 0 : i32
    return %c0_i32, %c0_i32_0 : i32, i32
  }
  func.func @transform_5(%arg0: i32) -> (i32, i32, i32) {
    %c0_i32 = arith.constant 0 : i32
    %c0_i32_0 = arith.constant 0 : i32
    %c0_i32_1 = arith.constant 0 : i32
    %c0_i32_2 = arith.constant 0 : i32
    return %c0_i32, %c0_i32_0, %c0_i32_1 : i32, i32, i32
  }
  func.func @transform_6(%arg0: i32) -> (i32, i32) {
    %c0_i32 = arith.constant 0 : i32
    %c0_i32_0 = arith.constant 0 : i32
    %c0_i32_1 = arith.constant 0 : i32
    return %c0_i32, %c0_i32_0 : i32, i32
  }
  func.func @transform_7(%arg0: i32) -> (i32, i32) {
    %c0_i32 = arith.constant 0 : i32
    %c0_i32_0 = arith.constant 0 : i32
    return %arg0, %c0_i32 : i32, i32
  }
}

</mosaic_0001>

<bundles_post_ra>
// kernel: tpu_custom_call.1
= control target key start
LH: loop header
LB: loop body
LE: loop exit
PB: predicated region body
PF: predicated region fallthrough
CT: control target
= control target key end

     0   :  { %vm662_vm0 = vcmask 97280   ;;  %vm807_vm1 = vcmask 1045504   ;;  %s9627_s0 = inlined_call_operand.vmem [shape: bf16[768,140], index: 0, kind: input, shape index: {}]   ;;  %s9628_s1 = inlined_call_operand.vmem [shape: bf16[2,140,192], index: 1, kind: input, shape index: {}]   ;;  %s9629_s2 = inlined_call_operand.vmem [shape: f32[1,192], index: 2, kind: input, shape index: {}]   ;;  %s9630_s3 = inlined_call_operand.vmem [shape: bf16[5,192,256], index: 3, kind: input, shape index: {}]   ;;  %s9631_s4 = inlined_call_operand.vmem [shape: f32[1,128], index: 4, kind: input, shape index: {}]   ;;  %s9632_s5 = inlined_call_operand.vmem [shape: bf16[4,128,128], index: 5, kind: input, shape index: {}]   ;;  %s9633_s6 = inlined_call_operand.vmem [shape: f32[1,128], index: 6, kind: input, shape index: {}]   ;;  %s9634_s7 = inlined_call_operand.hbm [shape: f32[32,128], index: 7, kind: output, shape index: {}]  }
   0x1   :  { %v6071_v0 = vld [vmem:[%s9628_s1 + $0x4] ss:$8 sps:$4 sm:$0xff]   ;;  %v6073_v1 = vld [vmem:[%s9628_s1] ss:$8 sps:$4 sm:$0xff]   ;;  %v6074_v2 = vld [vmem:[%s9628_s1 + $0x14] ss:$8 sps:$4 sm:$0xff]  }
   0x2   :  { %5782 = vmatprep.subr.bf16.mxu1 %v6071_v0  ;;  %814 = vmatprep.subr.bf16.mxu0 %v6071_v0  ;;  %v6076_v3 = vld [vmem:[%s9628_s1 + $0x10] ss:$8 sps:$4 sm:$0xff]   ;;  %v6077_v4 = vld [vmem:[%s9628_s1 + $0x24] ss:$8 sps:$4 sm:$0xff]   ;;  %v6079_v5 = vld [vmem:[%s9628_s1 + $0x20] ss:$8 sps:$4 sm:$0xff]  }
   0x3   :  { %5791 = vmatpush1.bf16.msra.mxu1 %v6073_v1  ;;  %815 = vmatpush1.bf16.msra.mxu0 %v6073_v1  ;;  %v6080_v6 = vld [vmem:[%s9628_s1 + $0x34] ss:$8 sps:$4 sm:$0xff]   ;;  %v6082_v7 = vld [vmem:[%s9628_s1 + $0x30] ss:$8 sps:$4 sm:$0xff]   ;;  %v6083_v8 = vld [vmem:[%s9628_s1 + $0x44] ss:$8 sps:$4 sm:$0xff]  }
   0x4   :  { %5783 = vmatprep.subr.bf16.mxu1 %v6074_v2  ;;  %816 = vmatprep.subr.bf16.mxu0 %v6074_v2  ;;  %v6100_v9 = vld [vmem:[%s9627_s0 + $0xf4] ss:$8 sps:$4 sm:$0xff]   ;;  %v6085_v10 = vld [vmem:[%s9628_s1 + $0x40] ss:$8 sps:$4 sm:$0xff]   ;;  %v6088_v12 = vld [vmem:[%s9628_s1 + $0x50] ss:$8 sps:$4 sm:$0xff]  }
   0x5   :  { %5166 = vmatprep.mubr.msk.bf16.mxu1 %vm662_vm0, %v6100_v9  ;;  %v6086_v11 = vld [vmem:[%s9628_s1 + $0x54] ss:$8 sps:$4 sm:$0xff]   ;;  %v6089_v13 = vld [vmem:[%s9628_s1 + $0x64] ss:$8 sps:$4 sm:$0xff]   ;;  %v6091_v14 = vld [vmem:[%s9628_s1 + $0x60] ss:$8 sps:$4 sm:$0xff]  }
   0x6   :  { %v6092_v15 = vld [vmem:[%s9628_s1 + $0x74] ss:$8 sps:$4 sm:$0xff]   ;;  %v6094_v16 = vld [vmem:[%s9628_s1 + $0x70] ss:$8 sps:$4 sm:$0xff]   ;;  %v6104_v23 = vld [vmem:[%s9627_s0 + $0x104] ss:$8 sps:$4 sm:$0xff]  }
   0x7   :  { %5792 = vmatpush1.bf16.msra.mxu1 %v6076_v3  ;;  %817 = vmatpush1.bf16.msra.mxu0 %v6076_v3  ;;  %v6095_v17 = vld [vmem:[%s9628_s1 + $0x84] ss:$8 sps:$4 sm:$0x3f]   ;;  %v6097_v18 = vld [vmem:[%s9628_s1 + $0x80] ss:$8 sps:$4 sm:$0x3f]  }
   0x8   :  { %5784 = vmatprep.subr.bf16.mxu1 %v6077_v4  ;;  %818 = vmatprep.subr.bf16.mxu0 %v6077_v4  ;;  %v809_v19 = vsel %vm807_vm1, %v6097_v18, 0  ;;  %v6103_v20 = vld [vmem:[%s9628_s1 + $0x94] ss:$8 sps:$4 sm:$0xff]   ;;  %v6098_v21 = vld [vmem:[%s9627_s0 + $0xf0] ss:$8 sps:$4 sm:$0xff]  }
   0x9   :  { %v6101_v22 = vld [vmem:[%s9628_s1 + $0x90] ss:$8 sps:$4 sm:$0xff]   ;;  %v6115_v24 = vld [vmem:[%s9628_s1 + $0xa4] ss:$8 sps:$4 sm:$0xff]   ;;  %v6113_v25 = vld [vmem:[%s9628_s1 + $0xa0] ss:$8 sps:$4 sm:$0xff]  }
   0xa   :  { %v6106_v26 = vld [vmem:[%s9627_s0 + $0x100] ss:$8 sps:$4 sm:$0xff]   ;;  %v6130_v27 = vld [vmem:[%s9628_s1 + $0xb4] ss:$8 sps:$4 sm:$0xff]   ;;  %v6128_v29 = vld [vmem:[%s9628_s1 + $0xb0] ss:$8 sps:$4 sm:$0xff]  }
   0xb   :  { %5793 = vmatpush1.bf16.msra.mxu1 %v6079_v5  ;;  %819 = vmatpush1.bf16.msra.mxu0 %v6079_v5  ;;  %v6107_v28 = vld [vmem:[%s9627_s0 + $0x114] ss:$8 sps:$4 sm:$0xff]   ;;  %v6145_v30 = vld [vmem:[%s9628_s1 + $0xc4] ss:$8 sps:$4 sm:$0xff]   ;;  %v6143_v31 = vld [vmem:[%s9628_s1 + $0xc0] ss:$8 sps:$4 sm:$0xff]  }
   0xc   :  { %5785 = vmatprep.subr.bf16.mxu1 %v6080_v6  ;;  %820 = vmatprep.subr.bf16.mxu0 %v6080_v6  ;;  %v6157_v32 = vld [vmem:[%s9628_s1 + $0xd4] ss:$8 sps:$4 sm:$0xff]   ;;  %v6109_v33 = vld [vmem:[%s9627_s0 + $0x110] ss:$8 sps:$4 sm:$0xff]   ;;  %v6110_v34 = vld [vmem:[%s9627_s0 + $0x124] ss:$8 sps:$4 sm:$0xff]  }
   0xd   :  { %v6155_v35 = vld [vmem:[%s9628_s1 + $0xd0] ss:$8 sps:$4 sm:$0xff]   ;;  %v6172_v36 = vld [vmem:[%s9628_s1 + $0xe4] ss:$8 sps:$4 sm:$0xff]   ;;  %v6170_v37 = vld [vmem:[%s9628_s1 + $0xe0] ss:$8 sps:$4 sm:$0xff]  }
   0xe   :  { %v6112_v38 = vld [vmem:[%s9627_s0 + $0x120] ss:$8 sps:$4 sm:$0xff]   ;;  %v6116_v39 = vld [vmem:[%s9627_s0 + $0x134] ss:$8 sps:$4 sm:$0xff]   ;;  %v6118_v40 = vld [vmem:[%s9627_s0 + $0x130] ss:$8 sps:$4 sm:$0xff]  }
   0xf   :  { %5794 = vmatpush1.bf16.msra.mxu1 %v6082_v7  ;;  %821 = vmatpush1.bf16.msra.mxu0 %v6082_v7  ;;  %v6119_v41 = vld [vmem:[%s9627_s0 + $0x144] ss:$8 sps:$4 sm:$0xff]   ;;  %v6121_v42 = vld [vmem:[%s9627_s0 + $0x140] ss:$8 sps:$4 sm:$0xff]   ;;  %v6122_v43 = vld [vmem:[%s9627_s0 + $0x154] ss:$8 sps:$4 sm:$0xff]  }
  0x10   :  { %5786 = vmatprep.subr.bf16.mxu1 %v6083_v8  ;;  %822 = vmatprep.subr.bf16.mxu0 %v6083_v8  ;;  %v6124_v44 = vld [vmem:[%s9627_s0 + $0x150] ss:$8 sps:$4 sm:$0xff]   ;;  %v6125_v45 = vld [vmem:[%s9627_s0 + $0x164] ss:$8 sps:$4 sm:$0xff]   ;;  %v6187_v47 = vld [vmem:[%s9628_s1 + $0xf4] ss:$8 sps:$4 sm:$0xff]  }
  0x11   :  { %v6185_v46 = vld [vmem:[%s9628_s1 + $0xf0] ss:$8 sps:$4 sm:$0xff]   ;;  %v6127_v48 = vld [vmem:[%s9627_s0 + $0x160] ss:$8 sps:$4 sm:$0xff]   ;;  %v6734_v49 = vld [vmem:[%s9627_s0 + $0x174] ss:$8 sps:$4 sm:$0xff]  }
  0x12   :  { %v6741_v50 = vld [vmem:[%s9627_s0 + $0x170] ss:$8 sps:$4 sm:$0xff]   ;;  %v6746_v51 = vld [vmem:[%s9627_s0 + $0x184] ss:$8 sps:$4 sm:$0xff]   ;;  %v6754_v52 = vld [vmem:[%s9627_s0 + $0x180] ss:$8 sps:$4 sm:$0xff]  }
  0x13   :  { %5795 = vmatpush1.bf16.msra.mxu1 %v6085_v10  ;;  %823 = vmatpush1.bf16.msra.mxu0 %v6085_v10  ;;  %v6759_v53 = vld [vmem:[%s9627_s0 + $0x194] ss:$8 sps:$4 sm:$0xff]   ;;  %v6197_v54 = vld [vmem:[%s9628_s1 + $0x100] ss:$8 sps:$4 sm:$0xff]   ;;  %v6199_v55 = vld [vmem:[%s9628_s1 + $0x104] ss:$8 sps:$4 sm:$0xff]  }
  0x14   :  { %5787 = vmatprep.subr.bf16.mxu1 %v6086_v11  ;;  %824 = vmatprep.subr.bf16.mxu0 %v6086_v11  ;;  %v6773_v56 = vld [vmem:[%s9627_s0 + $0x190] ss:$8 sps:$4 sm:$0xff]   ;;  %v6778_v57 = vld [vmem:[%s9627_s0 + $0x1a4] ss:$8 sps:$4 sm:$0xff]   ;;  %v6786_v58 = vld [vmem:[%s9627_s0 + $0x1a0] ss:$8 sps:$4 sm:$0xff]  }
  0x15   :  { %v6791_v59 = vld [vmem:[%s9627_s0 + $0x1b4] ss:$8 sps:$4 sm:$0xff]   ;;  %v6799_v60 = vld [vmem:[%s9627_s0 + $0x1b0] ss:$8 sps:$4 sm:$0xff]   ;;  %v6804_v61 = vld [vmem:[%s9627_s0 + $0x1c4] ss:$8 sps:$4 sm:$0xff]  }
  0x17   :  { %5796 = vmatpush1.bf16.msra.mxu1 %v6088_v12  ;;  %825 = vmatpush1.bf16.msra.mxu0 %v6088_v12 }
  0x18   :  { %5788 = vmatprep.subr.bf16.mxu1 %v6089_v13  ;;  %826 = vmatprep.subr.bf16.mxu0 %v6089_v13 }
  0x1b   :  { %5797 = vmatpush1.bf16.msra.mxu1 %v6091_v14  ;;  %827 = vmatpush1.bf16.msra.mxu0 %v6091_v14 }
  0x1c   :  { %5789 = vmatprep.subr.bf16.mxu1 %v6092_v15  ;;  %828 = vmatprep.subr.bf16.mxu0 %v6092_v15 }
  0x1f   :  { %5798 = vmatpush1.bf16.msra.mxu1 %v6094_v16  ;;  %829 = vmatpush1.bf16.msra.mxu0 %v6094_v16 }
  0x20   :  { %5790 = vmatprep.subr.msk.bf16.mxu1 %vm807_vm1, %v6095_v17  ;;  %5150 = vmatprep.subr.msk.bf16.mxu0 %vm807_vm1, %v6095_v17 }
  0x23   :  { %5799 = vmatpush1.bf16.msra.mxu1 %v809_v19  ;;  %831 = vmatpush1.bf16.msra.mxu0 %v809_v19 }
  0x24   :  { %1440 = vmatprep.subr.bf16.mxu1 %v6103_v20 }
  0x26   :  { %997 = vmatmul.mubr.bf16.vlgmr.msra.gmra.mrb[0].mxu1 %v6098_v21 }
  0x27   :  { %1441 = vmatpush1.bf16.msra.mxu1 %v6101_v22  ;;  %5167 = vmatprep.mubr.msk.bf16.mxu1 %vm662_vm0, %v6104_v23 }
  0x28   :  { %1442 = vmatprep.subr.bf16.mxu1 %v6115_v24 }
  0x2b   :  { %1443 = vmatpush1.bf16.msra.mxu1 %v6113_v25 }
  0x2c   :  { %1444 = vmatprep.subr.bf16.mxu1 %v6130_v27 }
  0x2e   :  { %1007 = vmatmul.mubr.bf16.gmra.mrb[4].mxu1 %v6106_v26 }
  0x2f   :  { %5168 = vmatprep.mubr.msk.bf16.mxu1 %vm662_vm0, %v6107_v28  ;;  %1445 = vmatpush1.bf16.msra.mxu1 %v6128_v29 }
  0x30   :  { %1446 = vmatprep.subr.bf16.mxu1 %v6145_v30 }
  0x33   :  { %1447 = vmatpush1.bf16.msra.mxu1 %v6143_v31 }
  0x34   :  { %1448 = vmatprep.subr.bf16.mxu1 %v6157_v32 }
  0x36   :  { %1017 = vmatmul.mubr.bf16.gmra.mrb[8].mxu1 %v6109_v33 }
  0x37   :  { %5169 = vmatprep.mubr.msk.bf16.mxu1 %vm662_vm0, %v6110_v34  ;;  %1449 = vmatpush1.bf16.msra.mxu1 %v6155_v35 }
  0x38   :  { %1450 = vmatprep.subr.bf16.mxu1 %v6172_v36 }
  0x3b   :  { %1451 = vmatpush1.bf16.msra.mxu1 %v6170_v37 }
  0x3c   :  { %1452 = vmatprep.subr.bf16.mxu1 %v6187_v47 }
  0x3e   :  { %1027 = vmatmul.mubr.bf16.gmra.mrb[12].mxu1 %v6112_v38 }
  0x3f   :  { %5170 = vmatprep.mubr.msk.bf16.mxu1 %vm662_vm0, %v6116_v39  ;;  %1453 = vmatpush1.bf16.msra.mxu1 %v6185_v46 }
  0x40   :  { %1454 = vmatprep.subr.bf16.mxu1 %v6199_v55 }
  0x43   :  { %1455 = vmatpush1.bf16.msra.mxu1 %v6197_v54 }
  0x46   :  { %1037 = vmatmul.mubr.bf16.gmra.mrb[16].mxu1 %v6118_v40 }
  0x47   :  { %5171 = vmatprep.mubr.msk.bf16.mxu1 %vm662_vm0, %v6119_v41 }
  0x4e   :  { %1047 = vmatmul.mubr.bf16.gmra.mrb[20].mxu1 %v6121_v42 }
  0x4f   :  { %5172 = vmatprep.mubr.msk.bf16.mxu1 %vm662_vm0, %v6122_v43 }
  0x56   :  { %1057 = vmatmul.mubr.bf16.gmra.mrb[24].mxu1 %v6124_v44 }
  0x57   :  { %5173 = vmatprep.mubr.msk.bf16.mxu1 %vm662_vm0, %v6125_v45 }
  0x5e   :  { %1067 = vmatmul.mubr.bf16.gmra.mrb[28].mxu1 %v6127_v48 }
  0x5f   :  { %5174 = vmatprep.mubr.msk.bf16.mxu1 %vm662_vm0, %v6734_v49 }
  0x66   :  { %1077 = vmatmul.mubr.bf16.gmra.mrb[32].mxu1 %v6741_v50 }
  0x67   :  { %5175 = vmatprep.mubr.msk.bf16.mxu1 %vm662_vm0, %v6746_v51 }
  0x6e   :  { %1087 = vmatmul.mubr.bf16.gmra.mrb[36].mxu1 %v6754_v52 }
  0x6f   :  { %5176 = vmatprep.mubr.msk.bf16.mxu1 %vm662_vm0, %v6759_v53 }
  0x76   :  { %1097 = vmatmul.mubr.bf16.gmra.mrb[40].mxu1 %v6773_v56 }
  0x77   :  { %5177 = vmatprep.mubr.msk.bf16.mxu1 %vm662_vm0, %v6778_v57 }
  0x7e   :  { %1107 = vmatmul.mubr.bf16.gmra.mrb[44].mxu1 %v6786_v58 }
  0x7f   :  { %5178 = vmatprep.mubr.msk.bf16.mxu1 %vm662_vm0, %v6791_v59 }
  0x86   :  { %1117 = vmatmul.mubr.bf16.gmra.mrb[48].mxu1 %v6799_v60 }
  0x87   :  { %5179 = vmatprep.mubr.msk.bf16.mxu1 %vm662_vm0, %v6804_v61 }
  0x88   :  { %12 = vsyncpa [#allocation3], 0  ;;  %v6812_v62 = vld [vmem:[%s9627_s0 + $0x1c0] ss:$8 sps:$4 sm:$0xff]   ;;  %v6817_v63 = vld [vmem:[%s9627_s0 + $0x1d4] ss:$8 sps:$4 sm:$0xff]  }
  0x89   :  { %v6212_v0 = vld [vmem:[%s9628_s1 + $0x114] ss:$8 sps:$4 sm:$0x3f]   ;;  %v6828_v1 = vld [vmem:[%s9627_s0 + $0x1d0] ss:$8 sps:$4 sm:$0xff]   ;;  %vm2662_vm2 = vcmask 523264  }
  0x8a   :  { %v6214_v2 = vld [vmem:[%s9628_s1 + $0x110] ss:$8 sps:$4 sm:$0x3f]   ;;  %v6836_v3 = vld [vmem:[%s9627_s0 + $0x1e4] ss:$8 sps:$4 sm:$0xff]   ;;  %5235 = vmatprep.subr.msk.bf16.mxu1 %vm807_vm1, %v6212_v0  ;;  %s6533_s9 = smov [#allocation2]  }
  0x8b   :  { %v1435_v4 = vsel %vm807_vm1, %v6214_v2, 0  ;;  %v6846_v5 = vld [vmem:[%s9627_s0 + $0x1e0] ss:$8 sps:$4 sm:$0xff]   ;;  %v6851_v6 = vld [vmem:[%s9627_s0 + $0x1f4] ss:$8 sps:$4 sm:$0xff]   ;;  %s5025_s10 = sshll.u32 %s6533_s9, 4  ;;  %s5026_s10 = int_to_ptr.vmem [resolvable:$true] %s5025_s10 }
  0x8c   :  { %1457 = vmatpush1.bf16.msra.mxu1 %v1435_v4  ;;  %v6859_v7 = vld [vmem:[%s9627_s0 + $0x1f0] ss:$8 sps:$4 sm:$0xff]   ;;  %v6864_v8 = vld [vmem:[%s9627_s0 + $0x204] ss:$8 sps:$4 sm:$0xff]   ;;  %v6872_v9 = vld [vmem:[%s9627_s0 + $0x200] ss:$8 sps:$4 sm:$0xff]   ;;  %p6514_p1 = scmp.lt.s32.totalorder %s5026_s10, %s5026_s10 }
  0x8d   :  { %v6877_v10 = vld [vmem:[%s9627_s0 + $0x214] ss:$8 sps:$4 sm:$0xff]   ;;  %v6882_v11 = vld [vmem:[%s9627_s0 + $0x4] ss:$8 sps:$4 sm:$0xff]   ;;  %v6887_v12 = vld [vmem:[%s9627_s0] ss:$8 sps:$4 sm:$0xff]  }
  0x8e   :  { %1127 = vmatmul.mubr.bf16.gmra.mrb[52].mxu1 %v6812_v62  ;;  %5151 = vmatprep.mubr.msk.bf16.mxu0 %vm662_vm0, %v6882_v11  ;;  %v6898_v13 = vld [vmem:[%s9627_s0 + $0x210] ss:$8 sps:$4 sm:$0xff]   ;;  %v6903_v14 = vld [vmem:[%s9627_s0 + $0x224] ss:$8 sps:$4 sm:$0xff]   ;;  %v6908_v15 = vld [vmem:[%s9627_s0 + $0x14] ss:$8 sps:$4 sm:$0xff]  }
  0x8f   :  { %5180 = vmatprep.mubr.msk.bf16.mxu1 %vm662_vm0, %v6817_v63  ;;  %847 = vmatmul.mubr.bf16.vlgmr.msra.gmra.mrb[0].mxu0 %v6887_v12  ;;  %v6913_v16 = vld [vmem:[%s9627_s0 + $0x10] ss:$8 sps:$4 sm:$0xff]   ;;  %v6924_v17 = vld [vmem:[%s9627_s0 + $0x220] ss:$8 sps:$4 sm:$0xff]   ;;  %v6929_v18 = vld [vmem:[%s9627_s0 + $0x234] ss:$8 sps:$4 sm:$0xff]  }
  0x90   :  { %5152 = vmatprep.mubr.msk.bf16.mxu0 %vm662_vm0, %v6908_v15  ;;  %9798 = vst [vmem:[#allocation5_spill] sm:$0xff] %v6924_v17  ;;  %9799 = vst [vmem:[#allocation6_spill] sm:$0xff] %v6929_v18  ;;  %v6934_v19 = vld [vmem:[%s9627_s0 + $0x24] ss:$8 sps:$4 sm:$0xff]   ;;  %v6939_v20 = vld [vmem:[%s9627_s0 + $0x20] ss:$8 sps:$4 sm:$0xff]  }
  0x91   :  { %v6950_v21 = vld [vmem:[%s9627_s0 + $0x230] ss:$8 sps:$4 sm:$0xff]   ;;  %v6955_v22 = vld [vmem:[%s9627_s0 + $0x244] ss:$8 sps:$4 sm:$0xff]   ;;  %v6960_v23 = vld [vmem:[%s9627_s0 + $0x34] ss:$8 sps:$4 sm:$0xff]  }
  0x92   :  { %9800 = vst [vmem:[#allocation7_spill] sm:$0xff] %v6950_v21  ;;  %9801 = vst [vmem:[#allocation8_spill] sm:$0xff] %v6955_v22  ;;  %v6965_v24 = vld [vmem:[%s9627_s0 + $0x30] ss:$8 sps:$4 sm:$0xff]   ;;  %v6976_v25 = vld [vmem:[%s9627_s0 + $0x240] ss:$8 sps:$4 sm:$0xff]  }
  0x93   :  { %9802 = vst [vmem:[#allocation9_spill] sm:$0xff] %v6976_v25  ;;  %v6981_v26 = vld [vmem:[%s9627_s0 + $0x254] ss:$8 sps:$4 sm:$0xff]   ;;  %v6986_v27 = vld [vmem:[%s9627_s0 + $0x44] ss:$8 sps:$4 sm:$0xff]  }
  0x94   :  { %9803 = vst [vmem:[#allocation10_spill] sm:$0xff] %v6981_v26  ;;  %v6991_v28 = vld [vmem:[%s9627_s0 + $0x40] ss:$8 sps:$4 sm:$0xff]   ;;  %v7002_v29 = vld [vmem:[%s9627_s0 + $0x250] ss:$8 sps:$4 sm:$0xff]  }
  0x95   :  { %9804 = vst [vmem:[#allocation11_spill] sm:$0xff] %v7002_v29  ;;  %v7007_v30 = vld [vmem:[%s9627_s0 + $0x264] ss:$8 sps:$4 sm:$0xff]   ;;  %v7012_v31 = vld [vmem:[%s9627_s0 + $0x54] ss:$8 sps:$4 sm:$0xff]  }
  0x96   :  { %1137 = vmatmul.mubr.bf16.gmra.mrb[56].mxu1 %v6828_v1  ;;  %9805 = vst [vmem:[#allocation12_spill] sm:$0xff] %v7007_v30  ;;  %v7017_v32 = vld [vmem:[%s9627_s0 + $0x50] ss:$8 sps:$4 sm:$0xff]   ;;  %v7028_v33 = vld [vmem:[%s9627_s0 + $0x260] ss:$8 sps:$4 sm:$0xff]  }
  0x97   :  { %5181 = vmatprep.mubr.msk.bf16.mxu1 %vm662_vm0, %v6836_v3  ;;  %857 = vmatmul.mubr.bf16.gmra.mrb[4].mxu0 %v6913_v16  ;;  %9806 = vst [vmem:[#allocation13_spill] sm:$0xff] %v7028_v33  ;;  %v7033_v34 = vld [vmem:[%s9627_s0 + $0x274] ss:$8 sps:$4 sm:$0xff]   ;;  %v7038_v35 = vld [vmem:[%s9627_s0 + $0x64] ss:$8 sps:$4 sm:$0xff]  }
  0x98   :  { %5153 = vmatprep.mubr.msk.bf16.mxu0 %vm662_vm0, %v6934_v19  ;;  %9807 = vst [vmem:[#allocation14_spill] sm:$0xff] %v7033_v34  ;;  %v7043_v36 = vld [vmem:[%s9627_s0 + $0x60] ss:$8 sps:$4 sm:$0xff]   ;;  %v7054_v37 = vld [vmem:[%s9627_s0 + $0x270] ss:$8 sps:$4 sm:$0xff]  }
  0x99   :  { %9808 = vst [vmem:[#allocation15_spill] sm:$0xff] %v7054_v37  ;;  %v7059_v38 = vld [vmem:[%s9627_s0 + $0x284] ss:$8 sps:$4 sm:$0xff]   ;;  %v7064_v39 = vld [vmem:[%s9627_s0 + $0x74] ss:$8 sps:$4 sm:$0xff]  }
  0x9a   :  { %9809 = vst [vmem:[#allocation16_spill] sm:$0xff] %v7059_v38  ;;  %v7069_v40 = vld [vmem:[%s9627_s0 + $0x70] ss:$8 sps:$4 sm:$0xff]   ;;  %v7080_v41 = vld [vmem:[%s9627_s0 + $0x280] ss:$8 sps:$4 sm:$0xff]  }
  0x9b   :  { %9810 = vst [vmem:[#allocation17_spill] sm:$0xff] %v7080_v41  ;;  %v7085_v42 = vld [vmem:[%s9627_s0 + $0x294] ss:$8 sps:$4 sm:$0xff]   ;;  %v7090_v43 = vld [vmem:[%s9627_s0 + $0x84] ss:$8 sps:$4 sm:$0xff]  }
  0x9c   :  { %9811 = vst [vmem:[#allocation18_spill] sm:$0xff] %v7085_v42  ;;  %v7095_v44 = vld [vmem:[%s9627_s0 + $0x80] ss:$8 sps:$4 sm:$0xff]   ;;  %v7106_v45 = vld [vmem:[%s9627_s0 + $0x290] ss:$8 sps:$4 sm:$0xff]  }
  0x9d   :  { %9812 = vst [vmem:[#allocation19_spill] sm:$0xff] %v7106_v45  ;;  %v6203_v46 = vld [vmem:[%s9627_s0 + $0x2a4] ss:$8 sps:$4 sm:$0xff]   ;;  %v7114_v47 = vld [vmem:[%s9627_s0 + $0x94] ss:$8 sps:$4 sm:$0xff]  }
  0x9e   :  { %1147 = vmatmul.mubr.bf16.gmra.mrb[60].mxu1 %v6846_v5  ;;  %v7119_v48 = vld [vmem:[%s9627_s0 + $0x90] ss:$8 sps:$4 sm:$0xff]   ;;  %v6205_v0 = vld [vmem:[%s9627_s0 + $0x2a0] ss:$8 sps:$4 sm:$0xff]   ;;  %v6206_v4 = vld [vmem:[%s9627_s0 + $0x2b4] ss:$8 sps:$4 sm:$0xff]  }
  0x9f   :  { %5182 = vmatprep.mubr.msk.bf16.mxu1 %vm662_vm0, %v6851_v6  ;;  %867 = vmatmul.mubr.bf16.gmra.mrb[8].mxu0 %v6939_v20 }
  0xa0   :  { %5154 = vmatprep.mubr.msk.bf16.mxu0 %vm662_vm0, %v6960_v23 }
  0xa6   :  { %1157 = vmatmul.mubr.bf16.gmra.mrb[64].mxu1 %v6859_v7 }
  0xa7   :  { %5183 = vmatprep.mubr.msk.bf16.mxu1 %vm662_vm0, %v6864_v8  ;;  %877 = vmatmul.mubr.bf16.gmra.mrb[12].mxu0 %v6965_v24 }
  0xa8   :  { %5155 = vmatprep.mubr.msk.bf16.mxu0 %vm662_vm0, %v6986_v27 }
  0xae   :  { %1167 = vmatmul.mubr.bf16.gmra.mrb[68].mxu1 %v6872_v9 }
  0xaf   :  { %5184 = vmatprep.mubr.msk.bf16.mxu1 %vm662_vm0, %v6877_v10  ;;  %887 = vmatmul.mubr.bf16.gmra.mrb[16].mxu0 %v6991_v28 }
  0xb0   :  { %5156 = vmatprep.mubr.msk.bf16.mxu0 %vm662_vm0, %v7012_v31 }
  0xb6   :  { %1177 = vmatmul.mubr.bf16.gmra.mrb[72].mxu1 %v6898_v13 }
  0xb7   :  { %5185 = vmatprep.mubr.msk.bf16.mxu1 %vm662_vm0, %v6903_v14  ;;  %897 = vmatmul.mubr.bf16.gmra.mrb[20].mxu0 %v7017_v32 }
  0xb8   :  { %5157 = vmatprep.mubr.msk.bf16.mxu0 %vm662_vm0, %v7038_v35 }
  0xbe   :  { %1187 = vmatmul.mubr.bf16.gmra.mrb[76].mxu1 %v6924_v17 }
  0xbf   :  { %5186 = vmatprep.mubr.msk.bf16.mxu1 %vm662_vm0, %v6929_v18  ;;  %907 = vmatmul.mubr.bf16.gmra.mrb[24].mxu0 %v7043_v36 }
  0xc0   :  { %5158 = vmatprep.mubr.msk.bf16.mxu0 %vm662_vm0, %v7064_v39 }
  0xc6   :  { %1197 = vmatmul.mubr.bf16.gmra.mrb[80].mxu1 %v6950_v21 }
  0xc7   :  { %5187 = vmatprep.mubr.msk.bf16.mxu1 %vm662_vm0, %v6955_v22  ;;  %917 = vmatmul.mubr.bf16.gmra.mrb[28].mxu0 %v7069_v40 }
  0xc8   :  { %5159 = vmatprep.mubr.msk.bf16.mxu0 %vm662_vm0, %v7090_v43 }
  0xce   :  { %1207 = vmatmul.mubr.bf16.gmra.mrb[84].mxu1 %v6976_v25 }
  0xcf   :  { %5188 = vmatprep.mubr.msk.bf16.mxu1 %vm662_vm0, %v6981_v26  ;;  %927 = vmatmul.mubr.bf16.gmra.mrb[32].mxu0 %v7095_v44 }
  0xd0   :  { %5160 = vmatprep.mubr.msk.bf16.mxu0 %vm662_vm0, %v7114_v47 }
  0xd6   :  { %1217 = vmatmul.mubr.bf16.gmra.mrb[88].mxu1 %v7002_v29  ;;  %v6221_v29 = vld [vmem:[%s9627_s0 + $0x2f4] ss:$8 sps:$4 sm:$0xff]  }
  0xd7   :  { %5189 = vmatprep.mubr.msk.bf16.mxu1 %vm662_vm0, %v7007_v30  ;;  %937 = vmatmul.mubr.bf16.gmra.mrb[36].mxu0 %v7119_v48 }
  0xde   :  { %1227 = vmatmul.mubr.bf16.gmra.mrb[92].mxu1 %v7028_v33  ;;  %v6218_v33 = vld [vmem:[%s9627_s0 + $0x2e4] ss:$8 sps:$4 sm:$0xff]  }
  0xdf   :  { %5190 = vmatprep.mubr.msk.bf16.mxu1 %vm662_vm0, %v7033_v34 }
  0xe6   :  { %1237 = vmatmul.mubr.bf16.gmra.mrb[96].mxu1 %v7054_v37  ;;  %v6215_v37 = vld [vmem:[%s9627_s0 + $0x2d4] ss:$8 sps:$4 sm:$0xff]  }
  0xe7   :  { %5191 = vmatprep.mubr.msk.bf16.mxu1 %vm662_vm0, %v7059_v38 }
  0xee   :  { %1247 = vmatmul.mubr.bf16.gmra.mrb[100].mxu1 %v7080_v41  ;;  %v6209_v41 = vld [vmem:[%s9627_s0 + $0x2c4] ss:$8 sps:$4 sm:$0xff]  }
  0xef   :  { %5192 = vmatprep.mubr.msk.bf16.mxu1 %vm662_vm0, %v7085_v42 }
  0xf6   :  { %1257 = vmatmul.mubr.bf16.gmra.mrb[104].mxu1 %v7106_v45  ;;  %v7141_v45 = vld [vmem:[%s9627_s0 + $0xa4] ss:$8 sps:$4 sm:$0xff]  }
  0xf7   :  { %5193 = vmatprep.mubr.msk.bf16.mxu1 %vm662_vm0, %v6203_v46  ;;  %5161 = vmatprep.mubr.msk.bf16.mxu0 %vm662_vm0, %v7141_v45 }
  0xf9   :  { %v7126_v54 = vpop.f32.mrb[0].mxu1 }
  0xfa   :  { %9813 = vst [vmem:[#allocation20_spill] sm:$0xff] %v7126_v54  ;;  %v7128_v55 = vpop.f32.mrb[1].mxu1 }
  0xfb   :  { %9814 = vst [vmem:[#allocation21_spill] sm:$0xff] %v7128_v55  ;;  %v7133_v2 = vpop.f32.mrb[2].mxu1  ;;  %v7148_v55 = vld [vmem:[%s9627_s0 + $0xa0] ss:$8 sps:$4 sm:$0xff]  }
  0xfc   :  { %9815 = vst [vmem:[#allocation22_spill] sm:$0xff] %v7133_v2  ;;  %v7143_v46 = vpop.f32.mrb[3].mxu1  ;;  %947 = vmatmul.mubr.bf16.gmra.mrb[40].mxu0 %v7148_v55 }
  0xfd   :  { %9816 = vst [vmem:[#allocation23_spill] sm:$0xff] %v7143_v46  ;;  %v6208_v46 = vld [vmem:[%s9627_s0 + $0x2b0] ss:$8 sps:$4 sm:$0xff]  }
  0xfe   :  { %1267 = vmatmul.mubr.bf16.gmra.mrb[108].mxu1 %v6205_v0  ;;  %v7169_v0 = vld [vmem:[%s9627_s0 + $0xb4] ss:$8 sps:$4 sm:$0xff]  }
  0xff   :  { %5194 = vmatprep.mubr.msk.bf16.mxu1 %vm662_vm0, %v6206_v4  ;;  %5162 = vmatprep.mubr.msk.bf16.mxu0 %vm662_vm0, %v7169_v0 }
 0x101   :  { %v7154_v2 = vpop.f32.mrb[4].mxu1 }
 0x102   :  { %9817 = vst [vmem:[#allocation24_spill] sm:$0xff] %v7154_v2  ;;  %v7156_v54 = vpop.f32.mrb[5].mxu1 }
 0x103   :  { %9818 = vst [vmem:[#allocation25_spill] sm:$0xff] %v7156_v54  ;;  %v7161_v42 = vpop.f32.mrb[6].mxu1  ;;  %v7176_v54 = vld [vmem:[%s9627_s0 + $0xb0] ss:$8 sps:$4 sm:$0xff]  }
 0x104   :  { %9819 = vst [vmem:[#allocation26_spill] sm:$0xff] %v7161_v42  ;;  %v7171_v4 = vpop.f32.mrb[7].mxu1  ;;  %957 = vmatmul.mubr.bf16.gmra.mrb[44].mxu0 %v7176_v54 }
 0x105   :  { %9820 = vst [vmem:[#allocation27_spill] sm:$0xff] %v7171_v4  ;;  %v6211_v4 = vld [vmem:[%s9627_s0 + $0x2c0] ss:$8 sps:$4 sm:$0xff]  }
 0x106   :  { %1277 = vmatmul.mubr.bf16.gmra.mrb[112].mxu1 %v6208_v46  ;;  %v7197_v46 = vld [vmem:[%s9627_s0 + $0xc4] ss:$8 sps:$4 sm:$0xff]  }
 0x107   :  { %5195 = vmatprep.mubr.msk.bf16.mxu1 %vm662_vm0, %v6209_v41  ;;  %5163 = vmatprep.mubr.msk.bf16.mxu0 %vm662_vm0, %v7197_v46 }
 0x109   :  { %v7182_v42 = vpop.f32.mrb[8].mxu1 }
 0x10a   :  { %9821 = vst [vmem:[#allocation28_spill] sm:$0xff] %v7182_v42  ;;  %v7184_v2 = vpop.f32.mrb[9].mxu1 }
 0x10b   :  { %9822 = vst [vmem:[#allocation29_spill] sm:$0xff] %v7184_v2  ;;  %v7189_v38 = vpop.f32.mrb[10].mxu1  ;;  %v7204_v2 = vld [vmem:[%s9627_s0 + $0xc0] ss:$8 sps:$4 sm:$0xff]  }
 0x10c   :  { %9823 = vst [vmem:[#allocation30_spill] sm:$0xff] %v7189_v38  ;;  %v7199_v41 = vpop.f32.mrb[11].mxu1  ;;  %967 = vmatmul.mubr.bf16.gmra.mrb[48].mxu0 %v7204_v2 }
 0x10d   :  { %9824 = vst [vmem:[#allocation31_spill] sm:$0xff] %v7199_v41  ;;  %v6217_v41 = vld [vmem:[%s9627_s0 + $0x2d0] ss:$8 sps:$4 sm:$0xff]  }
 0x10e   :  { %1287 = vmatmul.mubr.bf16.gmra.mrb[116].mxu1 %v6211_v4  ;;  %v7225_v4 = vld [vmem:[%s9627_s0 + $0xd4] ss:$8 sps:$4 sm:$0xff]  }
 0x10f   :  { %5196 = vmatprep.mubr.msk.bf16.mxu1 %vm662_vm0, %v6215_v37  ;;  %5164 = vmatprep.mubr.msk.bf16.mxu0 %vm662_vm0, %v7225_v4 }
 0x111   :  { %v7210_v38 = vpop.f32.mrb[12].mxu1 }
 0x112   :  { %9825 = vst [vmem:[#allocation32_spill] sm:$0xff] %v7210_v38  ;;  %v7212_v42 = vpop.f32.mrb[13].mxu1 }
 0x113   :  { %9826 = vst [vmem:[#allocation33_spill] sm:$0xff] %v7212_v42  ;;  %v7217_v34 = vpop.f32.mrb[14].mxu1  ;;  %v7232_v42 = vld [vmem:[%s9627_s0 + $0xd0] ss:$8 sps:$4 sm:$0xff]  }
 0x114   :  { %9827 = vst [vmem:[#allocation34_spill] sm:$0xff] %v7217_v34  ;;  %v7227_v37 = vpop.f32.mrb[15].mxu1  ;;  %977 = vmatmul.mubr.bf16.gmra.mrb[52].mxu0 %v7232_v42 }
 0x115   :  { %9828 = vst [vmem:[#allocation35_spill] sm:$0xff] %v7227_v37  ;;  %v6220_v37 = vld [vmem:[%s9627_s0 + $0x2e0] ss:$8 sps:$4 sm:$0xff]  }
 0x116   :  { %1297 = vmatmul.mubr.bf16.gmra.mrb[120].mxu1 %v6217_v41  ;;  %v7253_v41 = vld [vmem:[%s9627_s0 + $0xe4] ss:$8 sps:$4 sm:$0xff]  }
 0x117   :  { %5197 = vmatprep.mubr.msk.bf16.mxu1 %vm662_vm0, %v6218_v33  ;;  %5165 = vmatprep.mubr.msk.bf16.mxu0 %vm662_vm0, %v7253_v41 }
 0x119   :  { %v7238_v34 = vpop.f32.mrb[16].mxu1 }
 0x11a   :  { %9829 = vst [vmem:[#allocation36_spill] sm:$0xff] %v7238_v34  ;;  %v7240_v38 = vpop.f32.mrb[17].mxu1 }
 0x11b   :  { %9830 = vst [vmem:[#allocation37_spill] sm:$0xff] %v7240_v38  ;;  %v7245_v30 = vpop.f32.mrb[18].mxu1  ;;  %v7260_v38 = vld [vmem:[%s9627_s0 + $0xe0] ss:$8 sps:$4 sm:$0xff]  }
 0x11c   :  { %9831 = vst [vmem:[#allocation38_spill] sm:$0xff] %v7245_v30  ;;  %v7255_v33 = vpop.f32.mrb[19].mxu1  ;;  %987 = vmatmul.mubr.bf16.gmra.mrb[56].mxu0 %v7260_v38 }
 0x11d   :  { %9832 = vst [vmem:[#allocation39_spill] sm:$0xff] %v7255_v33  ;;  %v6223_v33 = vld [vmem:[%s9627_s0 + $0x2f0] ss:$8 sps:$4 sm:$0xff]  }
 0x11e   :  { %1307 = vmatmul.mubr.bf16.gmra.mrb[124].mxu1 %v6220_v37 }
 0x11f   :  { %5198 = vmatprep.mubr.msk.bf16.mxu1 %vm662_vm0, %v6221_v29 }
 0x121   :  { %v7266_v30 = vpop.f32.mrb[20].mxu1 }
 0x122   :  { %9833 = vst [vmem:[#allocation40_spill] sm:$0xff] %v7266_v30  ;;  %v7268_v34 = vpop.f32.mrb[21].mxu1 }
 0x123   :  { %9834 = vst [vmem:[#allocation41_spill] sm:$0xff] %v7268_v34  ;;  %v7273_v26 = vpop.f32.mrb[22].mxu1 }
 0x124   :  { %9835 = vst [vmem:[#allocation42_spill] sm:$0xff] %v7273_v26  ;;  %v7275_v25 = vpop.f32.mrb[23].mxu1 }
 0x125   :  { %9836 = vst [vmem:[#allocation43_spill] sm:$0xff] %v7275_v25 }
 0x126   :  { %1317 = vmatmul.mubr.bf16.gmra.mrb[128].mxu1 %v6223_v33 }
 0x127   :  { %5236 = vmatprep.mubr.msk.bf16.mxu1 %vm662_vm0, %v6882_v11 }
 0x129   :  { %v7279_v37 = vpop.f32.mrb[24].mxu1 }
 0x12a   :  { %9837 = vst [vmem:[#allocation44_spill] sm:$0xff] %v7279_v37  ;;  %v7281_v22 = vpop.f32.mrb[25].mxu1 }
 0x12b   :  { %9838 = vst [vmem:[#allocation45_spill] sm:$0xff] %v7281_v22  ;;  %v7283_v29 = vpop.f32.mrb[26].mxu1 }
 0x12c   :  { %9839 = vst [vmem:[#allocation46_spill] sm:$0xff] %v7283_v29  ;;  %v7285_v30 = vpop.f32.mrb[27].mxu1 }
 0x12d   :  { %9840 = vst [vmem:[#allocation47_spill] sm:$0xff] %v7285_v30 }
 0x12e   :  { %1473 = vmatmul.mubr.bf16.vlgmr.msra.gmra.mrb[132].mxu1 %v6887_v12 }
 0x12f   :  { %5237 = vmatprep.mubr.msk.bf16.mxu1 %vm662_vm0, %v6908_v15 }
 0x131   :  { %v7290_v26 = vpop.f32.mrb[28].mxu1 }
 0x132   :  { %9841 = vst [vmem:[#allocation48_spill] sm:$0xff] %v7290_v26  ;;  %v7292_v25 = vpop.f32.mrb[29].mxu1 }
 0x133   :  { %9842 = vst [vmem:[#allocation49_spill] sm:$0xff] %v7292_v25  ;;  %v7294_v33 = vpop.f32.mrb[30].mxu1 }
 0x134   :  { %9843 = vst [vmem:[#allocation50_spill] sm:$0xff] %v7294_v33  ;;  %v7296_v11 = vpop.f32.mrb[31].mxu1 }
 0x135   :  { %9844 = vst [vmem:[#allocation51_spill] sm:$0xff] %v7296_v11 }
 0x136   :  { %1483 = vmatmul.mubr.bf16.gmra.mrb[136].mxu1 %v6913_v16 }
 0x137   :  { %5238 = vmatprep.mubr.msk.bf16.mxu1 %vm662_vm0, %v6934_v19 }
 0x139   :  { %v7301_v29 = vpop.f32.mrb[32].mxu1 }
 0x13a   :  { %9845 = vst [vmem:[#allocation52_spill] sm:$0xff] %v7301_v29  ;;  %v7303_v30 = vpop.f32.mrb[33].mxu1 }
 0x13b   :  { %9846 = vst [vmem:[#allocation53_spill] sm:$0xff] %v7303_v30  ;;  %v7305_v12 = vpop.f32.mrb[34].mxu1 }
 0x13c   :  { %9847 = vst [vmem:[#allocation54_spill] sm:$0xff] %v7305_v12  ;;  %v7307_v15 = vpop.f32.mrb[35].mxu1 }
 0x13d   :  { %9848 = vst [vmem:[#allocation55_spill] sm:$0xff] %v7307_v15 }
 0x13e   :  { %1493 = vmatmul.mubr.bf16.gmra.mrb[140].mxu1 %v6939_v20 }
 0x13f   :  { %5239 = vmatprep.mubr.msk.bf16.mxu1 %vm662_vm0, %v6960_v23 }
 0x141   :  { %v7312_v33 = vpop.f32.mrb[36].mxu1 }
 0x142   :  { %9849 = vst [vmem:[#allocation56_spill] sm:$0xff] %v7312_v33  ;;  %v7314_v11 = vpop.f32.mrb[37].mxu1 }
 0x143   :  { %9850 = vst [vmem:[#allocation57_spill] sm:$0xff] %v7314_v11  ;;  %v7316_v16 = vpop.f32.mrb[38].mxu1 }
 0x144   :  { %9851 = vst [vmem:[#allocation58_spill] sm:$0xff] %v7316_v16  ;;  %v7318_v19 = vpop.f32.mrb[39].mxu1 }
 0x145   :  { %9852 = vst [vmem:[#allocation59_spill] sm:$0xff] %v7318_v19 }
 0x146   :  { %1503 = vmatmul.mubr.bf16.gmra.mrb[144].mxu1 %v6965_v24 }
 0x147   :  { %5240 = vmatprep.mubr.msk.bf16.mxu1 %vm662_vm0, %v6986_v27 }
 0x149   :  { %v7323_v12 = vpop.f32.mrb[40].mxu1 }
 0x14a   :  { %9853 = vst [vmem:[#allocation60_spill] sm:$0xff] %v7323_v12  ;;  %v7325_v15 = vpop.f32.mrb[41].mxu1 }
 0x14b   :  { %9854 = vst [vmem:[#allocation61_spill] sm:$0xff] %v7325_v15  ;;  %v7327_v20 = vpop.f32.mrb[42].mxu1 }
 0x14c   :  { %9855 = vst [vmem:[#allocation62_spill] sm:$0xff] %v7327_v20  ;;  %v7329_v23 = vpop.f32.mrb[43].mxu1 }
 0x14d   :  { %9856 = vst [vmem:[#allocation63_spill] sm:$0xff] %v7329_v23 }
 0x14e   :  { %1513 = vmatmul.mubr.bf16.gmra.mrb[148].mxu1 %v6991_v28 }
 0x14f   :  { %5241 = vmatprep.mubr.msk.bf16.mxu1 %vm662_vm0, %v7012_v31 }
 0x151   :  { %v7334_v16 = vpop.f32.mrb[44].mxu1 }
 0x152   :  { %9857 = vst [vmem:[#allocation64_spill] sm:$0xff] %v7334_v16  ;;  %v7336_v19 = vpop.f32.mrb[45].mxu1 }
 0x153   :  { %9858 = vst [vmem:[#allocation65_spill] sm:$0xff] %v7336_v19  ;;  %v7338_v24 = vpop.f32.mrb[46].mxu1 }
 0x154   :  { %9859 = vst [vmem:[#allocation66_spill] sm:$0xff] %v7338_v24  ;;  %v7340_v27 = vpop.f32.mrb[47].mxu1 }
 0x155   :  { %9860 = vst [vmem:[#allocation67_spill] sm:$0xff] %v7340_v27 }
 0x156   :  { %1523 = vmatmul.mubr.bf16.gmra.mrb[152].mxu1 %v7017_v32 }
 0x157   :  { %5242 = vmatprep.mubr.msk.bf16.mxu1 %vm662_vm0, %v7038_v35 }
 0x159   :  { %v7345_v20 = vpop.f32.mrb[48].mxu1 }
 0x15a   :  { %9861 = vst [vmem:[#allocation68_spill] sm:$0xff] %v7345_v20  ;;  %v7347_v23 = vpop.f32.mrb[49].mxu1 }
 0x15b   :  { %9862 = vst [vmem:[#allocation69_spill] sm:$0xff] %v7347_v23  ;;  %v7349_v28 = vpop.f32.mrb[50].mxu1 }
 0x15c   :  { %9863 = vst [vmem:[#allocation70_spill] sm:$0xff] %v7349_v28  ;;  %v7351_v31 = vpop.f32.mrb[51].mxu1 }
 0x15d   :  { %9864 = vst [vmem:[#allocation71_spill] sm:$0xff] %v7351_v31 }
 0x15e   :  { %1533 = vmatmul.mubr.bf16.gmra.mrb[156].mxu1 %v7043_v36 }
 0x15f   :  { %5243 = vmatprep.mubr.msk.bf16.mxu1 %vm662_vm0, %v7064_v39 }
 0x161   :  { %v7356_v24 = vpop.f32.mrb[52].mxu1 }
 0x162   :  { %9865 = vst [vmem:[#allocation72_spill] sm:$0xff] %v7356_v24  ;;  %v7358_v27 = vpop.f32.mrb[53].mxu1 }
 0x163   :  { %9866 = vst [vmem:[#allocation73_spill] sm:$0xff] %v7358_v27  ;;  %v7360_v32 = vpop.f32.mrb[54].mxu1 }
 0x164   :  { %9867 = vst [vmem:[#allocation74_spill] sm:$0xff] %v7360_v32  ;;  %v7362_v35 = vpop.f32.mrb[55].mxu1 }
 0x165   :  { %9868 = vst [vmem:[#allocation75_spill] sm:$0xff] %v7362_v35 }
 0x166   :  { %1543 = vmatmul.mubr.bf16.gmra.mrb[160].mxu1 %v7069_v40 }
 0x167   :  { %5244 = vmatprep.mubr.msk.bf16.mxu1 %vm662_vm0, %v7090_v43 }
 0x169   :  { %v7367_v28 = vpop.f32.mrb[56].mxu1 }
 0x16a   :  { %9869 = vst [vmem:[#allocation76_spill] sm:$0xff] %v7367_v28  ;;  %v7369_v31 = vpop.f32.mrb[57].mxu1 }
 0x16b   :  { %9870 = vst [vmem:[#allocation77_spill] sm:$0xff] %v7369_v31  ;;  %v7371_v36 = vpop.f32.mrb[58].mxu1 }
 0x16c   :  { %9871 = vst [vmem:[#allocation78_spill] sm:$0xff] %v7371_v36  ;;  %v7373_v39 = vpop.f32.mrb[59].mxu1 }
 0x16d   :  { %9872 = vst [vmem:[#allocation79_spill] sm:$0xff] %v7373_v39 }
 0x16e   :  { %1553 = vmatmul.mubr.bf16.gmra.mrb[164].mxu1 %v7095_v44 }
 0x16f   :  { %5245 = vmatprep.mubr.msk.bf16.mxu1 %vm662_vm0, %v7114_v47 }
 0x171   :  { %v7378_v32 = vpop.f32.mrb[60].mxu1 }
 0x172   :  { %9873 = vst [vmem:[#allocation80_spill] sm:$0xff] %v7378_v32  ;;  %v7380_v35 = vpop.f32.mrb[61].mxu1 }
 0x173   :  { %9874 = vst [vmem:[#allocation81_spill] sm:$0xff] %v7380_v35  ;;  %v7382_v40 = vpop.f32.mrb[62].mxu1 }
 0x174   :  { %9875 = vst [vmem:[#allocation82_spill] sm:$0xff] %v7382_v40  ;;  %v7384_v43 = vpop.f32.mrb[63].mxu1 }
 0x175   :  { %9876 = vst [vmem:[#allocation83_spill] sm:$0xff] %v7384_v43  ;;  %v7402_v43 = vpop.f32.mrb[0].mxu0 }
 0x176   :  { %1563 = vmatmul.mubr.bf16.gmra.mrb[168].mxu1 %v7119_v48 }
 0x177   :  { %5246 = vmatprep.mubr.msk.bf16.mxu1 %vm662_vm0, %v7141_v45  ;;  %v7406_v45 = vpop.f32.mrb[1].mxu0 }
 0x179   :  { %v7389_v36 = vpop.f32.mrb[64].mxu1 }
 0x17a   :  { %9877 = vst [vmem:[#allocation84_spill] sm:$0xff] %v7389_v36  ;;  %v7391_v39 = vpop.f32.mrb[65].mxu1 }
 0x17b   :  { %9878 = vst [vmem:[#allocation85_spill] sm:$0xff] %v7391_v39  ;;  %v7393_v44 = vpop.f32.mrb[66].mxu1  ;;  %v7410_v39 = vpop.f32.mrb[2].mxu0 }
 0x17c   :  { %9879 = vst [vmem:[#allocation86_spill] sm:$0xff] %v7393_v44  ;;  %v7395_v47 = vpop.f32.mrb[67].mxu1 }
 0x17d   :  { %9880 = vst [vmem:[#allocation87_spill] sm:$0xff] %v7395_v47  ;;  %v7414_v47 = vpop.f32.mrb[3].mxu0 }
 0x17e   :  { %1573 = vmatmul.mubr.bf16.gmra.mrb[172].mxu1 %v7148_v55 }
 0x17f   :  { %5247 = vmatprep.mubr.msk.bf16.mxu1 %vm662_vm0, %v7169_v0  ;;  %v7421_v0 = vpop.f32.mrb[4].mxu0 }
 0x181   :  { %v7400_v40 = vpop.f32.mrb[68].mxu1 }
 0x182   :  { %9881 = vst [vmem:[#allocation88_spill] sm:$0xff] %v7400_v40  ;;  %v7404_v48 = vpop.f32.mrb[69].mxu1  ;;  %v7425_v40 = vpop.f32.mrb[5].mxu0 }
 0x183   :  { %9882 = vst [vmem:[#allocation89_spill] sm:$0xff] %v7404_v48  ;;  %v7408_v36 = vpop.f32.mrb[70].mxu1  ;;  %v7429_v35 = vpop.f32.mrb[6].mxu0 }
 0x184   :  { %9883 = vst [vmem:[#allocation90_spill] sm:$0xff] %v7408_v36  ;;  %v7412_v44 = vpop.f32.mrb[71].mxu1  ;;  %v7433_v32 = vpop.f32.mrb[7].mxu0 }
 0x185   :  { %9884 = vst [vmem:[#allocation91_spill] sm:$0xff] %v7412_v44 }
 0x186   :  { %1583 = vmatmul.mubr.bf16.gmra.mrb[176].mxu1 %v7176_v54 }
 0x187   :  { %5248 = vmatprep.mubr.msk.bf16.mxu1 %vm662_vm0, %v7197_v46  ;;  %v7440_v46 = vpop.f32.mrb[8].mxu0 }
 0x189   :  { %v7419_v55 = vpop.f32.mrb[72].mxu1 }
 0x18a   :  { %9885 = vst [vmem:[#allocation92_spill] sm:$0xff] %v7419_v55  ;;  %v7423_v48 = vpop.f32.mrb[73].mxu1  ;;  %v7444_v55 = vpop.f32.mrb[9].mxu0 }
 0x18b   :  { %9886 = vst [vmem:[#allocation93_spill] sm:$0xff] %v7423_v48  ;;  %v7427_v36 = vpop.f32.mrb[74].mxu1  ;;  %v7448_v31 = vpop.f32.mrb[10].mxu0 }
 0x18c   :  { %9887 = vst [vmem:[#allocation94_spill] sm:$0xff] %v7427_v36  ;;  %v7431_v44 = vpop.f32.mrb[75].mxu1  ;;  %v7452_v28 = vpop.f32.mrb[11].mxu0 }
 0x18d   :  { %9888 = vst [vmem:[#allocation95_spill] sm:$0xff] %v7431_v44 }
 0x18e   :  { %1593 = vmatmul.mubr.bf16.gmra.mrb[180].mxu1 %v7204_v2 }
 0x18f   :  { %5249 = vmatprep.mubr.msk.bf16.mxu1 %vm662_vm0, %v7225_v4  ;;  %v7459_v4 = vpop.f32.mrb[12].mxu0 }
 0x191   :  { %v7438_v54 = vpop.f32.mrb[76].mxu1 }
 0x192   :  { %9889 = vst [vmem:[#allocation96_spill] sm:$0xff] %v7438_v54  ;;  %v7442_v48 = vpop.f32.mrb[77].mxu1  ;;  %v7463_v54 = vpop.f32.mrb[13].mxu0 }
 0x193   :  { %9890 = vst [vmem:[#allocation97_spill] sm:$0xff] %v7442_v48  ;;  %v7446_v36 = vpop.f32.mrb[78].mxu1  ;;  %v7467_v27 = vpop.f32.mrb[14].mxu0 }
 0x194   :  { %9891 = vst [vmem:[#allocation98_spill] sm:$0xff] %v7446_v36  ;;  %v7450_v44 = vpop.f32.mrb[79].mxu1  ;;  %v7471_v24 = vpop.f32.mrb[15].mxu0 }
 0x195   :  { %9892 = vst [vmem:[#allocation99_spill] sm:$0xff] %v7450_v44 }
 0x196   :  { %1603 = vmatmul.mubr.bf16.gmra.mrb[184].mxu1 %v7232_v42  ;;  %v6481_v42 = vld [vmem:[%s9627_s0 + $0xf4] ss:$8 sps:$4 sm:$0xff]  }
 0x197   :  { %5250 = vmatprep.mubr.msk.bf16.mxu1 %vm662_vm0, %v7253_v41 }
 0x199   :  { %v7457_v2 = vpop.f32.mrb[80].mxu1 }
 0x19a   :  { %9893 = vst [vmem:[#allocation100_spill] sm:$0xff] %v7457_v2  ;;  %v7461_v48 = vpop.f32.mrb[81].mxu1 }
 0x19b   :  { %9894 = vst [vmem:[#allocation101_spill] sm:$0xff] %v7461_v48  ;;  %v7465_v36 = vpop.f32.mrb[82].mxu1  ;;  %v7480_v48 = vpop.f32.mrb[16].mxu0 }
 0x19c   :  { %9895 = vst [vmem:[#allocation102_spill] sm:$0xff] %v7465_v36  ;;  %v7469_v44 = vpop.f32.mrb[83].mxu1  ;;  %v7484_v36 = vpop.f32.mrb[17].mxu0 }
 0x19d   :  { %9896 = vst [vmem:[#allocation103_spill] sm:$0xff] %v7469_v44  ;;  %v7488_v44 = vpop.f32.mrb[18].mxu0 }
 0x19e   :  { %1613 = vmatmul.mubr.bf16.gmra.mrb[188].mxu1 %v7260_v38  ;;  %v7492_v38 = vpop.f32.mrb[19].mxu0 }
 0x19f   :  { %5251 = vmatprep.mubr.msk.bf16.mxu1 %vm662_vm0, %v6481_v42  ;;  %v6482_v42 = vld [vmem:[%s9627_s0 + $0xf0] ss:$8 sps:$4 sm:$0xff]  }
 0x1a1   :  { %v7478_v41 = vpop.f32.mrb[84].mxu1 }
 0x1a2   :  { %9897 = vst [vmem:[#allocation104_spill] sm:$0xff] %v7478_v41  ;;  %v7482_v2 = vpop.f32.mrb[85].mxu1  ;;  %v6483_v41 = vld [vmem:[%s9627_s0 + $0x104] ss:$8 sps:$4 sm:$0xff]  }
 0x1a3   :  { %9898 = vst [vmem:[#allocation105_spill] sm:$0xff] %v7482_v2  ;;  %v7486_v23 = vpop.f32.mrb[86].mxu1 }
 0x1a4   :  { %9899 = vst [vmem:[#allocation106_spill] sm:$0xff] %v7486_v23  ;;  %v7490_v20 = vpop.f32.mrb[87].mxu1  ;;  %v7503_v23 = vpop.f32.mrb[20].mxu0 }
 0x1a5   :  { %9900 = vst [vmem:[#allocation107_spill] sm:$0xff] %v7490_v20  ;;  %v7507_v20 = vpop.f32.mrb[21].mxu0 }
 0x1a6   :  { %1623 = vmatmul.mubr.bf16.gmra.mrb[192].mxu1 %v6482_v42  ;;  %v7511_v15 = vpop.f32.mrb[22].mxu0 }
 0x1a7   :  { %5252 = vmatprep.mubr.msk.bf16.mxu1 %vm662_vm0, %v6483_v41  ;;  %v7515_v42 = vpop.f32.mrb[23].mxu0  ;;  %v6484_v41 = vld [vmem:[%s9627_s0 + $0x100] ss:$8 sps:$4 sm:$0xff]  }
 0x1a9   :  { %v7501_v2 = vpop.f32.mrb[88].mxu1 }
 0x1aa   :  { %9901 = vst [vmem:[#allocation108_spill] sm:$0xff] %v7501_v2  ;;  %v7505_v19 = vpop.f32.mrb[89].mxu1  ;;  %v6485_v2 = vld [vmem:[%s9627_s0 + $0x114] ss:$8 sps:$4 sm:$0xff]  }
 0x1ab   :  { %9902 = vst [vmem:[#allocation109_spill] sm:$0xff] %v7505_v19  ;;  %v7509_v16 = vpop.f32.mrb[90].mxu1 }
 0x1ac   :  { %9903 = vst [vmem:[#allocation110_spill] sm:$0xff] %v7509_v16  ;;  %v7513_v12 = vpop.f32.mrb[91].mxu1  ;;  %v7526_v16 = vpop.f32.mrb[24].mxu0 }
 0x1ad   :  { %9904 = vst [vmem:[#allocation111_spill] sm:$0xff] %v7513_v12  ;;  %v7530_v12 = vpop.f32.mrb[25].mxu0 }
 0x1ae   :  { %1633 = vmatmul.mubr.bf16.gmra.mrb[196].mxu1 %v6484_v41  ;;  %9907 = vst [vmem:[#allocation114_spill] sm:$0xff] %v7530_v12  ;;  %v7534_v30 = vpop.f32.mrb[26].mxu0 }
 0x1af   :  { %5253 = vmatprep.mubr.msk.bf16.mxu1 %vm662_vm0, %v6485_v2  ;;  %9909 = vst [vmem:[#allocation116_spill] sm:$0xff] %v7534_v30  ;;  %v7538_v41 = vpop.f32.mrb[27].mxu0  ;;  %v6486_v2 = vld [vmem:[%s9627_s0 + $0x110] ss:$8 sps:$4 sm:$0xff]  }
 0x1b0   :  { %9911 = vst [vmem:[#allocation118_spill] sm:$0xff] %v7538_v41  ;;  %v2145_v41 = vld [vmem:[%s9629_s2] sm:$0x3] }
 0x1b1   :  { %v7524_v19 = vpop.f32.mrb[92].mxu1 }
 0x1b2   :  { %9905 = vst [vmem:[#allocation112_spill] sm:$0xff] %v7524_v19  ;;  %v7528_v11 = vpop.f32.mrb[93].mxu1  ;;  %v6487_v19 = vld [vmem:[%s9627_s0 + $0x124] ss:$8 sps:$4 sm:$0xff]  }
 0x1b3   :  { %9906 = vst [vmem:[#allocation113_spill] sm:$0xff] %v7528_v11  ;;  %v7532_v33 = vpop.f32.mrb[94].mxu1 }
 0x1b4   :  { %9908 = vst [vmem:[#allocation115_spill] sm:$0xff] %v7532_v33  ;;  %v7536_v29 = vpop.f32.mrb[95].mxu1  ;;  %v7549_v33 = vpop.f32.mrb[28].mxu0 }
 0x1b5   :  { %9910 = vst [vmem:[#allocation117_spill] sm:$0xff] %v7536_v29  ;;  %9913 = vst [vmem:[#allocation120_spill] sm:$0xff] %v7549_v33  ;;  %v7553_v29 = vpop.f32.mrb[29].mxu0 }
 0x1b6   :  { %1643 = vmatmul.mubr.bf16.gmra.mrb[200].mxu1 %v6486_v2  ;;  %9915 = vst [vmem:[#allocation122_spill] sm:$0xff] %v7553_v29  ;;  %v7557_v22 = vpop.f32.mrb[30].mxu0  ;;  %v10011_v29 = vld [vmem:[#allocation10_spill] sm:$0xff] }
 0x1b7   :  { %5254 = vmatprep.mubr.msk.bf16.mxu1 %vm662_vm0, %v6487_v19  ;;  %9917 = vst [vmem:[#allocation124_spill] sm:$0xff] %v7557_v22  ;;  %v7561_v2 = vpop.f32.mrb[31].mxu0  ;;  %v6488_v19 = vld [vmem:[%s9627_s0 + $0x120] ss:$8 sps:$4 sm:$0xff]   ;;  %v10001_v22 = vld [vmem:[#allocation8_spill] sm:$0xff] }
 0x1b8   :  { %9919 = vst [vmem:[#allocation126_spill] sm:$0xff] %v7561_v2  ;;  %v2195_v2 = vlaneseq }
 0x1b9   :  { %v7547_v11 = vpop.f32.mrb[96].mxu1 }
 0x1ba   :  { %9912 = vst [vmem:[#allocation119_spill] sm:$0xff] %v7547_v11  ;;  %v7551_v25 = vpop.f32.mrb[97].mxu1  ;;  %v6489_v11 = vld [vmem:[%s9627_s0 + $0x134] ss:$8 sps:$4 sm:$0xff]  }
 0x1bb   :  { %9914 = vst [vmem:[#allocation121_spill] sm:$0xff] %v7551_v25  ;;  %v7555_v26 = vpop.f32.mrb[98].mxu1 }
 0x1bc   :  { %9916 = vst [vmem:[#allocation123_spill] sm:$0xff] %v7555_v26  ;;  %v7559_v37 = vpop.f32.mrb[99].mxu1  ;;  %v7572_v26 = vpop.f32.mrb[32].mxu0 }
 0x1bd   :  { %9918 = vst [vmem:[#allocation125_spill] sm:$0xff] %v7559_v37  ;;  %9921 = vst [vmem:[#allocation128_spill] sm:$0xff] %v7572_v26  ;;  %v7576_v37 = vpop.f32.mrb[33].mxu0 }
 0x1be   :  { %1653 = vmatmul.mubr.bf16.gmra.mrb[204].mxu1 %v6488_v19  ;;  %9923 = vst [vmem:[#allocation130_spill] sm:$0xff] %v7576_v37  ;;  %v7580_v18 = vpop.f32.mrb[34].mxu0 }
 0x1bf   :  { %5255 = vmatprep.mubr.msk.bf16.mxu1 %vm662_vm0, %v6489_v11  ;;  %9925 = vst [vmem:[#allocation132_spill] sm:$0xff] %v7580_v18  ;;  %v7584_v19 = vpop.f32.mrb[35].mxu0  ;;  %v6490_v11 = vld [vmem:[%s9627_s0 + $0x130] ss:$8 sps:$4 sm:$0xff]  }
 0x1c0   :  { %9927 = vst [vmem:[#allocation134_spill] sm:$0xff] %v7584_v19 }
 0x1c1   :  { %v7570_v25 = vpop.f32.mrb[100].mxu1 }
 0x1c2   :  { %9920 = vst [vmem:[#allocation127_spill] sm:$0xff] %v7570_v25  ;;  %v7574_v34 = vpop.f32.mrb[101].mxu1  ;;  %v6491_v25 = vld [vmem:[%s9627_s0 + $0x144] ss:$8 sps:$4 sm:$0xff]  }
 0x1c3   :  { %9922 = vst [vmem:[#allocation129_spill] sm:$0xff] %v7574_v34  ;;  %v7578_v21 = vpop.f32.mrb[102].mxu1 }
 0x1c4   :  { %9924 = vst [vmem:[#allocation131_spill] sm:$0xff] %v7578_v21  ;;  %v7582_v17 = vpop.f32.mrb[103].mxu1  ;;  %v7595_v21 = vpop.f32.mrb[36].mxu0 }
 0x1c5   :  { %9926 = vst [vmem:[#allocation133_spill] sm:$0xff] %v7582_v17  ;;  %9929 = vst [vmem:[#allocation136_spill] sm:$0xff] %v7595_v21  ;;  %v7599_v17 = vpop.f32.mrb[37].mxu0 }
 0x1c6   :  { %1663 = vmatmul.mubr.bf16.gmra.mrb[208].mxu1 %v6490_v11  ;;  %9931 = vst [vmem:[#allocation138_spill] sm:$0xff] %v7599_v17  ;;  %v7603_v37 = vpop.f32.mrb[38].mxu0 }
 0x1c7   :  { %5256 = vmatprep.mubr.msk.bf16.mxu1 %vm662_vm0, %v6491_v25  ;;  %9933 = vst [vmem:[#allocation140_spill] sm:$0xff] %v7603_v37  ;;  %v7607_v11 = vpop.f32.mrb[39].mxu0  ;;  %v6492_v25 = vld [vmem:[%s9627_s0 + $0x140] ss:$8 sps:$4 sm:$0xff]  }
 0x1c8   :  { %9935 = vst [vmem:[#allocation142_spill] sm:$0xff] %v7607_v11 }
 0x1c9   :  { %v7593_v34 = vpop.f32.mrb[104].mxu1 }
 0x1ca   :  { %9928 = vst [vmem:[#allocation135_spill] sm:$0xff] %v7593_v34  ;;  %v7597_v18 = vpop.f32.mrb[105].mxu1  ;;  %v6493_v34 = vld [vmem:[%s9627_s0 + $0x154] ss:$8 sps:$4 sm:$0xff]  }
 0x1cb   :  { %9930 = vst [vmem:[#allocation137_spill] sm:$0xff] %v7597_v18  ;;  %v7601_v19 = vpop.f32.mrb[106].mxu1 }
 0x1cc   :  { %9932 = vst [vmem:[#allocation139_spill] sm:$0xff] %v7601_v19  ;;  %v7605_v26 = vpop.f32.mrb[107].mxu1 }
 0x1cd   :  { %9934 = vst [vmem:[#allocation141_spill] sm:$0xff] %v7605_v26 }
 0x1ce   :  { %1673 = vmatmul.mubr.bf16.gmra.mrb[212].mxu1 %v6492_v25 }
 0x1cf   :  { %5257 = vmatprep.mubr.msk.bf16.mxu1 %vm662_vm0, %v6493_v34  ;;  %v7618_v19 = vpop.f32.mrb[40].mxu0  ;;  %v6494_v34 = vld [vmem:[%s9627_s0 + $0x150] ss:$8 sps:$4 sm:$0xff]  }
 0x1d0   :  { %9937 = vst [vmem:[#allocation144_spill] sm:$0xff] %v7618_v19  ;;  %v7622_v26 = vpop.f32.mrb[41].mxu0 }
 0x1d1   :  { %v7616_v18 = vpop.f32.mrb[108].mxu1  ;;  %9939 = vst [vmem:[#allocation146_spill] sm:$0xff] %v7622_v26  ;;  %v7626_v17 = vpop.f32.mrb[42].mxu0 }
 0x1d2   :  { %9936 = vst [vmem:[#allocation143_spill] sm:$0xff] %v7616_v18  ;;  %v7620_v37 = vpop.f32.mrb[109].mxu1  ;;  %9941 = vst [vmem:[#allocation148_spill] sm:$0xff] %v7626_v17  ;;  %v7630_v25 = vpop.f32.mrb[43].mxu0  ;;  %v6495_v18 = vld [vmem:[%s9627_s0 + $0x164] ss:$8 sps:$4 sm:$0xff]  }
 0x1d3   :  { %9938 = vst [vmem:[#allocation145_spill] sm:$0xff] %v7620_v37  ;;  %v7624_v11 = vpop.f32.mrb[110].mxu1  ;;  %9943 = vst [vmem:[#allocation150_spill] sm:$0xff] %v7630_v25 }
 0x1d4   :  { %9940 = vst [vmem:[#allocation147_spill] sm:$0xff] %v7624_v11  ;;  %v7628_v21 = vpop.f32.mrb[111].mxu1 }
 0x1d5   :  { %9942 = vst [vmem:[#allocation149_spill] sm:$0xff] %v7628_v21 }
 0x1d6   :  { %1683 = vmatmul.mubr.bf16.gmra.mrb[216].mxu1 %v6494_v34 }
 0x1d7   :  { %5258 = vmatprep.mubr.msk.bf16.mxu1 %vm662_vm0, %v6495_v18  ;;  %v7641_v11 = vpop.f32.mrb[44].mxu0  ;;  %v6496_v18 = vld [vmem:[%s9627_s0 + $0x160] ss:$8 sps:$4 sm:$0xff]  }
 0x1d8   :  { %9945 = vst [vmem:[#allocation152_spill] sm:$0xff] %v7641_v11  ;;  %v7645_v21 = vpop.f32.mrb[45].mxu0 }
 0x1d9   :  { %v7639_v37 = vpop.f32.mrb[112].mxu1  ;;  %9947 = vst [vmem:[#allocation154_spill] sm:$0xff] %v7645_v21  ;;  %v7649_v26 = vpop.f32.mrb[46].mxu0 }
 0x1da   :  { %9944 = vst [vmem:[#allocation151_spill] sm:$0xff] %v7639_v37  ;;  %v7643_v17 = vpop.f32.mrb[113].mxu1  ;;  %9949 = vst [vmem:[#allocation156_spill] sm:$0xff] %v7649_v26  ;;  %v7653_v34 = vpop.f32.mrb[47].mxu0 }
 0x1db   :  { %9946 = vst [vmem:[#allocation153_spill] sm:$0xff] %v7643_v17  ;;  %v7647_v25 = vpop.f32.mrb[114].mxu1  ;;  %9951 = vst [vmem:[#allocation158_spill] sm:$0xff] %v7653_v34 }
 0x1dc   :  { %9948 = vst [vmem:[#allocation155_spill] sm:$0xff] %v7647_v25  ;;  %v7651_v19 = vpop.f32.mrb[115].mxu1 }
 0x1dd   :  { %9950 = vst [vmem:[#allocation157_spill] sm:$0xff] %v7651_v19 }
 0x1de   :  { %1693 = vmatmul.mubr.bf16.gmra.mrb[220].mxu1 %v6496_v18 }
 0x1df   :  { %5259 = vmatprep.mubr.msk.bf16.mxu1 %vm662_vm0, %v6734_v49  ;;  %v7662_v17 = vpop.f32.mrb[48].mxu0 }
 0x1e0   :  { %v7666_v25 = vpop.f32.mrb[49].mxu0 }
 0x1e1   :  { %v7660_v37 = vpop.f32.mrb[116].mxu1  ;;  %v7670_v19 = vpop.f32.mrb[50].mxu0 }
 0x1e2   :  { %9952 = vst [vmem:[#allocation159_spill] sm:$0xff] %v7660_v37  ;;  %v7664_v21 = vpop.f32.mrb[117].mxu1  ;;  %9955 = vst [vmem:[#allocation162_spill] sm:$0xff] %v7670_v19  ;;  %v7674_v11 = vpop.f32.mrb[51].mxu0 }
 0x1e3   :  { %9953 = vst [vmem:[#allocation160_spill] sm:$0xff] %v7664_v21  ;;  %v7668_v26 = vpop.f32.mrb[118].mxu1  ;;  %9957 = vst [vmem:[#allocation164_spill] sm:$0xff] %v7674_v11 }
 0x1e4   :  { %9954 = vst [vmem:[#allocation161_spill] sm:$0xff] %v7668_v26  ;;  %v7672_v34 = vpop.f32.mrb[119].mxu1 }
 0x1e5   :  { %9956 = vst [vmem:[#allocation163_spill] sm:$0xff] %v7672_v34 }
 0x1e6   :  { %1703 = vmatmul.mubr.bf16.gmra.mrb[224].mxu1 %v6741_v50 }
 0x1e7   :  { %5260 = vmatprep.mubr.msk.bf16.mxu1 %vm662_vm0, %v6746_v51  ;;  %v7681_v18 = vpop.f32.mrb[52].mxu0 }
 0x1e8   :  { %v7685_v37 = vpop.f32.mrb[53].mxu0 }
 0x1e9   :  { %v7679_v49 = vpop.f32.mrb[120].mxu1  ;;  %v7689_v19 = vpop.f32.mrb[54].mxu0 }
 0x1ea   :  { %9958 = vst [vmem:[#allocation165_spill] sm:$0xff] %v7679_v49  ;;  %v7683_v21 = vpop.f32.mrb[121].mxu1  ;;  %9961 = vst [vmem:[#allocation168_spill] sm:$0xff] %v7689_v19  ;;  %v7693_v11 = vpop.f32.mrb[55].mxu0 }
 0x1eb   :  { %9959 = vst [vmem:[#allocation166_spill] sm:$0xff] %v7683_v21  ;;  %v7687_v26 = vpop.f32.mrb[122].mxu1  ;;  %9963 = vst [vmem:[#allocation170_spill] sm:$0xff] %v7693_v11 }
 0x1ec   :  { %9960 = vst [vmem:[#allocation167_spill] sm:$0xff] %v7687_v26  ;;  %v7691_v34 = vpop.f32.mrb[123].mxu1 }
 0x1ed   :  { %9962 = vst [vmem:[#allocation169_spill] sm:$0xff] %v7691_v34 }
 0x1ee   :  { %1713 = vmatmul.mubr.bf16.gmra.mrb[228].mxu1 %v6754_v52 }
 0x1ef   :  { %5261 = vmatprep.mubr.msk.bf16.mxu1 %vm662_vm0, %v6759_v53  ;;  %v7700_v51 = vpop.f32.mrb[56].mxu0 }
 0x1f0   :  { %v7704_v49 = vpop.f32.mrb[57].mxu0 }
 0x1f1   :  { %v7698_v50 = vpop.f32.mrb[124].mxu1  ;;  %9966 = vst [vmem:[#allocation173_spill] sm:$0xff] %v7704_v49  ;;  %v7708_v19 = vpop.f32.mrb[58].mxu0 }
 0x1f2   :  { %9964 = vst [vmem:[#allocation171_spill] sm:$0xff] %v7698_v50  ;;  %v7702_v21 = vpop.f32.mrb[125].mxu1  ;;  %9968 = vst [vmem:[#allocation175_spill] sm:$0xff] %v7708_v19  ;;  %v7712_v11 = vpop.f32.mrb[59].mxu0 }
 0x1f3   :  { %9965 = vst [vmem:[#allocation172_spill] sm:$0xff] %v7702_v21  ;;  %v7706_v26 = vpop.f32.mrb[126].mxu1  ;;  %9970 = vst [vmem:[#allocation177_spill] sm:$0xff] %v7712_v11 }
 0x1f4   :  { %9967 = vst [vmem:[#allocation174_spill] sm:$0xff] %v7706_v26  ;;  %v7710_v34 = vpop.f32.mrb[127].mxu1 }
 0x1f5   :  { %9969 = vst [vmem:[#allocation176_spill] sm:$0xff] %v7710_v34 }
 0x1f6   :  { %1723 = vmatmul.mubr.bf16.gmra.mrb[232].mxu1 %v6773_v56 }
 0x1f7   :  { %5262 = vmatprep.mubr.msk.bf16.mxu1 %vm662_vm0, %v6778_v57 }
 0x1f9   :  { %v7717_v52 = vpop.f32.mrb[128].mxu1 }
 0x1fa   :  { %9971 = vst [vmem:[#allocation178_spill] sm:$0xff] %v7717_v52  ;;  %v7719_v53 = vpop.f32.mrb[129].mxu1 }
 0x1fb   :  { %9972 = vst [vmem:[#allocation179_spill] sm:$0xff] %v7719_v53  ;;  %v7721_v21 = vpop.f32.mrb[130].mxu1 }
 0x1fc   :  { %9973 = vst [vmem:[#allocation180_spill] sm:$0xff] %v7721_v21  ;;  %v7723_v50 = vpop.f32.mrb[131].mxu1 }
 0x1fd   :  { %9974 = vst [vmem:[#allocation181_spill] sm:$0xff] %v7723_v50 }
 0x1fe   :  { %1733 = vmatmul.mubr.bf16.gmra.mrb[236].mxu1 %v6786_v58 }
 0x1ff   :  { %5263 = vmatprep.mubr.msk.bf16.mxu1 %vm662_vm0, %v6791_v59 }
 0x201   :  { %v7728_v34 = vpop.f32.mrb[132].mxu1 }
 0x202   :  { %v7732_v26 = vpop.f32.mrb[133].mxu1 }
 0x203   :  { %v7736_v53 = vpop.f32.mrb[134].mxu1 }
 0x204   :  { %v7740_v21 = vpop.f32.mrb[135].mxu1 }
 0x206   :  { %1743 = vmatmul.mubr.bf16.gmra.mrb[240].mxu1 %v6799_v60 }
 0x207   :  { %5264 = vmatprep.mubr.msk.bf16.mxu1 %vm662_vm0, %v6804_v61 }
 0x209   :  { %v7747_v59 = vpop.f32.mrb[136].mxu1 }
 0x20a   :  { %v7751_v56 = vpop.f32.mrb[137].mxu1 }
 0x20b   :  { %v7755_v52 = vpop.f32.mrb[138].mxu1 }
 0x20c   :  { %v7759_v11 = vpop.f32.mrb[139].mxu1 }
 0x20e   :  { %1753 = vmatmul.mubr.bf16.gmra.mrb[244].mxu1 %v6812_v62 }
 0x20f   :  { %5265 = vmatprep.mubr.msk.bf16.mxu1 %vm662_vm0, %v6817_v63 }
 0x211   :  { %v7766_v61 = vpop.f32.mrb[140].mxu1 }
 0x212   :  { %v7770_v57 = vpop.f32.mrb[141].mxu1 }
 0x213   :  { %v7774_v19 = vpop.f32.mrb[142].mxu1 }
 0x214   :  { %9975 = vst [vmem:[#allocation182_spill] sm:$0xff] %v7774_v19  ;;  %v7778_v49 = vpop.f32.mrb[143].mxu1 }
 0x215   :  { %9976 = vst [vmem:[#allocation183_spill] sm:$0xff] %v7778_v49 }
 0x216   :  { %1763 = vmatmul.mubr.bf16.gmra.mrb[248].mxu1 %v6828_v1 }
 0x217   :  { %5266 = vmatprep.mubr.msk.bf16.mxu1 %vm662_vm0, %v6836_v3 }
 0x219   :  { %v7785_v63 = vpop.f32.mrb[144].mxu1 }
 0x21a   :  { %v7789_v50 = vpop.f32.mrb[145].mxu1 }
 0x21b   :  { %v7793_v19 = vpop.f32.mrb[146].mxu1 }
 0x21c   :  { %9977 = vst [vmem:[#allocation184_spill] sm:$0xff] %v7793_v19  ;;  %v7797_v49 = vpop.f32.mrb[147].mxu1 }
 0x21d   :  { %9978 = vst [vmem:[#allocation185_spill] sm:$0xff] %v7797_v49 }
 0x21e   :  { %1773 = vmatmul.mubr.bf16.gmra.mrb[252].mxu1 %v6846_v5  ;;  %v6271_v5 = vld [vmem:[%s9630_s3 + $0xc4] ss:$8 sps:$4 sm:$0xff]  }
 0x21f   :  { %5267 = vmatprep.mubr.msk.bf16.mxu1 %vm662_vm0, %v6851_v6  ;;  %2711 = vmatprep.subr.bf16.mxu0 %v6271_v5 }
 0x221   :  { %v7804_v3 = vpop.f32.mrb[148].mxu1 }
 0x222   :  { %v7808_v58 = vpop.f32.mrb[149].mxu1 }
 0x223   :  { %v7812_v19 = vpop.f32.mrb[150].mxu1 }
 0x224   :  { %9979 = vst [vmem:[#allocation186_spill] sm:$0xff] %v7812_v19  ;;  %v7816_v49 = vpop.f32.mrb[151].mxu1 }
 0x225   :  { %9980 = vst [vmem:[#allocation187_spill] sm:$0xff] %v7816_v49 }
 0x226   :  { %1783 = vmatmul.mubr.bf16.gmra.mrb[0].mxu1 %v6859_v7  ;;  %v9991_v7 = vld [vmem:[#allocation6_spill] sm:$0xff] }
 0x227   :  { %5268 = vmatprep.mubr.msk.bf16.mxu1 %vm662_vm0, %v6864_v8 }
 0x229   :  { %v7823_v6 = vpop.f32.mrb[152].mxu1 }
 0x22a   :  { %v7827_v60 = vpop.f32.mrb[153].mxu1 }
 0x22b   :  { %v7831_v19 = vpop.f32.mrb[154].mxu1 }
 0x22c   :  { %9981 = vst [vmem:[#allocation188_spill] sm:$0xff] %v7831_v19  ;;  %v7835_v49 = vpop.f32.mrb[155].mxu1 }
 0x22d   :  { %9982 = vst [vmem:[#allocation189_spill] sm:$0xff] %v7835_v49 }
 0x22e   :  { %1793 = vmatmul.mubr.bf16.gmra.mrb[4].mxu1 %v6872_v9 }
 0x22f   :  { %5269 = vmatprep.mubr.msk.bf16.mxu1 %vm662_vm0, %v6877_v10 }
 0x231   :  { %v7842_v8 = vpop.f32.mrb[156].mxu1 }
 0x232   :  { %v7846_v62 = vpop.f32.mrb[157].mxu1 }
 0x233   :  { %9983 = vst [vmem:[#allocation190_spill] sm:$0xff] %v7846_v62  ;;  %v7850_v19 = vpop.f32.mrb[158].mxu1  ;;  %v10033_v62 = vld [vmem:[#allocation162_spill] sm:$0xff] }
 0x234   :  { %9984 = vst [vmem:[#allocation191_spill] sm:$0xff] %v7850_v19  ;;  %v7854_v49 = vpop.f32.mrb[159].mxu1 }
 0x235   :  { %9985 = vst [vmem:[#allocation192_spill] sm:$0xff] %v7854_v49 }
 0x236   :  { %1803 = vmatmul.mubr.bf16.gmra.mrb[8].mxu1 %v6898_v13  ;;  %v6274_v13 = vld [vmem:[%s9630_s3 + $0xd4] ss:$8 sps:$4 sm:$0xff]  }
 0x237   :  { %5270 = vmatprep.mubr.msk.bf16.mxu1 %vm662_vm0, %v6903_v14  ;;  %v6269_v14 = vld [vmem:[%s9630_s3 + $0xc0] ss:$8 sps:$4 sm:$0xff]  }
 0x238   :  { %2712 = vmatpush1.bf16.msra.mxu0 %v6269_v14  ;;  %v6272_v14 = vld [vmem:[%s9630_s3 + $0xd0] ss:$8 sps:$4 sm:$0xff]  }
 0x239   :  { %v7861_v10 = vpop.f32.mrb[160].mxu1  ;;  %2713 = vmatprep.subr.bf16.mxu0 %v6274_v13  ;;  %v6280_v13 = vld [vmem:[%s9630_s3 + $0xf4] ss:$8 sps:$4 sm:$0xff]  }
 0x23a   :  { %9986 = vst [vmem:[#allocation193_spill] sm:$0xff] %v7861_v10  ;;  %v7865_v1 = vpop.f32.mrb[161].mxu1  ;;  %v9990_v10 = vld [vmem:[#allocation5_spill] sm:$0xff] }
 0x23b   :  { %9987 = vst [vmem:[#allocation194_spill] sm:$0xff] %v7865_v1  ;;  %v7869_v19 = vpop.f32.mrb[162].mxu1 }
 0x23c   :  { %9988 = vst [vmem:[#allocation195_spill] sm:$0xff] %v7869_v19  ;;  %v7873_v49 = vpop.f32.mrb[163].mxu1  ;;  %2714 = vmatpush1.bf16.msra.mxu0 %v6272_v14  ;;  %v6275_v14 = vld [vmem:[%s9630_s3 + $0xe0] ss:$8 sps:$4 sm:$0xff]  }
 0x23d   :  { %9989 = vst [vmem:[#allocation196_spill] sm:$0xff] %v7873_v49 }
 0x23e   :  { %1813 = vmatmul.mubr.bf16.gmra.mrb[12].mxu1 %v9990_v10 }
 0x23f   :  { %5271 = vmatprep.mubr.msk.bf16.mxu1 %vm662_vm0, %v9991_v7  ;;  %v6277_v7 = vld [vmem:[%s9630_s3 + $0xe4] ss:$8 sps:$4 sm:$0xff]  }
 0x240   :  { %2715 = vmatprep.subr.bf16.mxu0 %v6277_v7  ;;  %v10032_v7 = vmax.f32 %v7402_v43, %v7728_v34 }
 0x241   :  { %v7886_v9 = vpop.f32.mrb[164].mxu1  ;;  %2716 = vmatpush1.bf16.msra.mxu0 %v6275_v14  ;;  %v6278_v14 = vld [vmem:[%s9630_s3 + $0xf0] ss:$8 sps:$4 sm:$0xff]  }
 0x242   :  { %9992 = vst [vmem:[#allocation5_spill] sm:$0xff] %v7886_v9  ;;  %v7890_v49 = vpop.f32.mrb[165].mxu1  ;;  %v10000_v9 = vld [vmem:[#allocation7_spill] sm:$0xff]  ;;  %2717 = vmatprep.subr.bf16.mxu0 %v6280_v13 }
 0x243   :  { %9994 = vst [vmem:[#allocation6_spill] sm:$0xff] %v7890_v49  ;;  %v7894_v1 = vpop.f32.mrb[166].mxu1 }
 0x244   :  { %9996 = vst [vmem:[#allocation197_spill] sm:$0xff] %v7894_v1  ;;  %v7898_v33 = vpop.f32.mrb[167].mxu1 }
 0x245   :  { %9998 = vst [vmem:[#allocation198_spill] sm:$0xff] %v7898_v33  ;;  %2718 = vmatpush1.bf16.msra.mxu0 %v6278_v14  ;;  %v6281_v14 = vld [vmem:[%s9630_s3 + $0x100] ss:$8 sps:$4 sm:$0xff]  }
 0x246   :  { %1823 = vmatmul.mubr.bf16.gmra.mrb[16].mxu1 %v10000_v9 }
 0x247   :  { %5272 = vmatprep.mubr.msk.bf16.mxu1 %vm662_vm0, %v10001_v22 }
 0x249   :  { %v7911_v10 = vpop.f32.mrb[168].mxu1 }
 0x24a   :  { %10002 = vst [vmem:[#allocation7_spill] sm:$0xff] %v7911_v10  ;;  %v7915_v33 = vpop.f32.mrb[169].mxu1  ;;  %v10010_v10 = vld [vmem:[#allocation9_spill] sm:$0xff] }
 0x24b   :  { %10004 = vst [vmem:[#allocation8_spill] sm:$0xff] %v7915_v33  ;;  %v7919_v49 = vpop.f32.mrb[170].mxu1 }
 0x24c   :  { %10006 = vst [vmem:[#allocation199_spill] sm:$0xff] %v7919_v49  ;;  %v7923_v19 = vpop.f32.mrb[171].mxu1 }
 0x24d   :  { %10008 = vst [vmem:[#allocation200_spill] sm:$0xff] %v7923_v19 }
 0x24e   :  { %1833 = vmatmul.mubr.bf16.gmra.mrb[20].mxu1 %v10010_v10 }
 0x24f   :  { %5273 = vmatprep.mubr.msk.bf16.mxu1 %vm662_vm0, %v10011_v29 }
 0x251   :  { %v7936_v9 = vpop.f32.mrb[172].mxu1 }
 0x252   :  { %10012 = vst [vmem:[#allocation9_spill] sm:$0xff] %v7936_v9  ;;  %v7940_v19 = vpop.f32.mrb[173].mxu1  ;;  %v10020_v9 = vld [vmem:[#allocation11_spill] sm:$0xff] }
 0x253   :  { %10014 = vst [vmem:[#allocation10_spill] sm:$0xff] %v7940_v19  ;;  %v7944_v33 = vpop.f32.mrb[174].mxu1  ;;  %v10021_v19 = vld [vmem:[#allocation12_spill] sm:$0xff] }
 0x254   :  { %10016 = vst [vmem:[#allocation201_spill] sm:$0xff] %v7944_v33  ;;  %v7948_v1 = vpop.f32.mrb[175].mxu1  ;;  %v2196_v33 = vshrl.u32 %v2195_v2, 7  ;;  %v6283_v2 = vld [vmem:[%s9630_s3 + $0x104] ss:$8 sps:$4 sm:$0xff]  }
 0x255   :  { %10018 = vst [vmem:[#allocation202_spill] sm:$0xff] %v7948_v1  ;;  %v10030_v1 = vld [vmem:[#allocation13_spill] sm:$0xff]  ;;  %2719 = vmatprep.subr.bf16.mxu0 %v6283_v2 }
 0x256   :  { %1843 = vmatmul.mubr.bf16.gmra.mrb[24].mxu1 %v10020_v9  ;;  %v2197_v22 = vsub.s32 0, %v2196_v33  ;;  %v10031_v9 = vld [vmem:[#allocation14_spill] sm:$0xff]  ;;  %2720 = vmatpush1.bf16.msra.mxu0 %v6281_v14  ;;  %v10034_v14 = vmax.f32 %v7406_v45, %v7732_v26 }
 0x257   :  { %5274 = vmatprep.mubr.msk.bf16.mxu1 %vm662_vm0, %v10021_v19 }
 0x258   :  { %v7990_v19 = vrot.slane %v2145_v41, %v2197_v22 }
 0x259   :  { %v7961_v10 = vpop.f32.mrb[176].mxu1 }
 0x25a   :  { %10022 = vst [vmem:[#allocation11_spill] sm:$0xff] %v7961_v10  ;;  %v7965_v29 = vpop.f32.mrb[177].mxu1 }
 0x25b   :  { %10024 = vst [vmem:[#allocation12_spill] sm:$0xff] %v7965_v29  ;;  %v7969_v49 = vpop.f32.mrb[178].mxu1 }
 0x25c   :  { %10026 = vst [vmem:[#allocation203_spill] sm:$0xff] %v7969_v49  ;;  %v7973_v30 = vpop.f32.mrb[179].mxu1  ;;  %v2201_v49 = vsub.s32 1, %v2196_v33 }
 0x25d   :  { %10028 = vst [vmem:[#allocation204_spill] sm:$0xff] %v7973_v30 }
 0x25e   :  { %1853 = vmatmul.mubr.bf16.gmra.mrb[28].mxu1 %v10030_v1  ;;  %v7993_v1 = vrot.slane %v2145_v41, %v2201_v49  ;;  %v10036_v41 = vmax.f32 %v7410_v39, %v7736_v53  ;;  %v10037_v49 = vld [vmem:[#allocation15_spill] sm:$0xff] }
 0x25f   :  { %5275 = vmatprep.mubr.msk.bf16.mxu1 %vm662_vm0, %v10031_v9 }
 0x261   :  { %v1594_v13 = vpop.f32.mrb[180].mxu1 }
 0x262   :  { %v2001_v30 = vmax.f32 %v7662_v17, %v1594_v13  ;;  %v1596_v29 = vpop.f32.mrb[181].mxu1  ;;  %v10035_v17 = vld [vmem:[#allocation164_spill] sm:$0xff] }
 0x263   :  { %v2002_v5 = vmax.f32 %v7666_v25, %v1596_v29  ;;  %v1598_v10 = vpop.f32.mrb[182].mxu1 }
 0x264   :  { %v2146_v33 = vmax.f32 %v10032_v7, %v2001_v30  ;;  %v2003_v12 = vmax.f32 %v10033_v62, %v1598_v10  ;;  %v1600_v9 = vpop.f32.mrb[183].mxu1  ;;  %v10038_v30 = vmax.f32 %v7414_v47, %v7740_v21  ;;  %v10039_v62 = vld [vmem:[#allocation16_spill] sm:$0xff] }
 0x265   :  { %v2147_v2 = vmax.f32 %v10034_v14, %v2002_v5  ;;  %v2004_v22 = vmax.f32 %v10035_v17, %v1600_v9  ;;  %v6284_v21 = vld [vmem:[%s9630_s3 + $0x110] ss:$8 sps:$4 sm:$0xff]   ;;  %v6286_v47 = vld [vmem:[%s9630_s3 + $0x114] ss:$8 sps:$4 sm:$0xff]  }
 0x266   :  { %v2205_v13 = vadd.f32 %v7990_v19, %v2146_v33  ;;  %v2148_v25 = vmax.f32 %v10036_v41, %v2003_v12  ;;  %1863 = vmatmul.mubr.bf16.gmra.mrb[32].mxu1 %v10037_v49  ;;  %v10045_v49 = vld [vmem:[#allocation170_spill] sm:$0xff]  ;;  %2721 = vmatprep.subr.bf16.mxu0 %v6286_v47 }
 0x267   :  { %v2206_v43 = vadd.f32 %v7993_v1, %v2147_v2  ;;  %v2149_v34 = vmax.f32 %v10038_v30, %v2004_v22  ;;  %5276 = vmatprep.mubr.msk.bf16.mxu1 %vm662_vm0, %v10039_v62  ;;  %v10041_v2 = vmax.f32 %v7421_v0, %v7747_v59  ;;  %v10047_v0 = vld [vmem:[#allocation17_spill] sm:$0xff]  ;;  %2722 = vmatpush1.bf16.msra.mxu0 %v6284_v21  ;;  %v10052_v21 = vld [vmem:[#allocation175_spill] sm:$0xff] }
 0x268   :  { %v2207_v26 = vadd.f32 %v7990_v19, %v2148_v25  ;;  %v2253_v10 = vmax.f32 %v2205_v13, 0.0 }
 0x269   :  { %v2208_v45 = vadd.f32 %v7993_v1, %v2149_v34  ;;  %v1604_v5 = vpop.f32.mrb[184].mxu1  ;;  %v2254_v29 = vmax.f32 %v2206_v43, 0.0  ;;  %v10046_v34 = vmax.f32 %v7429_v35, %v7755_v52 }
 0x26a   :  { %v2255_v39 = vmax.f32 %v2207_v26, 0.0  ;;  %v2005_v12 = vmax.f32 %v7681_v18, %v1604_v5  ;;  %v1606_v53 = vpop.f32.mrb[185].mxu1  ;;  %v10042_v18 = vld [vmem:[#allocation168_spill] sm:$0xff]  ;;  %v10048_v26 = vmax.f32 %v7433_v32, %v7759_v11  ;;  %v10051_v32 = vmax.f32 %v7440_v46, %v7766_v61  ;;  %v6289_v46 = vld [vmem:[%s9630_s3 + $0x124] ss:$8 sps:$4 sm:$0xff]  }
 0x26b   :  { %v2256_v7 = vmax.f32 %v2208_v45, 0.0  ;;  %v2006_v33 = vmax.f32 %v7685_v37, %v1606_v53  ;;  %v1608_v9 = vpop.f32.mrb[186].mxu1  ;;  %v10044_v37 = vmax.f32 %v7425_v40, %v7751_v56  ;;  %v10049_v40 = vld [vmem:[#allocation18_spill] sm:$0xff]  ;;  %2723 = vmatprep.subr.bf16.mxu0 %v6289_v46 }
 0x26c   :  { %v8024_v14 = vpack.c.bf16 %v2255_v39, %v2253_v10  ;;  %v2150_v17 = vmax.f32 %v10041_v2, %v2005_v12  ;;  %v2007_v22 = vmax.f32 %v10042_v18, %v1608_v9  ;;  %v1610_v13 = vpop.f32.mrb[187].mxu1 }
 0x26d   :  { %v8030_v41 = vpack.c.bf16 %v2256_v7, %v2254_v29  ;;  %v2151_v25 = vmax.f32 %v10044_v37, %v2006_v33  ;;  %v2008_v43 = vmax.f32 %v10045_v49, %v1610_v13  ;;  %v10050_v7 = vld [vmem:[#allocation173_spill] sm:$0xff]  ;;  %v10057_v49 = vld [vmem:[#allocation182_spill] sm:$0xff] }
 0x26e   :  { %10040 = vst [vmem:[#allocation13_spill] sm:$0xff] %v8024_v14  ;;  %v2209_v30 = vadd.f32 %v7990_v19, %v2150_v17  ;;  %v2152_v62 = vmax.f32 %v10046_v34, %v2007_v22  ;;  %1873 = vmatmul.mubr.bf16.gmra.mrb[36].mxu1 %v10047_v0  ;;  %v10056_v13 = vld [vmem:[#allocation177_spill] sm:$0xff]  ;;  %v10059_v34 = vld [vmem:[#allocation19_spill] sm:$0xff] }
 0x26f   :  { %10043 = vst [vmem:[#allocation14_spill] sm:$0xff] %v8030_v41  ;;  %v2210_v59 = vadd.f32 %v7993_v1, %v2151_v25  ;;  %v2153_v45 = vmax.f32 %v10048_v26, %v2008_v43  ;;  %5277 = vmatprep.mubr.msk.bf16.mxu1 %vm662_vm0, %v10049_v40  ;;  %v6287_v25 = vld [vmem:[%s9630_s3 + $0x120] ss:$8 sps:$4 sm:$0xff]   ;;  %v10058_v43 = vmax.f32 %v7448_v31, %v10057_v49  ;;  %v10226_v41 = vld [vmem:[#allocation76_spill] sm:$0xff] }
 0x270   :  { %v2211_v56 = vadd.f32 %v7990_v19, %v2152_v62  ;;  %v2257_v29 = vmax.f32 %v2209_v30, 0.0  ;;  %2724 = vmatpush1.bf16.msra.mxu0 %v6287_v25 }
 0x271   :  { %v2212_v5 = vadd.f32 %v7993_v1, %v2153_v45  ;;  %v1614_v10 = vpop.f32.mrb[188].mxu1  ;;  %v2258_v12 = vmax.f32 %v2210_v59, 0.0  ;;  %v6497_v59 = vld [vmem:[%s9627_s0 + $0x2a4] ss:$8 sps:$4 sm:$0xff]  }
 0x272   :  { %v2259_v35 = vmax.f32 %v2211_v56, 0.0  ;;  %v2009_v52 = vmax.f32 %v7700_v51, %v1614_v10  ;;  %v1616_v39 = vpop.f32.mrb[189].mxu1  ;;  %v10055_v51 = vmax.f32 %v7444_v55, %v7770_v57  ;;  %v10060_v57 = vld [vmem:[#allocation183_spill] sm:$0xff] }
 0x273   :  { %v2260_v53 = vmax.f32 %v2212_v5, 0.0  ;;  %v2010_v33 = vmax.f32 %v10050_v7, %v1616_v39  ;;  %v1618_v9 = vpop.f32.mrb[190].mxu1  ;;  %v10061_v62 = vmax.f32 %v7452_v28, %v10060_v57  ;;  %v10062_v5 = vld [vmem:[#allocation20_spill] sm:$0xff] }
 0x274   :  { %v2154_v11 = vmax.f32 %v10051_v32, %v2009_v52  ;;  %v2011_v47 = vmax.f32 %v10052_v21, %v1618_v9  ;;  %v1620_v2 = vpop.f32.mrb[191].mxu1  ;;  %v8055_v17 = vpack.c.bf16 %v2259_v35, %v2257_v29  ;;  %v10063_v52 = vld [vmem:[#allocation21_spill] sm:$0xff] }
 0x275   :  { %v8057_v18 = vpack.c.bf16 %v2260_v53, %v2258_v12  ;;  %v2155_v22 = vmax.f32 %v10055_v51, %v2010_v33  ;;  %v2012_v37 = vmax.f32 %v10056_v13, %v1620_v2  ;;  %v10064_v53 = vmax.f32 %v7459_v4, %v7785_v63  ;;  %v10065_v33 = vld [vmem:[#allocation22_spill] sm:$0xff]  ;;  %v10069_v51 = vld [vmem:[#allocation23_spill] sm:$0xff] }
 0x276   :  { %10053 = vst [vmem:[#allocation162_spill] sm:$0xff] %v8055_v17  ;;  %v2213_v61 = vadd.f32 %v7990_v19, %v2154_v11  ;;  %v2156_v30 = vmax.f32 %v10058_v43, %v2011_v47  ;;  %1883 = vmatmul.mubr.bf16.gmra.mrb[40].mxu1 %v10059_v34  ;;  %v10068_v47 = vmax.f32 %v7463_v54, %v7789_v50  ;;  %v6290_v13 = vld [vmem:[%s9630_s3 + $0x130] ss:$8 sps:$4 sm:$0xff]   ;;  %v6292_v4 = vld [vmem:[%s9630_s3 + $0x134] ss:$8 sps:$4 sm:$0xff]  }
 0x277   :  { %10054 = vst [vmem:[#allocation164_spill] sm:$0xff] %v8057_v18  ;;  %v2214_v55 = vadd.f32 %v7993_v1, %v2155_v22  ;;  %v2157_v0 = vmax.f32 %v10061_v62, %v2012_v37  ;;  %5278 = vmatprep.mubr.msk.bf16.mxu1 %vm662_vm0, %v6497_v59  ;;  %v10070_v37 = vld [vmem:[#allocation184_spill] sm:$0xff]  ;;  %v6498_v54 = vld [vmem:[%s9627_s0 + $0x2a0] ss:$8 sps:$4 sm:$0xff]   ;;  %2725 = vmatprep.subr.bf16.mxu0 %v6292_v4  ;;  %v6501_v4 = vld [vmem:[%s9627_s0 + $0x2c4] ss:$8 sps:$4 sm:$0xff]  }
 0x278   :  { %v2215_v26 = vadd.f32 %v7990_v19, %v2156_v30  ;;  %v2261_v40 = vmax.f32 %v2213_v61, 0.0  ;;  %v10071_v25 = vmax.f32 %v7467_v27, %v10070_v37  ;;  %v10072_v61 = vld [vmem:[#allocation185_spill] sm:$0xff]  ;;  %v6499_v30 = vld [vmem:[%s9627_s0 + $0x2b4] ss:$8 sps:$4 sm:$0xff]   ;;  %2726 = vmatpush1.bf16.msra.mxu0 %v6290_v13 }
 0x279   :  { %v2216_v31 = vadd.f32 %v7993_v1, %v2157_v0  ;;  %v1624_v45 = vpop.f32.mrb[192].mxu1  ;;  %v2262_v28 = vmax.f32 %v2214_v55, 0.0  ;;  %v10073_v49 = vmax.f32 %v7471_v24, %v10072_v61  ;;  %v10074_v0 = vld [vmem:[#allocation24_spill] sm:$0xff]  ;;  %v10225_v18 = vld [vmem:[#allocation75_spill] sm:$0xff] }
 0x27a   :  { %v2263_v56 = vmax.f32 %v2215_v26, 0.0  ;;  %v2013_v10 = vmax.f32 %v10062_v5, %v1624_v45  ;;  %v1626_v29 = vpop.f32.mrb[193].mxu1  ;;  %v10075_v45 = vld [vmem:[#allocation25_spill] sm:$0xff]  ;;  %v10076_v5 = vmax.f32 %v7480_v48, %v7804_v3 }
 0x27b   :  { %v2264_v35 = vmax.f32 %v2216_v31, 0.0  ;;  %v2014_v39 = vmax.f32 %v10063_v52, %v1626_v29  ;;  %v1628_v12 = vpop.f32.mrb[194].mxu1  ;;  %v10077_v29 = vld [vmem:[#allocation26_spill] sm:$0xff] }
 0x27c   :  { %v2158_v7 = vmax.f32 %v10064_v53, %v2013_v10  ;;  %v2015_v9 = vmax.f32 %v10065_v33, %v1628_v12  ;;  %v1630_v32 = vpop.f32.mrb[195].mxu1  ;;  %v8090_v11 = vpack.c.bf16 %v2263_v56, %v2261_v40  ;;  %v10080_v12 = vmax.f32 %v7484_v36, %v7808_v58  ;;  %v6295_v48 = vld [vmem:[%s9630_s3 + $0x144] ss:$8 sps:$4 sm:$0xff]   ;;  %v6500_v36 = vld [vmem:[%s9627_s0 + $0x2b0] ss:$8 sps:$4 sm:$0xff]  }
 0x27d   :  { %v8092_v21 = vpack.c.bf16 %v2264_v35, %v2262_v28  ;;  %v2159_v2 = vmax.f32 %v10068_v47, %v2014_v39  ;;  %v2016_v22 = vmax.f32 %v10069_v51, %v1630_v32  ;;  %v10082_v32 = vld [vmem:[#allocation186_spill] sm:$0xff]  ;;  %v10084_v51 = vld [vmem:[#allocation187_spill] sm:$0xff]  ;;  %2727 = vmatprep.subr.bf16.mxu0 %v6295_v48  ;;  %v10098_v48 = vld [vmem:[#allocation32_spill] sm:$0xff] }
 0x27e   :  { %10066 = vst [vmem:[#allocation15_spill] sm:$0xff] %v8090_v11  ;;  %v2217_v63 = vadd.f32 %v7990_v19, %v2158_v7  ;;  %v2160_v46 = vmax.f32 %v10071_v25, %v2015_v9  ;;  %1893 = vmatmul.mubr.bf16.gmra.mrb[44].mxu1 %v6498_v54  ;;  %v10081_v7 = vld [vmem:[#allocation27_spill] sm:$0xff]  ;;  %v6293_v9 = vld [vmem:[%s9630_s3 + $0x140] ss:$8 sps:$4 sm:$0xff]   ;;  %v10083_v47 = vmax.f32 %v7488_v44, %v10082_v32  ;;  %v10086_v54 = vld [vmem:[#allocation28_spill] sm:$0xff] }
 0x27f   :  { %10067 = vst [vmem:[#allocation16_spill] sm:$0xff] %v8092_v21  ;;  %v2218_v50 = vadd.f32 %v7993_v1, %v2159_v2  ;;  %v2161_v43 = vmax.f32 %v10073_v49, %v2016_v22  ;;  %5279 = vmatprep.mubr.msk.bf16.mxu1 %vm662_vm0, %v6499_v30  ;;  %v10085_v22 = vmax.f32 %v7492_v38, %v10084_v51  ;;  %v6298_v51 = vld [vmem:[%s9630_s3 + $0x154] ss:$8 sps:$4 sm:$0xff]  }
 0x280   :  { %v2219_v27 = vadd.f32 %v7990_v19, %v2160_v46  ;;  %v2265_v57 = vmax.f32 %v2217_v63, 0.0  ;;  %2728 = vmatpush1.bf16.msra.mxu0 %v6293_v9  ;;  %v10280_v21 = vld [vmem:[#allocation104_spill] sm:$0xff] }
 0x281   :  { %v2220_v34 = vadd.f32 %v7993_v1, %v2161_v43  ;;  %v1634_v55 = vpop.f32.mrb[196].mxu1  ;;  %v2266_v24 = vmax.f32 %v2218_v50, 0.0  ;;  %v10087_v43 = vld [vmem:[#allocation29_spill] sm:$0xff]  ;;  %2729 = vmatprep.subr.bf16.mxu0 %v6298_v51  ;;  %v10125_v51 = vld [vmem:[#allocation39_spill] sm:$0xff] }
 0x282   :  { %v2267_v62 = vmax.f32 %v2219_v27, 0.0  ;;  %v2017_v59 = vmax.f32 %v10074_v0, %v1634_v55  ;;  %v1636_v26 = vpop.f32.mrb[197].mxu1  ;;  %v10089_v55 = vmax.f32 %v7503_v23, %v7823_v6  ;;  %v6502_v23 = vld [vmem:[%s9627_s0 + $0x2c0] ss:$8 sps:$4 sm:$0xff]  }
 0x283   :  { %v2268_v31 = vmax.f32 %v2220_v34, 0.0  ;;  %v2018_v40 = vmax.f32 %v10075_v45, %v1636_v26  ;;  %v1638_v56 = vpop.f32.mrb[198].mxu1  ;;  %v10093_v45 = vld [vmem:[#allocation31_spill] sm:$0xff] }
 0x284   :  { %v2162_v10 = vmax.f32 %v10076_v5, %v2017_v59  ;;  %v2019_v28 = vmax.f32 %v10077_v29, %v1638_v56  ;;  %v1640_v35 = vpop.f32.mrb[199].mxu1  ;;  %v8127_v52 = vpack.c.bf16 %v2267_v62, %v2265_v57  ;;  %v10090_v62 = vld [vmem:[#allocation30_spill] sm:$0xff]  ;;  %v10094_v5 = vld [vmem:[#allocation188_spill] sm:$0xff] }
 0x285   :  { %v8129_v39 = vpack.c.bf16 %v2268_v31, %v2266_v24  ;;  %v2163_v53 = vmax.f32 %v10080_v12, %v2018_v40  ;;  %v2020_v33 = vmax.f32 %v10081_v7, %v1640_v35  ;;  %v10092_v24 = vmax.f32 %v7507_v20, %v7827_v60  ;;  %v6503_v60 = vld [vmem:[%s9627_s0 + $0x2d4] ss:$8 sps:$4 sm:$0xff]  }
 0x286   :  { %10078 = vst [vmem:[#allocation168_spill] sm:$0xff] %v8127_v52  ;;  %v2221_v3 = vadd.f32 %v7990_v19, %v2162_v10  ;;  %v2164_v2 = vmax.f32 %v10083_v47, %v2019_v28  ;;  %1903 = vmatmul.mubr.bf16.gmra.mrb[48].mxu1 %v6500_v36  ;;  %v10095_v10 = vmax.f32 %v7511_v15, %v10094_v5  ;;  %v10096_v28 = vld [vmem:[#allocation189_spill] sm:$0xff] }
 0x287   :  { %10079 = vst [vmem:[#allocation170_spill] sm:$0xff] %v8129_v39  ;;  %v2222_v58 = vadd.f32 %v7993_v1, %v2163_v53  ;;  %v2165_v13 = vmax.f32 %v10085_v22, %v2020_v33  ;;  %5280 = vmatprep.mubr.msk.bf16.mxu1 %vm662_vm0, %v6501_v4  ;;  %v10097_v35 = vmax.f32 %v7515_v42, %v10096_v28  ;;  %v10099_v42 = vld [vmem:[#allocation33_spill] sm:$0xff]  ;;  %v10279_v39 = vld [vmem:[#allocation103_spill] sm:$0xff] }
 0x288   :  { %v2223_v44 = vadd.f32 %v7990_v19, %v2164_v2  ;;  %v2269_v25 = vmax.f32 %v2221_v3, 0.0 }
 0x289   :  { %v2224_v63 = vadd.f32 %v7993_v1, %v2165_v13  ;;  %v1644_v37 = vpop.f32.mrb[200].mxu1  ;;  %v2270_v38 = vmax.f32 %v2222_v58, 0.0  ;;  %v6296_v58 = vld [vmem:[%s9630_s3 + $0x150] ss:$8 sps:$4 sm:$0xff]   ;;  %v10101_v13 = vmax.f32 %v7526_v16, %v7842_v8 }
 0x28a   :  { %v2271_v46 = vmax.f32 %v2223_v44, 0.0  ;;  %v2021_v50 = vmax.f32 %v10086_v54, %v1644_v37  ;;  %v1646_v61 = vpop.f32.mrb[201].mxu1  ;;  %v10102_v44 = vld [vmem:[#allocation34_spill] sm:$0xff]  ;;  %v6504_v16 = vld [vmem:[%s9627_s0 + $0x2d0] ss:$8 sps:$4 sm:$0xff]   ;;  %2730 = vmatpush1.bf16.msra.mxu0 %v6296_v58 }
 0x28b   :  { %v2272_v49 = vmax.f32 %v2224_v63, 0.0  ;;  %v2022_v30 = vmax.f32 %v10087_v43, %v1646_v61  ;;  %v1648_v27 = vpop.f32.mrb[202].mxu1  ;;  %v10105_v54 = vld [vmem:[#allocation190_spill] sm:$0xff] }
 0x28c   :  { %v8160_v34 = vpack.c.bf16 %v2271_v46, %v2269_v25  ;;  %v2166_v57 = vmax.f32 %v10089_v55, %v2021_v50  ;;  %v2023_v0 = vmax.f32 %v10090_v62, %v1648_v27  ;;  %v1650_v59 = vpop.f32.mrb[203].mxu1  ;;  %v10104_v46 = vld [vmem:[#allocation114_spill] sm:$0xff]  ;;  %v10109_v27 = vld [vmem:[#allocation191_spill] sm:$0xff] }
 0x28d   :  { %v8166_v26 = vpack.c.bf16 %v2272_v49, %v2270_v38  ;;  %v2167_v31 = vmax.f32 %v10092_v24, %v2022_v30  ;;  %v2024_v40 = vmax.f32 %v10093_v45, %v1650_v59  ;;  %v10106_v50 = vmax.f32 %v10104_v46, %v10105_v54  ;;  %v10107_v38 = vld [vmem:[#allocation35_spill] sm:$0xff]  ;;  %v10108_v30 = vld [vmem:[#allocation116_spill] sm:$0xff]  ;;  %v10111_v62 = vld [vmem:[#allocation118_spill] sm:$0xff] }
 0x28e   :  { %10088 = vst [vmem:[#allocation17_spill] sm:$0xff] %v8160_v34  ;;  %v2225_v56 = vadd.f32 %v7990_v19, %v2166_v57  ;;  %v2168_v29 = vmax.f32 %v10095_v10, %v2023_v0  ;;  %1913 = vmatmul.mubr.bf16.gmra.mrb[52].mxu1 %v6502_v23  ;;  %v10110_v55 = vmax.f32 %v10108_v30, %v10109_v27  ;;  %v10112_v0 = vld [vmem:[#allocation192_spill] sm:$0xff]  ;;  %v10127_v46 = vld [vmem:[#allocation195_spill] sm:$0xff] }
 0x28f   :  { %10091 = vst [vmem:[#allocation18_spill] sm:$0xff] %v8166_v26  ;;  %v2226_v6 = vadd.f32 %v7993_v1, %v2167_v31  ;;  %v2169_v20 = vmax.f32 %v10097_v35, %v2024_v40  ;;  %5281 = vmatprep.mubr.msk.bf16.mxu1 %vm662_vm0, %v6503_v60  ;;  %v10113_v59 = vmax.f32 %v10111_v62, %v10112_v0  ;;  %v6505_v31 = vld [vmem:[%s9627_s0 + $0x2e4] ss:$8 sps:$4 sm:$0xff]   ;;  %v10285_v26 = vld [vmem:[#allocation107_spill] sm:$0xff] }
 0x290   :  { %v2227_v15 = vadd.f32 %v7990_v19, %v2168_v29  ;;  %v2273_v7 = vmax.f32 %v2225_v56, 0.0  ;;  %v10114_v29 = vld [vmem:[#allocation36_spill] sm:$0xff] }
 0x291   :  { %v2228_v12 = vadd.f32 %v7993_v1, %v2169_v20  ;;  %v1654_v53 = vpop.f32.mrb[204].mxu1  ;;  %v2274_v33 = vmax.f32 %v2226_v6, 0.0  ;;  %v10115_v20 = vld [vmem:[#allocation37_spill] sm:$0xff] }
 0x292   :  { %v2275_v9 = vmax.f32 %v2227_v15, 0.0  ;;  %v2025_v3 = vmax.f32 %v10098_v48, %v1654_v53  ;;  %v1656_v32 = vpop.f32.mrb[205].mxu1  ;;  %v10117_v53 = vld [vmem:[#allocation120_spill] sm:$0xff]  ;;  %v10120_v48 = vld [vmem:[#allocation38_spill] sm:$0xff] }
 0x293   :  { %v2276_v47 = vmax.f32 %v2228_v12, 0.0  ;;  %v2026_v2 = vmax.f32 %v10099_v42, %v1656_v32  ;;  %v1658_v36 = vpop.f32.mrb[206].mxu1  ;;  %v10122_v42 = vld [vmem:[#allocation122_spill] sm:$0xff] }
 0x294   :  { %v8197_v22 = vpack.c.bf16 %v2275_v9, %v2273_v7  ;;  %v2170_v4 = vmax.f32 %v10101_v13, %v2025_v3  ;;  %v2027_v63 = vmax.f32 %v10102_v44, %v1658_v36  ;;  %v1660_v37 = vpop.f32.mrb[207].mxu1  ;;  %v10118_v7 = vld [vmem:[#allocation193_spill] sm:$0xff] }
 0x295   :  { %v8203_v25 = vpack.c.bf16 %v2276_v47, %v2274_v33  ;;  %v2171_v61 = vmax.f32 %v10106_v50, %v2026_v2  ;;  %v2028_v49 = vmax.f32 %v10107_v38, %v1660_v37  ;;  %v10119_v33 = vmax.f32 %v10117_v53, %v10118_v7  ;;  %v10123_v2 = vld [vmem:[#allocation194_spill] sm:$0xff]  ;;  %v10126_v37 = vld [vmem:[#allocation124_spill] sm:$0xff] }
 0x296   :  { %10100 = vst [vmem:[#allocation173_spill] sm:$0xff] %v8197_v22  ;;  %v2229_v43 = vadd.f32 %v7990_v19, %v2170_v4  ;;  %v2172_v57 = vmax.f32 %v10110_v55, %v2027_v63  ;;  %1923 = vmatmul.mubr.bf16.gmra.mrb[56].mxu1 %v6504_v16  ;;  %v10124_v36 = vmax.f32 %v10122_v42, %v10123_v2  ;;  %v6299_v4 = vld [vmem:[%s9630_s3 + $0x160] ss:$8 sps:$4 sm:$0xff]   ;;  %v6301_v44 = vld [vmem:[%s9630_s3 + $0x164] ss:$8 sps:$4 sm:$0xff]   ;;  %v10144_v2 = vld [vmem:[#allocation132_spill] sm:$0xff] }
 0x297   :  { %10103 = vst [vmem:[#allocation175_spill] sm:$0xff] %v8203_v25  ;;  %v2230_v8 = vadd.f32 %v7993_v1, %v2171_v61  ;;  %v2173_v24 = vmax.f32 %v10113_v59, %v2028_v49  ;;  %5282 = vmatprep.mubr.msk.bf16.mxu1 %vm662_vm0, %v6505_v31  ;;  %v10128_v54 = vmax.f32 %v10126_v37, %v10127_v46  ;;  %v6506_v61 = vld [vmem:[%s9627_s0 + $0x2e0] ss:$8 sps:$4 sm:$0xff]   ;;  %v6507_v55 = vld [vmem:[%s9627_s0 + $0x2f4] ss:$8 sps:$4 sm:$0xff]  }
 0x298   :  { %v2231_v45 = vadd.f32 %v7990_v19, %v2172_v57  ;;  %v2277_v5 = vmax.f32 %v2229_v43, 0.0  ;;  %v10129_v49 = vld [vmem:[#allocation126_spill] sm:$0xff]  ;;  %v10130_v43 = vld [vmem:[#allocation196_spill] sm:$0xff]  ;;  %2731 = vmatprep.subr.bf16.mxu0 %v6301_v44 }
 0x299   :  { %v2232_v40 = vadd.f32 %v7993_v1, %v2173_v24  ;;  %v1664_v56 = vpop.f32.mrb[208].mxu1  ;;  %v2278_v28 = vmax.f32 %v2230_v8, 0.0  ;;  %v10131_v30 = vmax.f32 %v10129_v49, %v10130_v43  ;;  %2732 = vmatpush1.bf16.msra.mxu0 %v6299_v4  ;;  %v10132_v59 = vld [vmem:[#allocation40_spill] sm:$0xff]  ;;  %v10140_v7 = vld [vmem:[#allocation130_spill] sm:$0xff] }
 0x29a   :  { %v2279_v10 = vmax.f32 %v2231_v45, 0.0  ;;  %v2029_v23 = vmax.f32 %v10114_v29, %v1664_v56  ;;  %v1666_v6 = vpop.f32.mrb[209].mxu1  ;;  %v10133_v56 = vld [vmem:[#allocation41_spill] sm:$0xff]  ;;  %v10147_v44 = vld [vmem:[#allocation134_spill] sm:$0xff]  ;;  %v10150_v43 = vld [vmem:[#allocation44_spill] sm:$0xff] }
 0x29b   :  { %v2280_v35 = vmax.f32 %v2232_v40, 0.0  ;;  %v2030_v60 = vmax.f32 %v10115_v20, %v1666_v6  ;;  %v1668_v15 = vpop.f32.mrb[210].mxu1  ;;  %v10136_v6 = vld [vmem:[#allocation5_spill] sm:$0xff]  ;;  %v10138_v20 = vld [vmem:[#allocation42_spill] sm:$0xff] }
 0x29c   :  { %v8228_v12 = vpack.c.bf16 %v2279_v10, %v2277_v5  ;;  %v2174_v9 = vmax.f32 %v10119_v33, %v2029_v23  ;;  %v2031_v3 = vmax.f32 %v10120_v48, %v1668_v15  ;;  %v1670_v32 = vpop.f32.mrb[211].mxu1  ;;  %v10135_v23 = vld [vmem:[#allocation128_spill] sm:$0xff]  ;;  %v10141_v33 = vld [vmem:[#allocation6_spill] sm:$0xff] }
 0x29d   :  { %v8234_v47 = vpack.c.bf16 %v2280_v35, %v2278_v28  ;;  %v2175_v58 = vmax.f32 %v10124_v36, %v2030_v60  ;;  %v2032_v13 = vmax.f32 %v10125_v51, %v1670_v32  ;;  %v10137_v28 = vmax.f32 %v10135_v23, %v10136_v6  ;;  %v10145_v36 = vld [vmem:[#allocation197_spill] sm:$0xff]  ;;  %v10283_v25 = vld [vmem:[#allocation106_spill] sm:$0xff] }
 0x29e   :  { %10116 = vst [vmem:[#allocation177_spill] sm:$0xff] %v8228_v12  ;;  %v2233_v63 = vadd.f32 %v7990_v19, %v2174_v9  ;;  %v2176_v50 = vmax.f32 %v10128_v54, %v2031_v3  ;;  %1933 = vmatmul.mubr.bf16.gmra.mrb[60].mxu1 %v6506_v61  ;;  %v10142_v9 = vmax.f32 %v10140_v7, %v10141_v33  ;;  %v10143_v3 = vld [vmem:[#allocation43_spill] sm:$0xff] }
 0x29f   :  { %10121 = vst [vmem:[#allocation182_spill] sm:$0xff] %v8234_v47  ;;  %v2234_v38 = vadd.f32 %v7993_v1, %v2175_v58  ;;  %v2177_v27 = vmax.f32 %v10131_v30, %v2032_v13  ;;  %5283 = vmatprep.mubr.msk.bf16.mxu1 %vm662_vm0, %v6507_v55  ;;  %v10146_v58 = vmax.f32 %v10144_v2, %v10145_v36  ;;  %v6508_v13 = vld [vmem:[%s9627_s0 + $0x2f0] ss:$8 sps:$4 sm:$0xff]   ;;  %v6304_v55 = vld [vmem:[%s9630_s3 + $0x174] ss:$8 sps:$4 sm:$0xff]   ;;  %v10165_v2 = vld [vmem:[#allocation142_spill] sm:$0xff] }
 0x2a0   :  { %v2235_v57 = vadd.f32 %v7990_v19, %v2176_v50  ;;  %v2281_v62 = vmax.f32 %v2233_v63, 0.0  ;;  %v10148_v63 = vld [vmem:[#allocation198_spill] sm:$0xff]  ;;  %2733 = vmatprep.subr.bf16.mxu0 %v6304_v55  ;;  %v10166_v36 = vld [vmem:[#allocation200_spill] sm:$0xff] }
 0x2a1   :  { %v2236_v16 = vadd.f32 %v7993_v1, %v2177_v27  ;;  %v1674_v8 = vpop.f32.mrb[212].mxu1  ;;  %v2282_v45 = vmax.f32 %v2234_v38, 0.0  ;;  %v10149_v37 = vmax.f32 %v10147_v44, %v10148_v63  ;;  %v10171_v55 = vld [vmem:[#allocation144_spill] sm:$0xff] }
 0x2a2   :  { %v2283_v0 = vmax.f32 %v2235_v57, 0.0  ;;  %v2033_v24 = vmax.f32 %v10132_v59, %v1674_v8  ;;  %v1676_v31 = vpop.f32.mrb[213].mxu1  ;;  %v10151_v8 = vld [vmem:[#allocation45_spill] sm:$0xff]  ;;  %v6302_v59 = vld [vmem:[%s9630_s3 + $0x170] ss:$8 sps:$4 sm:$0xff]  }
 0x2a3   :  { %v2284_v40 = vmax.f32 %v2236_v16, 0.0  ;;  %v2034_v5 = vmax.f32 %v10133_v56, %v1676_v31  ;;  %v1678_v10 = vpop.f32.mrb[214].mxu1  ;;  %v10153_v31 = vld [vmem:[#allocation136_spill] sm:$0xff]  ;;  %2734 = vmatpush1.bf16.msra.mxu0 %v6302_v59 }
 0x2a4   :  { %v8265_v29 = vpack.c.bf16 %v2283_v0, %v2281_v62  ;;  %v2178_v35 = vmax.f32 %v10137_v28, %v2033_v24  ;;  %v2035_v60 = vmax.f32 %v10138_v20, %v1678_v10  ;;  %v1680_v15 = vpop.f32.mrb[215].mxu1  ;;  %v10158_v28 = vld [vmem:[#allocation138_spill] sm:$0xff] }
 0x2a5   :  { %v8271_v53 = vpack.c.bf16 %v2284_v40, %v2282_v45  ;;  %v2179_v48 = vmax.f32 %v10142_v9, %v2034_v5  ;;  %v2036_v32 = vmax.f32 %v10143_v3, %v1680_v15  ;;  %v10154_v45 = vld [vmem:[#allocation7_spill] sm:$0xff]  ;;  %v10156_v5 = vld [vmem:[#allocation46_spill] sm:$0xff]  ;;  %v10162_v9 = vld [vmem:[#allocation140_spill] sm:$0xff] }
 0x2a6   :  { %10134 = vst [vmem:[#allocation19_spill] sm:$0xff] %v8265_v29  ;;  %v2237_v42 = vadd.f32 %v7990_v19, %v2178_v35  ;;  %v2180_v51 = vmax.f32 %v10146_v58, %v2035_v60  ;;  %1943 = vmatmul.mubr.bf16.gmra.mrb[64].mxu1 %v6508_v13  ;;  %v10155_v40 = vmax.f32 %v10153_v31, %v10154_v45  ;;  %v10159_v35 = vld [vmem:[#allocation8_spill] sm:$0xff]  ;;  %v10161_v15 = vld [vmem:[#allocation47_spill] sm:$0xff]  ;;  %v10176_v45 = vld [vmem:[#allocation146_spill] sm:$0xff] }
 0x2a7   :  { %10139 = vst [vmem:[#allocation183_spill] sm:$0xff] %v8271_v53  ;;  %v2238_v4 = vadd.f32 %v7993_v1, %v2179_v48  ;;  %v2181_v46 = vmax.f32 %v10149_v37, %v2036_v32  ;;  %v10160_v20 = vmax.f32 %v10158_v28, %v10159_v35  ;;  %v10163_v48 = vld [vmem:[#allocation199_spill] sm:$0xff]  ;;  %v10167_v58 = vmax.f32 %v10165_v2, %v10166_v36  ;;  %v6307_v28 = vld [vmem:[%s9630_s3 + $0x4] ss:$8 sps:$4 sm:$0xff]  }
 0x2a8   :  { %v2239_v54 = vadd.f32 %v7990_v19, %v2180_v51  ;;  %v2285_v38 = vmax.f32 %v2237_v42, 0.0  ;;  %v10164_v3 = vmax.f32 %v10162_v9, %v10163_v48  ;;  %v10183_v9 = vld [vmem:[#allocation150_spill] sm:$0xff]  ;;  %3030 = vmatprep.subr.bf16.mxu0 %v6307_v28 }
 0x2a9   :  { %v2240_v50 = vadd.f32 %v7993_v1, %v2181_v46  ;;  %v1684_v61 = vpop.f32.mrb[216].mxu1  ;;  %v2286_v57 = vmax.f32 %v2238_v4, 0.0  ;;  %v10168_v46 = vld [vmem:[#allocation48_spill] sm:$0xff]  ;;  %v10184_v48 = vld [vmem:[#allocation202_spill] sm:$0xff] }
 0x2aa   :  { %v2287_v49 = vmax.f32 %v2239_v54, 0.0  ;;  %v2037_v30 = vmax.f32 %v10150_v43, %v1684_v61  ;;  %v1686_v27 = vpop.f32.mrb[217].mxu1 }
 0x2ab   :  { %v2288_v16 = vmax.f32 %v2240_v50, 0.0  ;;  %v2038_v62 = vmax.f32 %v10151_v8, %v1686_v27  ;;  %v1688_v0 = vpop.f32.mrb[218].mxu1 }
 0x2ac   :  { %v8298_v24 = vpack.c.bf16 %v2287_v49, %v2285_v38  ;;  %v2182_v56 = vmax.f32 %v10155_v40, %v2037_v30  ;;  %v2039_v10 = vmax.f32 %v10156_v5, %v1688_v0  ;;  %v1690_v23 = vpop.f32.mrb[219].mxu1  ;;  %v10169_v49 = vld [vmem:[#allocation49_spill] sm:$0xff]  ;;  %v10177_v40 = vld [vmem:[#allocation10_spill] sm:$0xff] }
 0x2ad   :  { %v8304_v6 = vpack.c.bf16 %v2288_v16, %v2286_v57  ;;  %v2183_v60 = vmax.f32 %v10160_v20, %v2038_v62  ;;  %v2040_v7 = vmax.f32 %v10161_v15, %v1690_v23  ;;  %v10172_v57 = vld [vmem:[#allocation9_spill] sm:$0xff]  ;;  %v10174_v62 = vld [vmem:[#allocation50_spill] sm:$0xff]  ;;  %v10180_v20 = vld [vmem:[#allocation148_spill] sm:$0xff] }
 0x2ae   :  { %10152 = vst [vmem:[#allocation20_spill] sm:$0xff] %v8298_v24  ;;  %v2241_v33 = vadd.f32 %v7990_v19, %v2182_v56  ;;  %v2184_v32 = vmax.f32 %v10164_v3, %v2039_v10  ;;  %v10173_v16 = vmax.f32 %v10171_v55, %v10172_v57  ;;  %v10178_v56 = vmax.f32 %v10176_v45, %v10177_v40  ;;  %v10179_v10 = vld [vmem:[#allocation51_spill] sm:$0xff] }
 0x2af   :  { %10157 = vst [vmem:[#allocation21_spill] sm:$0xff] %v8304_v6  ;;  %v2242_v42 = vadd.f32 %v7993_v1, %v2183_v60  ;;  %v2185_v51 = vmax.f32 %v10167_v58, %v2040_v7  ;;  %v10181_v60 = vld [vmem:[#allocation201_spill] sm:$0xff]  ;;  %v10185_v3 = vmax.f32 %v10183_v9, %v10184_v48  ;;  %v10197_v40 = vld [vmem:[#allocation55_spill] sm:$0xff] }
 0x2b0   :  { %v2243_v13 = vadd.f32 %v7990_v19, %v2184_v32  ;;  %v2289_v63 = vmax.f32 %v2241_v33, 0.0  ;;  %v10182_v15 = vmax.f32 %v10180_v20, %v10181_v60  ;;  %v10201_v60 = vld [vmem:[#allocation158_spill] sm:$0xff] }
 0x2b1   :  { %v2244_v4 = vadd.f32 %v7993_v1, %v2185_v51  ;;  %v1694_v44 = vpop.f32.mrb[220].mxu1  ;;  %v2290_v61 = vmax.f32 %v2242_v42, 0.0 }
 0x2b2   :  { %v2291_v37 = vmax.f32 %v2243_v13, 0.0  ;;  %v2041_v54 = vmax.f32 %v10168_v46, %v1694_v44  ;;  %v1696_v50 = vpop.f32.mrb[221].mxu1  ;;  %v10186_v13 = vld [vmem:[#allocation52_spill] sm:$0xff]  ;;  %v10187_v46 = vld [vmem:[#allocation53_spill] sm:$0xff] }
 0x2b3   :  { %v2292_v38 = vmax.f32 %v2244_v4, 0.0  ;;  %v2042_v43 = vmax.f32 %v10169_v49, %v1696_v50  ;;  %v1698_v30 = vpop.f32.mrb[222].mxu1 }
 0x2b4   :  { %v8322_v27 = vpack.c.bf16 %v2291_v37, %v2289_v63  ;;  %v2186_v8 = vmax.f32 %v10173_v16, %v2041_v54  ;;  %v2043_v0 = vmax.f32 %v10174_v62, %v1698_v30  ;;  %v1700_v59 = vpop.f32.mrb[223].mxu1  ;;  %v10191_v30 = vld [vmem:[#allocation54_spill] sm:$0xff] }
 0x2b5   :  { %v8328_v31 = vpack.c.bf16 %v2292_v38, %v2290_v61  ;;  %v2187_v5 = vmax.f32 %v10178_v56, %v2042_v43  ;;  %v2044_v23 = vmax.f32 %v10179_v10, %v1700_v59  ;;  %v10188_v61 = vld [vmem:[#allocation152_spill] sm:$0xff]  ;;  %v10189_v38 = vld [vmem:[#allocation11_spill] sm:$0xff]  ;;  %v10194_v62 = vld [vmem:[#allocation154_spill] sm:$0xff] }
 0x2b6   :  { %10170 = vst [vmem:[#allocation22_spill] sm:$0xff] %v8322_v27  ;;  %v2245_v35 = vadd.f32 %v7990_v19, %v2186_v8  ;;  %v2188_v7 = vmax.f32 %v10182_v15, %v2043_v0  ;;  %v10190_v49 = vmax.f32 %v10188_v61, %v10189_v38  ;;  %v10195_v0 = vld [vmem:[#allocation12_spill] sm:$0xff]  ;;  %v10209_v38 = vld [vmem:[#allocation59_spill] sm:$0xff] }
 0x2b7   :  { %10175 = vst [vmem:[#allocation23_spill] sm:$0xff] %v8328_v31  ;;  %v2246_v33 = vadd.f32 %v7993_v1, %v2187_v5  ;;  %v2189_v32 = vmax.f32 %v10185_v3, %v2044_v23  ;;  %v10196_v59 = vmax.f32 %v10194_v62, %v10195_v0  ;;  %v10198_v10 = vld [vmem:[#allocation156_spill] sm:$0xff]  ;;  %v10199_v23 = vld [vmem:[#allocation203_spill] sm:$0xff]  ;;  %v10211_v62 = vld [vmem:[#allocation61_spill] sm:$0xff] }
 0x2b8   :  { %v2247_v42 = vadd.f32 %v7990_v19, %v2188_v7  ;;  %v2293_v58 = vmax.f32 %v2245_v35, 0.0  ;;  %v10200_v28 = vmax.f32 %v10198_v10, %v10199_v23  ;;  %v10202_v15 = vld [vmem:[#allocation204_spill] sm:$0xff]  ;;  %v10227_v31 = vld [vmem:[#allocation77_spill] sm:$0xff] }
 0x2b9   :  { %v2248_v2 = vadd.f32 %v7993_v1, %v2189_v32  ;;  %v1704_v36 = vpop.f32.mrb[224].mxu1  ;;  %v2294_v63 = vmax.f32 %v2246_v33, 0.0  ;;  %v10203_v7 = vmax.f32 %v10201_v60, %v10202_v15  ;;  %v10215_v60 = vld [vmem:[#allocation65_spill] sm:$0xff] }
 0x2ba   :  { %v2295_v51 = vmax.f32 %v2247_v42, 0.0  ;;  %v2045_v4 = vmax.f32 %v10186_v13, %v1704_v36  ;;  %v1706_v44 = vpop.f32.mrb[225].mxu1  ;;  %v10222_v36 = vld [vmem:[#allocation72_spill] sm:$0xff] }
 0x2bb   :  { %v2296_v37 = vmax.f32 %v2248_v2, 0.0  ;;  %v2046_v54 = vmax.f32 %v10187_v46, %v1706_v44  ;;  %v1708_v50 = vpop.f32.mrb[226].mxu1  ;;  %v10204_v2 = vld [vmem:[#allocation56_spill] sm:$0xff]  ;;  %v10221_v46 = vld [vmem:[#allocation71_spill] sm:$0xff] }
 0x2bc   :  { %v2190_v43 = vmax.f32 %v10190_v49, %v2045_v4  ;;  %v2047_v55 = vmax.f32 %v10191_v30, %v1708_v50  ;;  %v1710_v57 = vpop.f32.mrb[227].mxu1  ;;  %v8353_v16 = vpack.c.bf16 %v2295_v51, %v2293_v58  ;;  %v10205_v4 = vld [vmem:[#allocation57_spill] sm:$0xff]  ;;  %v10210_v30 = vld [vmem:[#allocation60_spill] sm:$0xff] }
 0x2bd   :  { %v8355_v8 = vpack.c.bf16 %v2296_v37, %v2294_v63  ;;  %v2191_v45 = vmax.f32 %v10196_v59, %v2046_v54  ;;  %v2048_v56 = vmax.f32 %v10197_v40, %v1710_v57  ;;  %v10206_v37 = vld [vmem:[#allocation58_spill] sm:$0xff]  ;;  %v10219_v40 = vld [vmem:[#allocation69_spill] sm:$0xff] }
 0x2be   :  { %10192 = vst [vmem:[#allocation184_spill] sm:$0xff] %v8353_v16  ;;  %v2249_v5 = vadd.f32 %v7990_v19, %v2190_v43  ;;  %v2192_v35 = vmax.f32 %v10200_v28, %v2047_v55  ;;  %v10214_v28 = vld [vmem:[#allocation64_spill] sm:$0xff]  ;;  %v10220_v55 = vld [vmem:[#allocation70_spill] sm:$0xff] }
 0x2bf   :  { %10193 = vst [vmem:[#allocation185_spill] sm:$0xff] %v8355_v8  ;;  %v2250_v20 = vadd.f32 %v7993_v1, %v2191_v45  ;;  %v2193_v33 = vmax.f32 %v10203_v7, %v2048_v56  ;;  %v10212_v45 = vld [vmem:[#allocation62_spill] sm:$0xff] }
 0x2c0   :  { %v2251_v9 = vadd.f32 %v7990_v19, %v2192_v35  ;;  %v2297_v32 = vmax.f32 %v2249_v5, 0.0  ;;  %v10213_v5 = vld [vmem:[#allocation63_spill] sm:$0xff]  ;;  %v10224_v8 = vld [vmem:[#allocation74_spill] sm:$0xff]  ;;  %v10281_v35 = vld [vmem:[#allocation105_spill] sm:$0xff] }
 0x2c1   :  { %v2252_v48 = vadd.f32 %v7993_v1, %v2193_v33  ;;  %v8371_v3 = vpop.f32.mrb[228].mxu1  ;;  %v2298_v51 = vmax.f32 %v2250_v20, 0.0  ;;  %v10216_v33 = vld [vmem:[#allocation66_spill] sm:$0xff] }
 0x2c2   :  { %v2299_v42 = vmax.f32 %v2251_v9, 0.0  ;;  %v8375_v58 = vpop.f32.mrb[229].mxu1  ;;  %v10282_v15 = vmax.f32 %v10204_v2, %v8371_v3 }
 0x2c3   :  { %v2300_v13 = vmax.f32 %v2252_v48, 0.0  ;;  %v8379_v63 = vpop.f32.mrb[230].mxu1  ;;  %v10284_v9 = vmax.f32 %v10205_v4, %v8375_v58 }
 0x2c4   :  { %v8383_v54 = vpop.f32.mrb[231].mxu1  ;;  %v8385_v50 = vpack.c.bf16 %v2299_v42, %v2297_v32  ;;  %v10217_v32 = vld [vmem:[#allocation67_spill] sm:$0xff] }
 0x2c5   :  { %v8387_v61 = vpack.c.bf16 %v2300_v13, %v2298_v51  ;;  %v10218_v13 = vld [vmem:[#allocation68_spill] sm:$0xff] }
 0x2c6   :  { %10207 = vst [vmem:[#allocation24_spill] sm:$0xff] %v8385_v50 }
 0x2c7   :  { %10208 = vst [vmem:[#allocation25_spill] sm:$0xff] %v8387_v61  ;;  %v10223_v61 = vld [vmem:[#allocation73_spill] sm:$0xff] }
 0x2c9   :  { %v8391_v43 = vpop.f32.mrb[232].mxu1 }
 0x2ca   :  { %v8395_v57 = vpop.f32.mrb[233].mxu1 }
 0x2cb   :  { %v8399_v59 = vpop.f32.mrb[234].mxu1 }
 0x2cc   :  { %v8403_v56 = vpop.f32.mrb[235].mxu1 }
 0x2d1   :  { %v8407_v23 = vpop.f32.mrb[236].mxu1 }
 0x2d2   :  { %v8411_v20 = vpop.f32.mrb[237].mxu1 }
 0x2d3   :  { %v8415_v7 = vpop.f32.mrb[238].mxu1 }
 0x2d4   :  { %v8419_v48 = vpop.f32.mrb[239].mxu1 }
 0x2d9   :  { %v8423_v51 = vpop.f32.mrb[240].mxu1 }
 0x2da   :  { %v8427_v10 = vpop.f32.mrb[241].mxu1 }
 0x2db   :  { %v8431_v0 = vpop.f32.mrb[242].mxu1 }
 0x2dc   :  { %v8435_v49 = vpop.f32.mrb[243].mxu1 }
 0x2e1   :  { %v8439_v44 = vpop.f32.mrb[244].mxu1 }
 0x2e2   :  { %v8443_v50 = vpop.f32.mrb[245].mxu1 }
 0x2e3   :  { %v8447_v16 = vpop.f32.mrb[246].mxu1 }
 0x2e4   :  { %v8451_v17 = vpop.f32.mrb[247].mxu1 }
 0x2e9   :  { %v8455_v14 = vpop.f32.mrb[248].mxu1 }
 0x2ea   :  { %v8459_v27 = vpop.f32.mrb[249].mxu1 }
 0x2eb   :  { %v8463_v24 = vpop.f32.mrb[250].mxu1 }
 0x2ec   :  { %10228 = vst [vmem:[#allocation26_spill] sm:$0xff] %v8463_v24  ;;  %v8467_v29 = vpop.f32.mrb[251].mxu1 }
 0x2ed   :  { %10230 = vst [vmem:[#allocation27_spill] sm:$0xff] %v8467_v29 }
 0x2f1   :  { %v8471_v12 = vpop.f32.mrb[252].mxu1 }
 0x2f2   :  { %10232 = vst [vmem:[#allocation186_spill] sm:$0xff] %v8471_v12  ;;  %v8475_v22 = vpop.f32.mrb[253].mxu1 }
 0x2f3   :  { %10234 = vst [vmem:[#allocation187_spill] sm:$0xff] %v8475_v22  ;;  %v8479_v34 = vpop.f32.mrb[254].mxu1 }
 0x2f4   :  { %10236 = vst [vmem:[#allocation28_spill] sm:$0xff] %v8479_v34  ;;  %v8483_v52 = vpop.f32.mrb[255].mxu1 }
 0x2f5   :  { %10238 = vst [vmem:[#allocation29_spill] sm:$0xff] %v8483_v52 }
 0x2f9   :  { %v8487_v11 = vpop.f32.mrb[0].mxu1 }
 0x2fa   :  { %10240 = vst [vmem:[#allocation30_spill] sm:$0xff] %v8487_v11  ;;  %v8491_v12 = vpop.f32.mrb[1].mxu1 }
 0x2fb   :  { %10242 = vst [vmem:[#allocation31_spill] sm:$0xff] %v8491_v12  ;;  %v8495_v22 = vpop.f32.mrb[2].mxu1 }
 0x2fc   :  { %10244 = vst [vmem:[#allocation188_spill] sm:$0xff] %v8495_v22  ;;  %v8499_v34 = vpop.f32.mrb[3].mxu1 }
 0x2fd   :  { %10246 = vst [vmem:[#allocation189_spill] sm:$0xff] %v8499_v34 }
 0x301   :  { %v8503_v52 = vpop.f32.mrb[4].mxu1 }
 0x302   :  { %10248 = vst [vmem:[#allocation32_spill] sm:$0xff] %v8503_v52  ;;  %v8507_v11 = vpop.f32.mrb[5].mxu1 }
 0x303   :  { %10250 = vst [vmem:[#allocation33_spill] sm:$0xff] %v8507_v11  ;;  %v8511_v12 = vpop.f32.mrb[6].mxu1 }
 0x304   :  { %10252 = vst [vmem:[#allocation34_spill] sm:$0xff] %v8511_v12  ;;  %v8515_v22 = vpop.f32.mrb[7].mxu1 }
 0x305   :  { %10254 = vst [vmem:[#allocation114_spill] sm:$0xff] %v8515_v22 }
 0x309   :  { %v8519_v34 = vpop.f32.mrb[8].mxu1 }
 0x30a   :  { %10256 = vst [vmem:[#allocation190_spill] sm:$0xff] %v8519_v34  ;;  %v8523_v52 = vpop.f32.mrb[9].mxu1 }
 0x30b   :  { %10258 = vst [vmem:[#allocation35_spill] sm:$0xff] %v8523_v52  ;;  %v8527_v11 = vpop.f32.mrb[10].mxu1 }
 0x30c   :  { %10260 = vst [vmem:[#allocation116_spill] sm:$0xff] %v8527_v11  ;;  %v8531_v12 = vpop.f32.mrb[11].mxu1 }
 0x30d   :  { %10262 = vst [vmem:[#allocation191_spill] sm:$0xff] %v8531_v12 }
 0x311   :  { %v8535_v22 = vpop.f32.mrb[12].mxu1 }
 0x312   :  { %10264 = vst [vmem:[#allocation118_spill] sm:$0xff] %v8535_v22  ;;  %v8539_v34 = vpop.f32.mrb[13].mxu1 }
 0x313   :  { %10266 = vst [vmem:[#allocation192_spill] sm:$0xff] %v8539_v34  ;;  %v8543_v52 = vpop.f32.mrb[14].mxu1 }
 0x314   :  { %10268 = vst [vmem:[#allocation36_spill] sm:$0xff] %v8543_v52  ;;  %v8547_v11 = vpop.f32.mrb[15].mxu1 }
 0x315   :  { %10270 = vst [vmem:[#allocation37_spill] sm:$0xff] %v8547_v11 }
 0x319   :  { %v8551_v12 = vpop.f32.mrb[16].mxu1 }
 0x31a   :  { %10272 = vst [vmem:[#allocation120_spill] sm:$0xff] %v8551_v12  ;;  %v8555_v22 = vpop.f32.mrb[17].mxu1 }
 0x31b   :  { %10274 = vst [vmem:[#allocation193_spill] sm:$0xff] %v8555_v22  ;;  %v8559_v34 = vpop.f32.mrb[18].mxu1 }
 0x31c   :  { %10276 = vst [vmem:[#allocation38_spill] sm:$0xff] %v8559_v34  ;;  %v8563_v52 = vpop.f32.mrb[19].mxu1 }
 0x31d   :  { %10278 = vst [vmem:[#allocation122_spill] sm:$0xff] %v8563_v52 }
 0x321   :  { %v1834_v11 = vpop.f32.mrb[20].mxu1 }
 0x322   :  { %v2097_v29 = vmax.f32 %v10280_v21, %v1834_v11  ;;  %v1836_v53 = vpop.f32.mrb[21].mxu1  ;;  %v10286_v11 = vmax.f32 %v10206_v37, %v8379_v63  ;;  %v10289_v63 = vld [vmem:[#allocation109_spill] sm:$0xff] }
 0x323   :  { %v2098_v12 = vmax.f32 %v10281_v35, %v1836_v53  ;;  %v1838_v47 = vpop.f32.mrb[22].mxu1 }
 0x324   :  { %v2301_v22 = vmax.f32 %v10282_v15, %v2097_v29  ;;  %v2099_v24 = vmax.f32 %v10283_v25, %v1838_v47  ;;  %v1840_v6 = vpop.f32.mrb[23].mxu1  ;;  %v10287_v29 = vmax.f32 %v10209_v38, %v8383_v54  ;;  %v10290_v54 = vmax.f32 %v10210_v30, %v8391_v43  ;;  %v10291_v15 = vld [vmem:[#allocation110_spill] sm:$0xff] }
 0x325   :  { %v2302_v34 = vmax.f32 %v10284_v9, %v2098_v12  ;;  %v2100_v42 = vmax.f32 %v10285_v26, %v1840_v6  ;;  %v10288_v26 = vld [vmem:[#allocation108_spill] sm:$0xff]  ;;  %v10294_v43 = vmax.f32 %v10212_v45, %v8399_v59 }
 0x326   :  { %v2349_v52 = vadd.f32 %v2301_v22, %v7990_v19  ;;  %v2303_v21 = vmax.f32 %v10286_v11, %v2099_v24  ;;  %v10292_v11 = vmax.f32 %v10211_v62, %v8395_v57  ;;  %v10295_v57 = vmax.f32 %v10213_v5, %v8403_v56 }
 0x327   :  { %v2350_v53 = vadd.f32 %v2302_v34, %v7993_v1  ;;  %v2304_v3 = vmax.f32 %v10287_v29, %v2100_v42 }
 0x328   :  { %v2351_v25 = vadd.f32 %v2303_v21, %v7990_v19  ;;  %v2397_v12 = vmax.f32 %v2349_v52, 0.0 }
 0x329   :  { %v2352_v47 = vadd.f32 %v2304_v3, %v7993_v1  ;;  %v1844_v2 = vpop.f32.mrb[24].mxu1  ;;  %v2398_v4 = vmax.f32 %v2350_v53, 0.0  ;;  %v10293_v53 = vld [vmem:[#allocation111_spill] sm:$0xff]  ;;  %v6305_v3 = vld [vmem:[%s9630_s3] ss:$8 sps:$4 sm:$0xff]  }
 0x32a   :  { %v2399_v58 = vmax.f32 %v2351_v25, 0.0  ;;  %v2101_v6 = vmax.f32 %v10288_v26, %v1844_v2  ;;  %v1846_v22 = vpop.f32.mrb[25].mxu1 }
 0x32b   :  { %v2400_v35 = vmax.f32 %v2352_v47, 0.0  ;;  %v2102_v24 = vmax.f32 %v10289_v63, %v1846_v22  ;;  %v1848_v37 = vpop.f32.mrb[26].mxu1  ;;  %v6310_v47 = vld [vmem:[%s9630_s3 + $0x14] ss:$8 sps:$4 sm:$0xff]  }
 0x32c   :  { %v8589_v34 = vpack.c.bf16 %v2399_v58, %v2397_v12  ;;  %v2305_v38 = vmax.f32 %v10290_v54, %v2101_v6  ;;  %v2103_v9 = vmax.f32 %v10291_v15, %v1848_v37  ;;  %v1850_v42 = vpop.f32.mrb[27].mxu1  ;;  %v6308_v58 = vld [vmem:[%s9630_s3 + $0x10] ss:$8 sps:$4 sm:$0xff]  }
 0x32d   :  { %v8595_v52 = vpack.c.bf16 %v2400_v35, %v2398_v4  ;;  %v2306_v21 = vmax.f32 %v10292_v11, %v2102_v24  ;;  %v2104_v29 = vmax.f32 %v10293_v53, %v1850_v42  ;;  %v10296_v22 = vld [vmem:[#allocation112_spill] sm:$0xff]  ;;  %v6313_v4 = vld [vmem:[%s9630_s3 + $0x24] ss:$8 sps:$4 sm:$0xff]  }
 0x32e   :  { %v2353_v25 = vadd.f32 %v2305_v38, %v7990_v19  ;;  %v2307_v30 = vmax.f32 %v10294_v43, %v2103_v9  ;;  %v10297_v24 = vld [vmem:[#allocation113_spill] sm:$0xff]  ;;  %v10298_v38 = vmax.f32 %v10214_v28, %v8407_v23  ;;  %v10299_v9 = vld [vmem:[#allocation115_spill] sm:$0xff]  ;;  %v10302_v28 = vmax.f32 %v10216_v33, %v8415_v7 }
 0x32f   :  { %v2354_v2 = vadd.f32 %v2306_v21, %v7993_v1  ;;  %v2308_v62 = vmax.f32 %v10295_v57, %v2104_v29  ;;  %5332 = vmatprep.mubr.msk.bf16.mxu0 %vm2662_vm2, %v8595_v52  ;;  %v10300_v29 = vmax.f32 %v10215_v60, %v8411_v20  ;;  %v10303_v60 = vmax.f32 %v10217_v32, %v8419_v48 }
 0x330   :  { %v2355_v12 = vadd.f32 %v2307_v30, %v7990_v19  ;;  %2744 = vmatmul.mubr.bf16.vlgmr.msra.gmra.mrb[60].mxu0 %v8589_v34  ;;  %v2401_v26 = vmax.f32 %v2353_v25, 0.0  ;;  %v10301_v25 = vld [vmem:[#allocation117_spill] sm:$0xff] }
 0x331   :  { %v2356_v59 = vadd.f32 %v2308_v62, %v7993_v1  ;;  %v1854_v45 = vpop.f32.mrb[28].mxu1  ;;  %3031 = vmatpush1.bf16.msra.mxu0 %v6305_v3  ;;  %v2402_v35 = vmax.f32 %v2354_v2, 0.0  ;;  %v6311_v30 = vld [vmem:[%s9630_s3 + $0x20] ss:$8 sps:$4 sm:$0xff]   ;;  %v6316_v2 = vld [vmem:[%s9630_s3 + $0x34] ss:$8 sps:$4 sm:$0xff]  }
 0x332   :  { %v2403_v6 = vmax.f32 %v2355_v12, 0.0  ;;  %v2105_v56 = vmax.f32 %v10296_v22, %v1854_v45  ;;  %v1856_v5 = vpop.f32.mrb[29].mxu1  ;;  %3032 = vmatprep.subr.bf16.mxu0 %v6310_v47  ;;  %v6314_v12 = vld [vmem:[%s9630_s3 + $0x30] ss:$8 sps:$4 sm:$0xff]  }
 0x333   :  { %v2404_v63 = vmax.f32 %v2356_v59, 0.0  ;;  %v2106_v37 = vmax.f32 %v10297_v24, %v1856_v5  ;;  %v1858_v54 = vpop.f32.mrb[30].mxu1 }
 0x334   :  { %v2309_v15 = vmax.f32 %v10298_v38, %v2105_v56  ;;  %v2107_v42 = vmax.f32 %v10299_v9, %v1858_v54  ;;  %v1860_v11 = vpop.f32.mrb[31].mxu1  ;;  %v8632_v21 = vpack.c.bf16 %v2403_v6, %v2401_v26  ;;  %v6319_v26 = vld [vmem:[%s9630_s3 + $0x44] ss:$8 sps:$4 sm:$0xff]   ;;  %v10308_v9 = vmax.f32 %v10219_v40, %v8427_v10 }
 0x335   :  { %v8634_v53 = vpack.c.bf16 %v2404_v63, %v2402_v35  ;;  %v2310_v3 = vmax.f32 %v10300_v29, %v2106_v37  ;;  %v2108_v43 = vmax.f32 %v10301_v25, %v1860_v11  ;;  %3033 = vmatpush1.bf16.msra.mxu0 %v6308_v58  ;;  %v10304_v58 = vld [vmem:[#allocation119_spill] sm:$0xff]  ;;  %v10305_v56 = vld [vmem:[#allocation121_spill] sm:$0xff]  ;;  %v10306_v63 = vmax.f32 %v10218_v13, %v8423_v51 }
 0x336   :  { %v2357_v23 = vadd.f32 %v2309_v15, %v7990_v19  ;;  %v2311_v47 = vmax.f32 %v10302_v28, %v2107_v42  ;;  %3034 = vmatprep.subr.bf16.mxu0 %v6313_v4  ;;  %v10307_v37 = vld [vmem:[#allocation123_spill] sm:$0xff]  ;;  %v10309_v11 = vld [vmem:[#allocation125_spill] sm:$0xff]  ;;  %v10310_v51 = vmax.f32 %v10220_v55, %v8431_v0  ;;  %v10311_v10 = vmax.f32 %v10221_v46, %v8435_v49 }
 0x337   :  { %v2358_v20 = vadd.f32 %v2310_v3, %v7993_v1  ;;  %v2312_v57 = vmax.f32 %v10303_v60, %v2108_v43  ;;  %5333 = vmatprep.mubr.msk.bf16.mxu0 %vm2662_vm2, %v8634_v53  ;;  %v6317_v3 = vld [vmem:[%s9630_s3 + $0x40] ss:$8 sps:$4 sm:$0xff]   ;;  %v6322_v43 = vld [vmem:[%s9630_s3 + $0x54] ss:$8 sps:$4 sm:$0xff]   ;;  %v6320_v28 = vld [vmem:[%s9630_s3 + $0x50] ss:$8 sps:$4 sm:$0xff]  }
 0x338   :  { %v2359_v62 = vadd.f32 %v2311_v47, %v7990_v19  ;;  %2754 = vmatmul.mubr.bf16.gmra.mrb[64].mxu0 %v8632_v21  ;;  %v2405_v59 = vmax.f32 %v2357_v23, 0.0  ;;  %v6325_v60 = vld [vmem:[%s9630_s3 + $0x64] ss:$8 sps:$4 sm:$0xff]  }
 0x339   :  { %v2360_v7 = vadd.f32 %v2312_v57, %v7993_v1  ;;  %v1864_v33 = vpop.f32.mrb[32].mxu1  ;;  %3035 = vmatpush1.bf16.msra.mxu0 %v6311_v30  ;;  %v2406_v6 = vmax.f32 %v2358_v20, 0.0  ;;  %v10312_v20 = vld [vmem:[#allocation127_spill] sm:$0xff] }
 0x33a   :  { %v2407_v45 = vmax.f32 %v2359_v62, 0.0  ;;  %v2109_v48 = vmax.f32 %v10304_v58, %v1864_v33  ;;  %v1866_v32 = vpop.f32.mrb[33].mxu1  ;;  %3036 = vmatprep.subr.bf16.mxu0 %v6316_v2 }
 0x33b   :  { %v2408_v22 = vmax.f32 %v2360_v7, 0.0  ;;  %v2110_v5 = vmax.f32 %v10305_v56, %v1866_v32  ;;  %v1868_v4 = vpop.f32.mrb[34].mxu1  ;;  %v10313_v7 = vld [vmem:[#allocation129_spill] sm:$0xff] }
 0x33c   :  { %v8667_v35 = vpack.c.bf16 %v2407_v45, %v2405_v59  ;;  %v2313_v24 = vmax.f32 %v10306_v63, %v2109_v48  ;;  %v2111_v54 = vmax.f32 %v10307_v37, %v1868_v4  ;;  %v1870_v38 = vpop.f32.mrb[35].mxu1  ;;  %v10314_v45 = vmax.f32 %v10222_v36, %v8439_v44  ;;  %v10315_v48 = vld [vmem:[#allocation131_spill] sm:$0xff]  ;;  %v6323_v63 = vld [vmem:[%s9630_s3 + $0x60] ss:$8 sps:$4 sm:$0xff]  }
 0x33d   :  { %v8673_v15 = vpack.c.bf16 %v2408_v22, %v2406_v6  ;;  %v2314_v42 = vmax.f32 %v10308_v9, %v2110_v5  ;;  %v2112_v29 = vmax.f32 %v10309_v11, %v1870_v38  ;;  %3037 = vmatpush1.bf16.msra.mxu0 %v6314_v12  ;;  %v10316_v22 = vmax.f32 %v10223_v61, %v8443_v50  ;;  %v10317_v5 = vld [vmem:[#allocation133_spill] sm:$0xff]  ;;  %v6328_v37 = vld [vmem:[%s9630_s3 + $0x74] ss:$8 sps:$4 sm:$0xff]   ;;  %v6326_v9 = vld [vmem:[%s9630_s3 + $0x70] ss:$8 sps:$4 sm:$0xff]  }
 0x33e   :  { %v2361_v25 = vadd.f32 %v2313_v24, %v7990_v19  ;;  %v2315_v13 = vmax.f32 %v10310_v51, %v2111_v54  ;;  %3038 = vmatprep.subr.bf16.mxu0 %v6319_v26  ;;  %v10318_v36 = vmax.f32 %v10224_v8, %v8447_v16  ;;  %v10319_v61 = vmax.f32 %v10225_v18, %v8451_v17 }
 0x33f   :  { %v2362_v40 = vadd.f32 %v2314_v42, %v7993_v1  ;;  %v2316_v30 = vmax.f32 %v10311_v10, %v2112_v29  ;;  %5334 = vmatprep.mubr.msk.bf16.mxu0 %vm2662_vm2, %v8673_v15  ;;  %v10320_v29 = vld [vmem:[#allocation135_spill] sm:$0xff] }
 0x340   :  { %v2363_v23 = vadd.f32 %v2315_v13, %v7990_v19  ;;  %2764 = vmatmul.mubr.bf16.gmra.mrb[68].mxu0 %v8667_v35  ;;  %v2409_v47 = vmax.f32 %v2361_v25, 0.0  ;;  %v10321_v13 = vld [vmem:[#allocation137_spill] sm:$0xff] }
 0x341   :  { %v2364_v55 = vadd.f32 %v2316_v30, %v7993_v1  ;;  %v1874_v0 = vpop.f32.mrb[36].mxu1  ;;  %3039 = vmatpush1.bf16.msra.mxu0 %v6317_v3  ;;  %v2410_v57 = vmax.f32 %v2362_v40, 0.0  ;;  %v6331_v3 = vld [vmem:[%s9630_s3 + $0x84] ss:$8 sps:$4 sm:$0xff]   ;;  %v10322_v30 = vmax.f32 %v10226_v41, %v8455_v14 }
 0x342   :  { %v2411_v2 = vmax.f32 %v2363_v23, 0.0  ;;  %v2113_v46 = vmax.f32 %v10312_v20, %v1874_v0  ;;  %v1876_v49 = vpop.f32.mrb[37].mxu1  ;;  %3040 = vmatprep.subr.bf16.mxu0 %v6322_v43  ;;  %v10326_v14 = vld [vmem:[#allocation78_spill] sm:$0xff] }
 0x343   :  { %v2412_v62 = vmax.f32 %v2364_v55, 0.0  ;;  %v2114_v33 = vmax.f32 %v10313_v7, %v1876_v49  ;;  %v1878_v12 = vpop.f32.mrb[38].mxu1  ;;  %v10323_v55 = vld [vmem:[#allocation139_spill] sm:$0xff]  ;;  %v10327_v41 = vld [vmem:[#allocation26_spill] sm:$0xff] }
 0x344   :  { %v8706_v59 = vpack.c.bf16 %v2411_v2, %v2409_v47  ;;  %v2317_v58 = vmax.f32 %v10314_v45, %v2113_v46  ;;  %v2115_v32 = vmax.f32 %v10315_v48, %v1878_v12  ;;  %v1880_v26 = vpop.f32.mrb[39].mxu1  ;;  %v10324_v2 = vmax.f32 %v10227_v31, %v8459_v27  ;;  %v10325_v46 = vld [vmem:[#allocation141_spill] sm:$0xff]  ;;  %v10329_v31 = vld [vmem:[#allocation79_spill] sm:$0xff] }
 0x345   :  { %v8712_v6 = vpack.c.bf16 %v2412_v62, %v2410_v57  ;;  %v2318_v56 = vmax.f32 %v10316_v22, %v2114_v33  ;;  %v2116_v4 = vmax.f32 %v10317_v5, %v1880_v26  ;;  %3041 = vmatpush1.bf16.msra.mxu0 %v6320_v28  ;;  %v10328_v62 = vmax.f32 %v10326_v14, %v10327_v41  ;;  %v6334_v33 = vld [vmem:[%s9630_s3 + $0x94] ss:$8 sps:$4 sm:$0xff]   ;;  %v6332_v22 = vld [vmem:[%s9630_s3 + $0x90] ss:$8 sps:$4 sm:$0xff]  }
 0x346   :  { %v2365_v24 = vadd.f32 %v2317_v58, %v7990_v19  ;;  %v2319_v44 = vmax.f32 %v10318_v36, %v2115_v32  ;;  %3042 = vmatprep.subr.bf16.mxu0 %v6325_v60  ;;  %v6329_v60 = vld [vmem:[%s9630_s3 + $0x80] ss:$8 sps:$4 sm:$0xff]   ;;  %v10330_v12 = vld [vmem:[#allocation27_spill] sm:$0xff]  ;;  %v6337_v36 = vld [vmem:[%s9630_s3 + $0xa4] ss:$8 sps:$4 sm:$0xff]  }
 0x347   :  { %v2366_v50 = vadd.f32 %v2318_v56, %v7993_v1  ;;  %v2320_v54 = vmax.f32 %v10319_v61, %v2116_v4  ;;  %5335 = vmatprep.mubr.msk.bf16.mxu0 %vm2662_vm2, %v8712_v6  ;;  %v10331_v45 = vmax.f32 %v10329_v31, %v10330_v12  ;;  %v10332_v4 = vld [vmem:[#allocation143_spill] sm:$0xff] }
 0x348   :  { %v2367_v38 = vadd.f32 %v2319_v44, %v7990_v19  ;;  %2774 = vmatmul.mubr.bf16.gmra.mrb[72].mxu0 %v8706_v59  ;;  %v2413_v42 = vmax.f32 %v2365_v24, 0.0  ;;  %v10348_v12 = vld [vmem:[#allocation151_spill] sm:$0xff] }
 0x349   :  { %v2368_v16 = vadd.f32 %v2320_v54, %v7993_v1  ;;  %v1884_v8 = vpop.f32.mrb[40].mxu1  ;;  %3043 = vmatpush1.bf16.msra.mxu0 %v6323_v63  ;;  %v2414_v25 = vmax.f32 %v2366_v50, 0.0  ;;  %v10333_v50 = vld [vmem:[#allocation145_spill] sm:$0xff] }
 0x34a   :  { %v2415_v11 = vmax.f32 %v2367_v38, 0.0  ;;  %v2117_v17 = vmax.f32 %v10320_v29, %v1884_v8  ;;  %v1886_v18 = vpop.f32.mrb[41].mxu1  ;;  %3044 = vmatprep.subr.bf16.mxu0 %v6328_v37  ;;  %v10335_v8 = vld [vmem:[#allocation186_spill] sm:$0xff] }
 0x34b   :  { %v2416_v51 = vmax.f32 %v2368_v16, 0.0  ;;  %v2118_v43 = vmax.f32 %v10321_v13, %v1886_v18  ;;  %v1888_v40 = vpop.f32.mrb[42].mxu1  ;;  %v10334_v16 = vld [vmem:[#allocation80_spill] sm:$0xff] }
 0x34c   :  { %v8745_v10 = vpack.c.bf16 %v2415_v11, %v2413_v42  ;;  %v2321_v23 = vmax.f32 %v10322_v30, %v2117_v17  ;;  %v2119_v0 = vmax.f32 %v10323_v55, %v1888_v40  ;;  %v1890_v28 = vpop.f32.mrb[43].mxu1  ;;  %v10337_v11 = vld [vmem:[#allocation147_spill] sm:$0xff]  ;;  %v6335_v30 = vld [vmem:[%s9630_s3 + $0xa0] ss:$8 sps:$4 sm:$0xff]  }
 0x34d   :  { %v8751_v47 = vpack.c.bf16 %v2416_v51, %v2414_v25  ;;  %v2322_v20 = vmax.f32 %v10324_v2, %v2118_v43  ;;  %v2120_v49 = vmax.f32 %v10325_v46, %v1890_v28  ;;  %3045 = vmatpush1.bf16.msra.mxu0 %v6326_v9  ;;  %v10336_v9 = vmax.f32 %v10334_v16, %v10335_v8  ;;  %v10339_v25 = vld [vmem:[#allocation187_spill] sm:$0xff]  ;;  %v10341_v43 = vld [vmem:[#allocation149_spill] sm:$0xff]  ;;  %v10342_v55 = vld [vmem:[#allocation82_spill] sm:$0xff] }
 0x34e   :  { %v2369_v57 = vadd.f32 %v2321_v23, %v7990_v19  ;;  %v2323_v7 = vmax.f32 %v10328_v62, %v2119_v0  ;;  %3046 = vmatprep.subr.bf16.mxu0 %v6331_v3  ;;  %v10338_v3 = vld [vmem:[#allocation81_spill] sm:$0xff]  ;;  %v10343_v0 = vld [vmem:[#allocation28_spill] sm:$0xff]  ;;  %v10355_v8 = vld [vmem:[#allocation31_spill] sm:$0xff] }
 0x34f   :  { %v2370_v27 = vadd.f32 %v2322_v20, %v7993_v1  ;;  %v2324_v58 = vmax.f32 %v10331_v45, %v2120_v49  ;;  %5336 = vmatprep.mubr.msk.bf16.mxu0 %vm2662_vm2, %v8751_v47  ;;  %v10340_v51 = vmax.f32 %v10338_v3, %v10339_v25  ;;  %v10344_v28 = vmax.f32 %v10342_v55, %v10343_v0  ;;  %v6340_v20 = vld [vmem:[%s9630_s3 + $0xb4] ss:$8 sps:$4 sm:$0xff]   ;;  %v10354_v16 = vld [vmem:[#allocation85_spill] sm:$0xff]  ;;  %v10358_v3 = vld [vmem:[#allocation86_spill] sm:$0xff] }
 0x350   :  { %v2371_v48 = vadd.f32 %v2323_v7, %v7990_v19  ;;  %2784 = vmatmul.mubr.bf16.gmra.mrb[76].mxu0 %v8745_v10  ;;  %v2417_v56 = vmax.f32 %v2369_v57, 0.0  ;;  %v10345_v49 = vld [vmem:[#allocation83_spill] sm:$0xff]  ;;  %v10359_v25 = vld [vmem:[#allocation188_spill] sm:$0xff] }
 0x351   :  { %v2372_v32 = vadd.f32 %v2324_v58, %v7993_v1  ;;  %v1894_v26 = vpop.f32.mrb[44].mxu1  ;;  %3047 = vmatpush1.bf16.msra.mxu0 %v6329_v60  ;;  %v2418_v44 = vmax.f32 %v2370_v27, 0.0  ;;  %v10346_v60 = vld [vmem:[#allocation29_spill] sm:$0xff] }
 0x352   :  { %v2419_v5 = vmax.f32 %v2371_v48, 0.0  ;;  %v2121_v63 = vmax.f32 %v10332_v4, %v1894_v26  ;;  %v1896_v24 = vpop.f32.mrb[45].mxu1  ;;  %3048 = vmatprep.subr.bf16.mxu0 %v6334_v33  ;;  %v10347_v57 = vmax.f32 %v10345_v49, %v10346_v60  ;;  %v6338_v33 = vld [vmem:[%s9630_s3 + $0xb0] ss:$8 sps:$4 sm:$0xff]   ;;  %v6343_v48 = vld [vmem:[%s9630_s3 + $0x184] ss:$8 sps:$4 sm:$0xff]  }
 0x353   :  { %v2420_v37 = vmax.f32 %v2372_v32, 0.0  ;;  %v2122_v61 = vmax.f32 %v10333_v50, %v1896_v24  ;;  %v1898_v54 = vpop.f32.mrb[46].mxu1  ;;  %v10351_v24 = vld [vmem:[#allocation30_spill] sm:$0xff]  ;;  %v10364_v49 = vld [vmem:[#allocation159_spill] sm:$0xff] }
 0x354   :  { %v8784_v38 = vpack.c.bf16 %v2419_v5, %v2417_v56  ;;  %v2325_v42 = vmax.f32 %v10336_v9, %v2121_v63  ;;  %v2123_v29 = vmax.f32 %v10337_v11, %v1898_v54  ;;  %v1900_v17 = vpop.f32.mrb[47].mxu1  ;;  %v10350_v63 = vld [vmem:[#allocation84_spill] sm:$0xff]  ;;  %v10356_v9 = vmax.f32 %v10354_v16, %v10355_v8  ;;  %v10357_v11 = vld [vmem:[#allocation157_spill] sm:$0xff] }
 0x355   :  { %v8790_v18 = vpack.c.bf16 %v2420_v37, %v2418_v44  ;;  %v2326_v13 = vmax.f32 %v10340_v51, %v2122_v61  ;;  %v2124_v40 = vmax.f32 %v10341_v43, %v1900_v17  ;;  %3049 = vmatpush1.bf16.msra.mxu0 %v6332_v22  ;;  %v10349_v22 = vld [vmem:[#allocation153_spill] sm:$0xff]  ;;  %v10353_v37 = vld [vmem:[#allocation155_spill] sm:$0xff]  ;;  %v10360_v51 = vmax.f32 %v10358_v3, %v10359_v25 }
 0x356   :  { %v2373_v23 = vadd.f32 %v2325_v42, %v7990_v19  ;;  %v2327_v2 = vmax.f32 %v10344_v28, %v2123_v29  ;;  %3050 = vmatprep.subr.bf16.mxu0 %v6337_v36  ;;  %v10352_v36 = vmax.f32 %v10350_v63, %v10351_v24 }
 0x357   :  { %v2374_v46 = vadd.f32 %v2326_v13, %v7993_v1  ;;  %v2328_v14 = vmax.f32 %v10347_v57, %v2124_v40  ;;  %5337 = vmatprep.mubr.msk.bf16.mxu0 %vm2662_vm2, %v8790_v18  ;;  %v10361_v40 = vld [vmem:[#allocation87_spill] sm:$0xff] }
 0x358   :  { %v2375_v41 = vadd.f32 %v2327_v2, %v7990_v19  ;;  %2794 = vmatmul.mubr.bf16.gmra.mrb[80].mxu0 %v8784_v38  ;;  %v2421_v27 = vmax.f32 %v2373_v23, 0.0 }
 0x359   :  { %v2376_v62 = vadd.f32 %v2328_v14, %v7993_v1  ;;  %v1904_v7 = vpop.f32.mrb[48].mxu1  ;;  %3051 = vmatpush1.bf16.msra.mxu0 %v6335_v30  ;;  %v2422_v32 = vmax.f32 %v2374_v46, 0.0  ;;  %v10362_v30 = vld [vmem:[#allocation189_spill] sm:$0xff] }
 0x35a   :  { %v2423_v31 = vmax.f32 %v2375_v41, 0.0  ;;  %v2125_v45 = vmax.f32 %v10348_v12, %v1904_v7  ;;  %v1906_v58 = vpop.f32.mrb[49].mxu1  ;;  %3052 = vmatprep.subr.bf16.mxu0 %v6340_v20  ;;  %v10363_v23 = vmax.f32 %v10361_v40, %v10362_v30  ;;  %v10367_v12 = vld [vmem:[#allocation32_spill] sm:$0xff]  ;;  %v10381_v30 = vld [vmem:[#allocation165_spill] sm:$0xff] }
 0x35b   :  { %v2424_v26 = vmax.f32 %v2376_v62, 0.0  ;;  %v2126_v56 = vmax.f32 %v10349_v22, %v1906_v58  ;;  %v1908_v5 = vpop.f32.mrb[50].mxu1  ;;  %v10365_v62 = vld [vmem:[#allocation160_spill] sm:$0xff] }
 0x35c   :  { %v8823_v4 = vpack.c.bf16 %v2423_v31, %v2421_v27  ;;  %v2329_v44 = vmax.f32 %v10352_v36, %v2125_v45  ;;  %v2127_v50 = vmax.f32 %v10353_v37, %v1908_v5  ;;  %v1910_v61 = vpop.f32.mrb[51].mxu1  ;;  %v10366_v31 = vld [vmem:[#allocation88_spill] sm:$0xff]  ;;  %v10371_v5 = vld [vmem:[#allocation33_spill] sm:$0xff]  ;;  %v10373_v36 = vld [vmem:[#allocation163_spill] sm:$0xff] }
 0x35d   :  { %v8829_v54 = vpack.c.bf16 %v2424_v26, %v2422_v32  ;;  %v2330_v42 = vmax.f32 %v10356_v9, %v2126_v56  ;;  %v2128_v29 = vmax.f32 %v10357_v11, %v1910_v61  ;;  %3053 = vmatpush1.bf16.msra.mxu0 %v6338_v33  ;;  %v10368_v45 = vmax.f32 %v10366_v31, %v10367_v12  ;;  %v10370_v56 = vld [vmem:[#allocation89_spill] sm:$0xff]  ;;  %v10375_v61 = vld [vmem:[#allocation34_spill] sm:$0xff] }
 0x35e   :  { %v2377_v17 = vadd.f32 %v2329_v44, %v7990_v19  ;;  %v2331_v13 = vmax.f32 %v10360_v51, %v2127_v50  ;;  %3374 = vmatprep.subr.bf16.mxu0 %v6343_v48  ;;  %v10369_v48 = vld [vmem:[#allocation161_spill] sm:$0xff]  ;;  %v10372_v63 = vmax.f32 %v10370_v56, %v10371_v5  ;;  %v10374_v50 = vld [vmem:[#allocation90_spill] sm:$0xff] }
 0x35f   :  { %v2378_v43 = vadd.f32 %v2330_v42, %v7993_v1  ;;  %v2332_v55 = vmax.f32 %v10363_v23, %v2128_v29  ;;  %5338 = vmatprep.mubr.msk.bf16.mxu0 %vm2662_vm2, %v8829_v54  ;;  %v10376_v16 = vmax.f32 %v10374_v50, %v10375_v61  ;;  %v10377_v42 = vld [vmem:[#allocation91_spill] sm:$0xff]  ;;  %v10378_v11 = vld [vmem:[#allocation114_spill] sm:$0xff]  ;;  %v10387_v12 = vld [vmem:[#allocation93_spill] sm:$0xff] }
 0x360   :  { %v2379_v0 = vadd.f32 %v2331_v13, %v7990_v19  ;;  %2804 = vmatmul.mubr.bf16.gmra.mrb[84].mxu0 %v8823_v4  ;;  %v2425_v20 = vmax.f32 %v2377_v17, 0.0  ;;  %v10379_v29 = vmax.f32 %v10377_v42, %v10378_v11  ;;  %v10380_v13 = vld [vmem:[#allocation16_spill] sm:$0xff]  ;;  %v10391_v5 = vld [vmem:[#allocation94_spill] sm:$0xff]  ;;  %v10395_v50 = vld [vmem:[#allocation191_spill] sm:$0xff] }
 0x361   :  { %v2380_v28 = vadd.f32 %v2332_v55, %v7993_v1  ;;  %v1914_v2 = vpop.f32.mrb[52].mxu1  ;;  %v2426_v14 = vmax.f32 %v2378_v43, 0.0 }
 0x362   :  { %v2427_v46 = vmax.f32 %v2379_v0, 0.0  ;;  %v2129_v60 = vmax.f32 %v10364_v49, %v1914_v2  ;;  %v1916_v57 = vpop.f32.mrb[53].mxu1  ;;  %v10382_v2 = vld [vmem:[#allocation166_spill] sm:$0xff]  ;;  %v10383_v49 = vld [vmem:[#allocation92_spill] sm:$0xff] }
 0x363   :  { %v2428_v41 = vmax.f32 %v2380_v28, 0.0  ;;  %v2130_v7 = vmax.f32 %v10365_v62, %v1916_v57  ;;  %v1918_v33 = vpop.f32.mrb[54].mxu1 }
 0x364   :  { %v8850_v27 = vpack.c.bf16 %v2427_v46, %v2425_v20  ;;  %v2333_v58 = vmax.f32 %v10368_v45, %v2129_v60  ;;  %v2131_v32 = vmax.f32 %v10369_v48, %v1918_v33  ;;  %v1920_v26 = vpop.f32.mrb[55].mxu1  ;;  %v10384_v60 = vld [vmem:[#allocation190_spill] sm:$0xff]  ;;  %v10388_v45 = vld [vmem:[#allocation35_spill] sm:$0xff] }
 0x365   :  { %v8856_v22 = vpack.c.bf16 %v2428_v41, %v2426_v14  ;;  %v2334_v24 = vmax.f32 %v10372_v63, %v2130_v7  ;;  %v2132_v44 = vmax.f32 %v10373_v36, %v1920_v26  ;;  %v10385_v57 = vmax.f32 %v10383_v49, %v10384_v60  ;;  %v10386_v41 = vld [vmem:[#allocation167_spill] sm:$0xff]  ;;  %v10392_v63 = vld [vmem:[#allocation116_spill] sm:$0xff]  ;;  %v10404_v49 = vld [vmem:[#allocation174_spill] sm:$0xff] }
 0x366   :  { %v2381_v37 = vadd.f32 %v2333_v58, %v7990_v19  ;;  %v2335_v8 = vmax.f32 %v10376_v16, %v2131_v32  ;;  %v10389_v58 = vmax.f32 %v10387_v12, %v10388_v45  ;;  %v10390_v32 = vld [vmem:[#allocation169_spill] sm:$0xff] }
 0x367   :  { %v2382_v9 = vadd.f32 %v2334_v24, %v7993_v1  ;;  %v2336_v17 = vmax.f32 %v10379_v29, %v2132_v44  ;;  %5339 = vmatprep.mubr.msk.bf16.mxu0 %vm2662_vm2, %v8856_v22  ;;  %v10393_v24 = vmax.f32 %v10391_v5, %v10392_v63  ;;  %v10398_v29 = vld [vmem:[#allocation170_spill] sm:$0xff] }
 0x368   :  { %v2383_v3 = vadd.f32 %v2335_v8, %v7990_v19  ;;  %2814 = vmatmul.mubr.bf16.gmra.mrb[88].mxu0 %v8850_v27  ;;  %v2429_v43 = vmax.f32 %v2381_v37, 0.0  ;;  %v10394_v37 = vld [vmem:[#allocation95_spill] sm:$0xff] }
 0x369   :  { %v2384_v25 = vadd.f32 %v2336_v17, %v7993_v1  ;;  %v1924_v51 = vpop.f32.mrb[56].mxu1  ;;  %5340 = vmatprep.mubr.msk.bf16.mxu0 %vm2662_vm2, %v10380_v13  ;;  %v2430_v0 = vmax.f32 %v2382_v9, 0.0  ;;  %v10396_v61 = vmax.f32 %v10394_v37, %v10395_v50  ;;  %v10397_v9 = vld [vmem:[#allocation15_spill] sm:$0xff] }
 0x36a   :  { %v2431_v40 = vmax.f32 %v2383_v3, 0.0  ;;  %v2133_v23 = vmax.f32 %v10381_v30, %v1924_v51  ;;  %v1926_v55 = vpop.f32.mrb[57].mxu1 }
 0x36b   :  { %v2432_v28 = vmax.f32 %v2384_v25, 0.0  ;;  %v2134_v20 = vmax.f32 %v10382_v2, %v1926_v55  ;;  %v1928_v46 = vpop.f32.mrb[58].mxu1  ;;  %v10399_v25 = vld [vmem:[#allocation171_spill] sm:$0xff]  ;;  %v10402_v2 = vld [vmem:[#allocation118_spill] sm:$0xff] }
 0x36c   :  { %v2337_v14 = vmax.f32 %v10385_v57, %v2133_v23  ;;  %v2135_v62 = vmax.f32 %v10386_v41, %v1928_v46  ;;  %v1930_v7 = vpop.f32.mrb[59].mxu1  ;;  %v8883_v33 = vpack.c.bf16 %v2431_v40, %v2429_v43  ;;  %v10400_v23 = vld [vmem:[#allocation172_spill] sm:$0xff] }
 0x36d   :  { %v8885_v31 = vpack.c.bf16 %v2432_v28, %v2430_v0  ;;  %v2338_v48 = vmax.f32 %v10389_v58, %v2134_v20  ;;  %v2136_v26 = vmax.f32 %v10390_v32, %v1930_v7  ;;  %v10401_v28 = vld [vmem:[#allocation96_spill] sm:$0xff] }
 0x36e   :  { %v2385_v56 = vadd.f32 %v2337_v14, %v7990_v19  ;;  %v2339_v36 = vmax.f32 %v10393_v24, %v2135_v62  ;;  %v10403_v20 = vmax.f32 %v10401_v28, %v10402_v2  ;;  %v10405_v62 = vld [vmem:[#allocation97_spill] sm:$0xff]  ;;  %v10406_v7 = vld [vmem:[#allocation192_spill] sm:$0xff] }
 0x36f   :  { %v2386_v44 = vadd.f32 %v2338_v48, %v7993_v1  ;;  %v2340_v16 = vmax.f32 %v10396_v61, %v2136_v26  ;;  %v10407_v12 = vmax.f32 %v10405_v62, %v10406_v7  ;;  %v10408_v58 = vld [vmem:[#allocation176_spill] sm:$0xff]  ;;  %v10409_v26 = vld [vmem:[#allocation98_spill] sm:$0xff] }
 0x370   :  { %v2387_v8 = vadd.f32 %v2339_v36, %v7990_v19  ;;  %2824 = vmatmul.mubr.bf16.gmra.mrb[92].mxu0 %v10397_v9  ;;  %v2433_v17 = vmax.f32 %v2385_v56, 0.0  ;;  %v10410_v56 = vld [vmem:[#allocation36_spill] sm:$0xff]  ;;  %v10412_v36 = vld [vmem:[#allocation99_spill] sm:$0xff] }
 0x371   :  { %v2388_v42 = vadd.f32 %v2340_v16, %v7993_v1  ;;  %v1934_v11 = vpop.f32.mrb[60].mxu1  ;;  %5341 = vmatprep.mubr.msk.bf16.mxu0 %vm2662_vm2, %v10398_v29  ;;  %v2434_v40 = vmax.f32 %v2386_v44, 0.0  ;;  %v10411_v5 = vmax.f32 %v10409_v26, %v10410_v56  ;;  %v10413_v44 = vld [vmem:[#allocation37_spill] sm:$0xff]  ;;  %v10415_v16 = vld [vmem:[#allocation168_spill] sm:$0xff] }
 0x372   :  { %v2435_v3 = vmax.f32 %v2387_v8, 0.0  ;;  %v2137_v51 = vmax.f32 %v10399_v25, %v1934_v11  ;;  %v1936_v43 = vpop.f32.mrb[61].mxu1  ;;  %v10414_v37 = vmax.f32 %v10412_v36, %v10413_v44  ;;  %v10416_v11 = vld [vmem:[#allocation18_spill] sm:$0xff]  ;;  %v10419_v28 = vld [vmem:[#allocation100_spill] sm:$0xff] }
 0x373   :  { %v2436_v30 = vmax.f32 %v2388_v42, 0.0  ;;  %v2138_v55 = vmax.f32 %v10400_v23, %v1936_v43  ;;  %v1938_v0 = vpop.f32.mrb[62].mxu1  ;;  %v10417_v25 = vld [vmem:[#allocation178_spill] sm:$0xff]  ;;  %v10418_v23 = vld [vmem:[#allocation179_spill] sm:$0xff]  ;;  %v10420_v2 = vld [vmem:[#allocation120_spill] sm:$0xff] }
 0x374   :  { %v2341_v46 = vmax.f32 %v10403_v20, %v2137_v51  ;;  %v2139_v60 = vmax.f32 %v10404_v49, %v1938_v0  ;;  %v1940_v57 = vpop.f32.mrb[63].mxu1  ;;  %v8910_v14 = vpack.c.bf16 %v2435_v3, %v2433_v17  ;;  %v10421_v20 = vmax.f32 %v10419_v28, %v10420_v2  ;;  %v10422_v49 = vld [vmem:[#allocation180_spill] sm:$0xff]  ;;  %v10439_v28 = vld [vmem:[#allocation21_spill] sm:$0xff] }
 0x375   :  { %v8912_v41 = vpack.c.bf16 %v2436_v30, %v2434_v40  ;;  %v2342_v45 = vmax.f32 %v10407_v12, %v2138_v55  ;;  %v2140_v48 = vmax.f32 %v10408_v58, %v1940_v57  ;;  %v10423_v12 = vld [vmem:[#allocation101_spill] sm:$0xff]  ;;  %v10440_v2 = vld [vmem:[#allocation20_spill] sm:$0xff] }
 0x376   :  { %v2389_v32 = vadd.f32 %v2341_v46, %v7990_v19  ;;  %v2343_v63 = vmax.f32 %v10411_v5, %v2139_v60  ;;  %v10427_v5 = vld [vmem:[#allocation102_spill] sm:$0xff] }
 0x377   :  { %v2390_v24 = vadd.f32 %v2342_v45, %v7993_v1  ;;  %v2344_v50 = vmax.f32 %v10414_v37, %v2140_v48  ;;  %v10424_v45 = vld [vmem:[#allocation193_spill] sm:$0xff]  ;;  %v10430_v37 = vld [vmem:[#allocation122_spill] sm:$0xff] }
 0x378   :  { %v2391_v61 = vadd.f32 %v2343_v63, %v7990_v19  ;;  %2834 = vmatmul.mubr.bf16.gmra.mrb[96].mxu0 %v10415_v16  ;;  %v2437_v17 = vmax.f32 %v2389_v32, 0.0  ;;  %v10425_v58 = vmax.f32 %v10423_v12, %v10424_v45  ;;  %v10426_v32 = vld [vmem:[#allocation181_spill] sm:$0xff]  ;;  %v10428_v63 = vld [vmem:[#allocation38_spill] sm:$0xff]  ;;  %v10445_v45 = vld [vmem:[#allocation164_spill] sm:$0xff] }
 0x379   :  { %v2392_v8 = vadd.f32 %v2344_v50, %v7993_v1  ;;  %v1944_v42 = vpop.f32.mrb[64].mxu1  ;;  %5342 = vmatprep.mubr.msk.bf16.mxu0 %vm2662_vm2, %v10416_v11  ;;  %v2438_v40 = vmax.f32 %v2390_v24, 0.0  ;;  %v10429_v24 = vmax.f32 %v10427_v5, %v10428_v63  ;;  %v10431_v50 = vmax.f32 %v10279_v39, %v10430_v37  ;;  %v10435_v39 = vld [vmem:[#allocation182_spill] sm:$0xff]  ;;  %v10444_v12 = vld [vmem:[#allocation13_spill] sm:$0xff]  ;;  %v6350_v5 = vld [vmem:[%s9630_s3 + $0x1b0] ss:$8 sps:$4 sm:$0xff]  }
 0x37a   :  { %v2439_v3 = vmax.f32 %v2391_v61, 0.0  ;;  %v2141_v51 = vmax.f32 %v10417_v25, %v1944_v42  ;;  %v1946_v43 = vpop.f32.mrb[65].mxu1  ;;  %v10432_v42 = vld [vmem:[#allocation17_spill] sm:$0xff] }
 0x37b   :  { %v2440_v30 = vmax.f32 %v2392_v8, 0.0  ;;  %v2142_v55 = vmax.f32 %v10418_v23, %v1946_v43  ;;  %v1948_v0 = vpop.f32.mrb[66].mxu1  ;;  %v6355_v63 = vld [vmem:[%s9630_s3 + $0x1c4] ss:$8 sps:$4 sm:$0xff]  }
 0x37c   :  { %v2345_v46 = vmax.f32 %v10421_v20, %v2141_v51  ;;  %v2143_v60 = vmax.f32 %v10422_v49, %v1948_v0  ;;  %v1950_v57 = vpop.f32.mrb[67].mxu1  ;;  %v8937_v62 = vpack.c.bf16 %v2439_v3, %v2437_v17  ;;  %v10433_v3 = vld [vmem:[#allocation175_spill] sm:$0xff]  ;;  %v10443_v49 = vld [vmem:[#allocation14_spill] sm:$0xff] }
 0x37d   :  { %v8939_v7 = vpack.c.bf16 %v2440_v30, %v2438_v40  ;;  %v2346_v48 = vmax.f32 %v10425_v58, %v2142_v55  ;;  %v2144_v26 = vmax.f32 %v10426_v32, %v1950_v57  ;;  %v10434_v55 = vld [vmem:[#allocation173_spill] sm:$0xff]  ;;  %v10437_v0 = vld [vmem:[#allocation183_spill] sm:$0xff] }
 0x37e   :  { %v2393_v56 = vadd.f32 %v2345_v46, %v7990_v19  ;;  %v2347_v36 = vmax.f32 %v10429_v24, %v2143_v60  ;;  %v10441_v20 = vld [vmem:[#allocation23_spill] sm:$0xff]  ;;  %v10442_v46 = vld [vmem:[#allocation22_spill] sm:$0xff] }
 0x37f   :  { %v2394_v44 = vadd.f32 %v2346_v48, %v7993_v1  ;;  %v2348_v61 = vmax.f32 %v10431_v50, %v2144_v26  ;;  %v6341_v60 = vld [vmem:[%s9630_s3 + $0x180] ss:$8 sps:$4 sm:$0xff]   ;;  %v6346_v57 = vld [vmem:[%s9630_s3 + $0x194] ss:$8 sps:$4 sm:$0xff]   ;;  %v6344_v58 = vld [vmem:[%s9630_s3 + $0x190] ss:$8 sps:$4 sm:$0xff]  }
 0x380   :  { %v2395_v8 = vadd.f32 %v2347_v36, %v7990_v19  ;;  %2844 = vmatmul.mubr.bf16.gmra.mrb[100].mxu0 %v10432_v42  ;;  %v2441_v25 = vmax.f32 %v2393_v56, 0.0  ;;  %v10436_v19 = vld [vmem:[#allocation177_spill] sm:$0xff]  ;;  %v6352_v26 = vld [vmem:[%s9630_s3 + $0x1b4] ss:$8 sps:$4 sm:$0xff]   ;;  %v10446_v56 = vld [vmem:[#allocation162_spill] sm:$0xff] }
 0x381   :  { %v2396_v17 = vadd.f32 %v2348_v61, %v7993_v1  ;;  %5343 = vmatprep.mubr.msk.bf16.mxu0 %vm2662_vm2, %v10433_v3  ;;  %v2442_v43 = vmax.f32 %v2394_v44, 0.0  ;;  %v10438_v1 = vld [vmem:[#allocation19_spill] sm:$0xff]  ;;  %v6349_v48 = vld [vmem:[%s9630_s3 + $0x1a4] ss:$8 sps:$4 sm:$0xff]   ;;  %v6347_v32 = vld [vmem:[%s9630_s3 + $0x1a0] ss:$8 sps:$4 sm:$0xff]  }
 0x382   :  { %v2443_v51 = vmax.f32 %v2395_v8, 0.0  ;;  %v6353_v24 = vld [vmem:[%s9630_s3 + $0x1c0] ss:$8 sps:$4 sm:$0xff]   ;;  %v6358_v36 = vld [vmem:[%s9630_s3 + $0x1d4] ss:$8 sps:$4 sm:$0xff]  }
 0x383   :  { %v2444_v40 = vmax.f32 %v2396_v17, 0.0  ;;  %v6356_v44 = vld [vmem:[%s9630_s3 + $0x1d0] ss:$8 sps:$4 sm:$0xff]   ;;  %v6361_v37 = vld [vmem:[%s9630_s3 + $0x1e4] ss:$8 sps:$4 sm:$0xff]  }
 0x384   :  { %v8958_v30 = vpack.c.bf16 %v2443_v51, %v2441_v25  ;;  %v6359_v50 = vld [vmem:[%s9630_s3 + $0x1e0] ss:$8 sps:$4 sm:$0xff]   ;;  %v6364_v61 = vld [vmem:[%s9630_s3 + $0x1f4] ss:$8 sps:$4 sm:$0xff]   ;;  %v6362_v8 = vld [vmem:[%s9630_s3 + $0x1f0] ss:$8 sps:$4 sm:$0xff]  }
 0x385   :  { %v8960_v23 = vpack.c.bf16 %v2444_v40, %v2442_v43  ;;  %v6367_v17 = vld [vmem:[%s9630_s3 + $0x204] ss:$8 sps:$4 sm:$0xff]   ;;  %v6365_v25 = vld [vmem:[%s9630_s3 + $0x200] ss:$8 sps:$4 sm:$0xff]   ;;  %v6370_v51 = vld [vmem:[%s9630_s3 + $0x214] ss:$8 sps:$4 sm:$0xff]  }
 0x386   :  { %v6368_v43 = vld [vmem:[%s9630_s3 + $0x210] ss:$8 sps:$4 sm:$0xff]   ;;  %v6373_v40 = vld [vmem:[%s9630_s3 + $0x224] ss:$8 sps:$4 sm:$0xff]  }
 0x388   :  { %2854 = vmatmul.mubr.bf16.gmra.mrb[104].mxu0 %v10434_v55 }
 0x389   :  { %5344 = vmatprep.mubr.msk.bf16.mxu0 %vm2662_vm2, %v10435_v39 }
 0x390   :  { %2864 = vmatmul.mubr.bf16.gmra.mrb[108].mxu0 %v10436_v19 }
 0x391   :  { %5345 = vmatprep.mubr.msk.bf16.mxu0 %vm2662_vm2, %v10437_v0 }
 0x398   :  { %2874 = vmatmul.mubr.bf16.gmra.mrb[112].mxu0 %v10438_v1 }
 0x399   :  { %5346 = vmatprep.mubr.msk.bf16.mxu0 %vm2662_vm2, %v10439_v28 }
 0x3a0   :  { %2884 = vmatmul.mubr.bf16.gmra.mrb[116].mxu0 %v10440_v2 }
 0x3a1   :  { %5347 = vmatprep.mubr.msk.bf16.mxu0 %vm2662_vm2, %v10441_v20 }
 0x3a8   :  { %2894 = vmatmul.mubr.bf16.gmra.mrb[120].mxu0 %v10442_v46 }
 0x3a9   :  { %5372 = vmatprep.mubr.msk.bf16.mxu0 %vm2662_vm2, %v10443_v49  ;;  %v6371_v49 = vld [vmem:[%s9630_s3 + $0x220] ss:$8 sps:$4 sm:$0xff]  }
 0x3b0   :  { %3063 = vmatmul.mubr.bf16.vlgmr.msra.gmra.mrb[60].mxu0 %v10444_v12  ;;  %v6379_v12 = vld [vmem:[%s9630_s3 + $0x244] ss:$8 sps:$4 sm:$0xff]  }
 0x3b1   :  { %5373 = vmatprep.mubr.msk.bf16.mxu0 %vm2662_vm2, %v10445_v45  ;;  %3375 = vmatpush1.bf16.msra.mxu0 %v6341_v60  ;;  %v6376_v60 = vld [vmem:[%s9630_s3 + $0x234] ss:$8 sps:$4 sm:$0xff]   ;;  %v6391_v45 = vld [vmem:[%s9630_s3 + $0x284] ss:$8 sps:$4 sm:$0xff]  }
 0x3b2   :  { %3376 = vmatprep.subr.bf16.mxu0 %v6346_v57  ;;  %v6374_v57 = vld [vmem:[%s9630_s3 + $0x230] ss:$8 sps:$4 sm:$0xff]  }
 0x3b5   :  { %3377 = vmatpush1.bf16.msra.mxu0 %v6344_v58  ;;  %v6389_v58 = vld [vmem:[%s9630_s3 + $0x280] ss:$8 sps:$4 sm:$0xff]  }
 0x3b6   :  { %3378 = vmatprep.subr.bf16.mxu0 %v6349_v48  ;;  %v6392_v48 = vld [vmem:[%s9630_s3 + $0x290] ss:$8 sps:$4 sm:$0xff]  }
 0x3b8   :  { %3073 = vmatmul.mubr.bf16.gmra.mrb[64].mxu0 %v10446_v56  ;;  %v6400_v56 = vld [vmem:[%s9630_s3 + $0x2b4] ss:$8 sps:$4 sm:$0xff]  }
 0x3b9   :  { %5374 = vmatprep.mubr.msk.bf16.mxu0 %vm2662_vm2, %v10380_v13  ;;  %3379 = vmatpush1.bf16.msra.mxu0 %v6347_v32  ;;  %v6397_v32 = vld [vmem:[%s9630_s3 + $0x2a4] ss:$8 sps:$4 sm:$0xff]  }
 0x3ba   :  { %3380 = vmatprep.subr.bf16.mxu0 %v6352_v26  ;;  %v6395_v26 = vld [vmem:[%s9630_s3 + $0x2a0] ss:$8 sps:$4 sm:$0xff]  }
 0x3bd   :  { %3381 = vmatpush1.bf16.msra.mxu0 %v6350_v5  ;;  %v6398_v5 = vld [vmem:[%s9630_s3 + $0x2b0] ss:$8 sps:$4 sm:$0xff]  }
 0x3be   :  { %3382 = vmatprep.subr.bf16.mxu0 %v6355_v63  ;;  %v6403_v63 = vld [vmem:[%s9630_s3 + $0x2c4] ss:$8 sps:$4 sm:$0xff]  }
 0x3c0   :  { %3083 = vmatmul.mubr.bf16.gmra.mrb[68].mxu0 %v10397_v9 }
 0x3c1   :  { %5375 = vmatprep.mubr.msk.bf16.mxu0 %vm2662_vm2, %v10398_v29  ;;  %3383 = vmatpush1.bf16.msra.mxu0 %v6353_v24  ;;  %v6401_v24 = vld [vmem:[%s9630_s3 + $0x2c0] ss:$8 sps:$4 sm:$0xff]  }
 0x3c2   :  { %3384 = vmatprep.subr.bf16.mxu0 %v6358_v36  ;;  %v6406_v36 = vld [vmem:[%s9630_s3 + $0x2d4] ss:$8 sps:$4 sm:$0xff]  }
 0x3c5   :  { %3385 = vmatpush1.bf16.msra.mxu0 %v6356_v44  ;;  %v6404_v44 = vld [vmem:[%s9630_s3 + $0x2d0] ss:$8 sps:$4 sm:$0xff]  }
 0x3c6   :  { %3386 = vmatprep.subr.bf16.mxu0 %v6361_v37  ;;  %v6409_v37 = vld [vmem:[%s9630_s3 + $0x2e4] ss:$8 sps:$4 sm:$0xff]  }
 0x3c8   :  { %3093 = vmatmul.mubr.bf16.gmra.mrb[72].mxu0 %v10415_v16 }
 0x3c9   :  { %5376 = vmatprep.mubr.msk.bf16.mxu0 %vm2662_vm2, %v10416_v11  ;;  %3387 = vmatpush1.bf16.msra.mxu0 %v6359_v50  ;;  %v6407_v50 = vld [vmem:[%s9630_s3 + $0x2e0] ss:$8 sps:$4 sm:$0xff]  }
 0x3ca   :  { %3388 = vmatprep.subr.bf16.mxu0 %v6364_v61  ;;  %v6412_v61 = vld [vmem:[%s9630_s3 + $0x2f4] ss:$8 sps:$4 sm:$0xff]  }
 0x3cd   :  { %3389 = vmatpush1.bf16.msra.mxu0 %v6362_v8  ;;  %v6410_v8 = vld [vmem:[%s9630_s3 + $0x2f0] ss:$8 sps:$4 sm:$0xff]  }
 0x3ce   :  { %3390 = vmatprep.subr.bf16.mxu0 %v6367_v17  ;;  %v6415_v17 = vld [vmem:[%s9630_s3 + $0x304] ss:$8 sps:$4 sm:$0xff]  }
 0x3d0   :  { %3103 = vmatmul.mubr.bf16.gmra.mrb[76].mxu0 %v10432_v42 }
 0x3d1   :  { %5377 = vmatprep.mubr.msk.bf16.mxu0 %vm2662_vm2, %v10433_v3  ;;  %3391 = vmatpush1.bf16.msra.mxu0 %v6365_v25  ;;  %v6431_v25 = vld [vmem:[%s9632_s5 + $0x40] sm:$0xff]  }
 0x3d2   :  { %3392 = vmatprep.subr.bf16.mxu0 %v6370_v51  ;;  %5702 = vmatprep.subr.bf16.mxu1 %v6431_v25  ;;  %v6444_v51 = vld [vmem:[%s9632_s5 + $0x48] sm:$0xff]  }
 0x3d3   :  { %5703 = vmatpush3.bf16.msra.mxu1 %v6431_v25 }
 0x3d4   :  { %5704 = vmatprep.subr.bf16.mxu1 %v6444_v51 }
 0x3d5   :  { %3393 = vmatpush1.bf16.msra.mxu0 %v6368_v43  ;;  %v6413_v43 = vld [vmem:[%s9630_s3 + $0x300] ss:$8 sps:$4 sm:$0xff]  }
 0x3d6   :  { %3394 = vmatprep.subr.bf16.mxu0 %v6373_v40  ;;  %v6418_v40 = vld [vmem:[%s9630_s3 + $0x314] ss:$8 sps:$4 sm:$0xff]  }
 0x3d7   :  { %5705 = vmatpush3.bf16.msra.mxu1 %v6444_v51 }
 0x3d8   :  { %3113 = vmatmul.mubr.bf16.gmra.mrb[80].mxu0 %v10434_v55 }
 0x3d9   :  { %5378 = vmatprep.mubr.msk.bf16.mxu0 %vm2662_vm2, %v10435_v39  ;;  %3395 = vmatpush1.bf16.msra.mxu0 %v6371_v49  ;;  %v6416_v49 = vld [vmem:[%s9630_s3 + $0x310] ss:$8 sps:$4 sm:$0xff]  }
 0x3da   :  { %3396 = vmatprep.subr.bf16.mxu0 %v6376_v60  ;;  %v6419_v60 = vld [vmem:[%s9630_s3 + $0x320] ss:$8 sps:$4 sm:$0xff]  }
 0x3dd   :  { %3397 = vmatpush1.bf16.msra.mxu0 %v6374_v57  ;;  %v6427_v57 = vld [vmem:[%s9630_s3 + $0x344] ss:$8 sps:$4 sm:$0xff]  }
 0x3de   :  { %3782 = vmatprep.subr.bf16.mxu0 %v6379_v12  ;;  %v6425_v12 = vld [vmem:[%s9630_s3 + $0x340] ss:$8 sps:$4 sm:$0xff]  }
 0x3e0   :  { %3123 = vmatmul.mubr.bf16.gmra.mrb[84].mxu0 %v10436_v19 }
 0x3e1   :  { %5379 = vmatprep.mubr.msk.bf16.mxu0 %vm2662_vm2, %v10437_v0 }
 0x3e8   :  { %3133 = vmatmul.mubr.bf16.gmra.mrb[88].mxu0 %v10438_v1 }
 0x3e9   :  { %5380 = vmatprep.mubr.msk.bf16.mxu0 %vm2662_vm2, %v8595_v52  ;;  %v6382_v52 = vld [vmem:[%s9630_s3 + $0x254] ss:$8 sps:$4 sm:$0xff]  }
 0x3f0   :  { %3143 = vmatmul.mubr.bf16.gmra.mrb[92].mxu0 %v8589_v34  ;;  %v6377_v34 = vld [vmem:[%s9630_s3 + $0x240] ss:$8 sps:$4 sm:$0xff]  }
 0x3f1   :  { %5381 = vmatprep.mubr.msk.bf16.mxu0 %vm2662_vm2, %v8634_v53  ;;  %v6385_v53 = vld [vmem:[%s9630_s3 + $0x264] ss:$8 sps:$4 sm:$0xff]  }
 0x3f8   :  { %3153 = vmatmul.mubr.bf16.gmra.mrb[96].mxu0 %v8632_v21  ;;  %v6380_v21 = vld [vmem:[%s9630_s3 + $0x250] ss:$8 sps:$4 sm:$0xff]  }
 0x3f9   :  { %5382 = vmatprep.mubr.msk.bf16.mxu0 %vm2662_vm2, %v8673_v15 }
 0x400   :  { %3163 = vmatmul.mubr.bf16.gmra.mrb[100].mxu0 %v8667_v35 }
 0x401   :  { %5383 = vmatprep.mubr.msk.bf16.mxu0 %vm2662_vm2, %v8712_v6 }
 0x408   :  { %3173 = vmatmul.mubr.bf16.gmra.mrb[104].mxu0 %v8706_v59 }
 0x409   :  { %5384 = vmatprep.mubr.msk.bf16.mxu0 %vm2662_vm2, %v8751_v47 }
 0x410   :  { %3183 = vmatmul.mubr.bf16.gmra.mrb[108].mxu0 %v8745_v10 }
 0x411   :  { %5385 = vmatprep.mubr.msk.bf16.mxu0 %vm2662_vm2, %v8790_v18 }
 0x418   :  { %3193 = vmatmul.mubr.bf16.gmra.mrb[112].mxu0 %v8784_v38 }
 0x419   :  { %5386 = vmatprep.mubr.msk.bf16.mxu0 %vm2662_vm2, %v8829_v54 }
 0x420   :  { %3203 = vmatmul.mubr.bf16.gmra.mrb[116].mxu0 %v8823_v4 }
 0x421   :  { %5387 = vmatprep.mubr.msk.bf16.mxu0 %vm2662_vm2, %v8856_v22 }
 0x428   :  { %3213 = vmatmul.mubr.bf16.gmra.mrb[120].mxu0 %v8850_v27 }
 0x429   :  { %5436 = vmatprep.mubr.msk.bf16.mxu0 %vm2662_vm2, %v10380_v13  ;;  %v6383_v13 = vld [vmem:[%s9630_s3 + $0x260] ss:$8 sps:$4 sm:$0xff]  }
 0x430   :  { %3407 = vmatmul.mubr.bf16.vlgmr.msra.gmra.mrb[60].mxu0 %v10397_v9  ;;  %v6388_v9 = vld [vmem:[%s9630_s3 + $0x274] ss:$8 sps:$4 sm:$0xff]  }
 0x431   :  { %5437 = vmatprep.mubr.msk.bf16.mxu0 %vm2662_vm2, %v10398_v29  ;;  %3783 = vmatpush1.bf16.msra.mxu0 %v6377_v34  ;;  %v6386_v29 = vld [vmem:[%s9630_s3 + $0x270] ss:$8 sps:$4 sm:$0xff]  }
 0x432   :  { %3784 = vmatprep.subr.bf16.mxu0 %v6382_v52  ;;  %v6428_v34 = vld [vmem:[%s9630_s3 + $0x350] ss:$8 sps:$4 sm:$0xff]   ;;  %v6434_v52 = vld [vmem:[%s9630_s3 + $0x364] ss:$8 sps:$4 sm:$0xff]  }
 0x435   :  { %3785 = vmatpush1.bf16.msra.mxu0 %v6380_v21  ;;  %v6432_v21 = vld [vmem:[%s9630_s3 + $0x360] ss:$8 sps:$4 sm:$0xff]  }
 0x436   :  { %3786 = vmatprep.subr.bf16.mxu0 %v6385_v53  ;;  %v6437_v53 = vld [vmem:[%s9630_s3 + $0x374] ss:$8 sps:$4 sm:$0xff]  }
 0x438   :  { %3417 = vmatmul.mubr.bf16.gmra.mrb[64].mxu0 %v10415_v16  ;;  %v6394_v16 = vld [vmem:[%s9630_s3 + $0x294] ss:$8 sps:$4 sm:$0xff]  }
 0x439   :  { %5438 = vmatprep.mubr.msk.bf16.mxu0 %vm2662_vm2, %v10416_v11  ;;  %3787 = vmatpush1.bf16.msra.mxu0 %v6383_v13  ;;  %v6435_v13 = vld [vmem:[%s9630_s3 + $0x370] ss:$8 sps:$4 sm:$0xff]  }
 0x43a   :  { %3788 = vmatprep.subr.bf16.mxu0 %v6388_v9  ;;  %v6451_v9 = vld [vmem:[%s9632_s5 + $0x50] sm:$0xff]  }
 0x43b   :  { %5706 = vmatprep.subr.bf16.mxu1 %v6451_v9 }
 0x43c   :  { %5707 = vmatpush3.bf16.msra.mxu1 %v6451_v9 }
 0x43d   :  { %3789 = vmatpush1.bf16.msra.mxu0 %v6386_v29  ;;  %v6440_v29 = vld [vmem:[%s9630_s3 + $0x384] ss:$8 sps:$4 sm:$0xff]  }
 0x43e   :  { %3790 = vmatprep.subr.bf16.mxu0 %v6391_v45  ;;  %v6438_v45 = vld [vmem:[%s9630_s3 + $0x380] ss:$8 sps:$4 sm:$0xff]  }
 0x440   :  { %3427 = vmatmul.mubr.bf16.gmra.mrb[68].mxu0 %v10432_v42 }
 0x441   :  { %5439 = vmatprep.mubr.msk.bf16.mxu0 %vm2662_vm2, %v10433_v3  ;;  %3791 = vmatpush1.bf16.msra.mxu0 %v6389_v58  ;;  %v6443_v58 = vld [vmem:[%s9630_s3 + $0x394] ss:$8 sps:$4 sm:$0xff]  }
 0x442   :  { %3792 = vmatprep.subr.bf16.mxu0 %v6394_v16  ;;  %v6441_v16 = vld [vmem:[%s9630_s3 + $0x390] ss:$8 sps:$4 sm:$0xff]  }
 0x445   :  { %3793 = vmatpush1.bf16.msra.mxu0 %v6392_v48  ;;  %v6447_v48 = vld [vmem:[%s9630_s3 + $0x3a4] ss:$8 sps:$4 sm:$0xff]  }
 0x446   :  { %3794 = vmatprep.subr.bf16.mxu0 %v6397_v32  ;;  %v6445_v32 = vld [vmem:[%s9630_s3 + $0x3a0] ss:$8 sps:$4 sm:$0xff]  }
 0x448   :  { %3437 = vmatmul.mubr.bf16.gmra.mrb[72].mxu0 %v10434_v55 }
 0x449   :  { %5440 = vmatprep.mubr.msk.bf16.mxu0 %vm2662_vm2, %v10435_v39  ;;  %3795 = vmatpush1.bf16.msra.mxu0 %v6395_v26  ;;  %v6450_v26 = vld [vmem:[%s9630_s3 + $0x3b4] ss:$8 sps:$4 sm:$0xff]  }
 0x44a   :  { %3796 = vmatprep.subr.bf16.mxu0 %v6400_v56  ;;  %v6448_v56 = vld [vmem:[%s9630_s3 + $0x3b0] ss:$8 sps:$4 sm:$0xff]  }
 0x44d   :  { %3797 = vmatpush1.bf16.msra.mxu0 %v6398_v5  ;;  %v6452_v5 = vld [vmem:[%s9632_s5 + $0x58] sm:$0xff]  }
 0x44e   :  { %3798 = vmatprep.subr.bf16.mxu0 %v6403_v63  ;;  %5708 = vmatprep.subr.bf16.mxu1 %v6452_v5  ;;  %v10447_v63 = vld [vmem:[#allocation185_spill] sm:$0xff] }
 0x44f   :  { %5709 = vmatpush3.bf16.msra.mxu1 %v6452_v5 }
 0x450   :  { %3447 = vmatmul.mubr.bf16.gmra.mrb[76].mxu0 %v10436_v19 }
 0x451   :  { %5441 = vmatprep.mubr.msk.bf16.mxu0 %vm2662_vm2, %v10437_v0  ;;  %3799 = vmatpush1.bf16.msra.mxu0 %v6401_v24  ;;  %v10448_v24 = vld [vmem:[#allocation184_spill] sm:$0xff] }
 0x452   :  { %3800 = vmatprep.subr.bf16.mxu0 %v6406_v36  ;;  %v10449_v36 = vld [vmem:[#allocation25_spill] sm:$0xff] }
 0x455   :  { %3801 = vmatpush1.bf16.msra.mxu0 %v6404_v44  ;;  %v10450_v44 = vld [vmem:[#allocation24_spill] sm:$0xff] }
 0x456   :  { %3802 = vmatprep.subr.bf16.mxu0 %v6409_v37  ;;  %v6453_v37 = vld [vmem:[%s9632_s5 + $0x60] sm:$0xff]  }
 0x457   :  { %5710 = vmatprep.subr.bf16.mxu1 %v6453_v37 }
 0x458   :  { %3457 = vmatmul.mubr.bf16.gmra.mrb[80].mxu0 %v10438_v1  ;;  %5711 = vmatpush3.bf16.msra.mxu1 %v6453_v37 }
 0x459   :  { %5442 = vmatprep.mubr.msk.bf16.mxu0 %vm2662_vm2, %v10439_v28  ;;  %3803 = vmatpush1.bf16.msra.mxu0 %v6407_v50  ;;  %v6454_v50 = vld [vmem:[%s9632_s5 + $0x68] sm:$0xff]  }
 0x45a   :  { %3804 = vmatprep.subr.bf16.mxu0 %v6412_v61  ;;  %5712 = vmatprep.subr.bf16.mxu1 %v6454_v50 }
 0x45c   :  { %5713 = vmatpush3.bf16.msra.mxu1 %v6454_v50 }
 0x45d   :  { %3805 = vmatpush1.bf16.msra.mxu0 %v6410_v8 }
 0x45e   :  { %4190 = vmatprep.subr.bf16.mxu0 %v6415_v17 }
 0x460   :  { %3467 = vmatmul.mubr.bf16.gmra.mrb[84].mxu0 %v10440_v2 }
 0x461   :  { %5443 = vmatprep.mubr.msk.bf16.mxu0 %vm2662_vm2, %v10441_v20 }
 0x468   :  { %3477 = vmatmul.mubr.bf16.gmra.mrb[88].mxu0 %v10442_v46 }
 0x469   :  { %5444 = vmatprep.mubr.msk.bf16.mxu0 %vm2662_vm2, %v8673_v15 }
 0x470   :  { %3487 = vmatmul.mubr.bf16.gmra.mrb[92].mxu0 %v8667_v35 }
 0x471   :  { %5445 = vmatprep.mubr.msk.bf16.mxu0 %vm2662_vm2, %v8712_v6 }
 0x478   :  { %3497 = vmatmul.mubr.bf16.gmra.mrb[96].mxu0 %v8706_v59 }
 0x479   :  { %5446 = vmatprep.mubr.msk.bf16.mxu0 %vm2662_vm2, %v8751_v47 }
 0x480   :  { %3507 = vmatmul.mubr.bf16.gmra.mrb[100].mxu0 %v8745_v10 }
 0x481   :  { %5447 = vmatprep.mubr.msk.bf16.mxu0 %vm2662_vm2, %v8790_v18 }
 0x488   :  { %3517 = vmatmul.mubr.bf16.gmra.mrb[104].mxu0 %v8784_v38 }
 0x489   :  { %5448 = vmatprep.mubr.msk.bf16.mxu0 %vm2662_vm2, %v8829_v54 }
 0x490   :  { %3527 = vmatmul.mubr.bf16.gmra.mrb[108].mxu0 %v8823_v4 }
 0x491   :  { %5449 = vmatprep.mubr.msk.bf16.mxu0 %vm2662_vm2, %v8856_v22 }
 0x498   :  { %3537 = vmatmul.mubr.bf16.gmra.mrb[112].mxu0 %v8850_v27 }
 0x499   :  { %5450 = vmatprep.mubr.msk.bf16.mxu0 %vm2662_vm2, %v8885_v31 }
 0x4a0   :  { %3547 = vmatmul.mubr.bf16.gmra.mrb[116].mxu0 %v8883_v33 }
 0x4a1   :  { %5451 = vmatprep.mubr.msk.bf16.mxu0 %vm2662_vm2, %v8912_v41 }
 0x4a8   :  { %3557 = vmatmul.mubr.bf16.gmra.mrb[120].mxu0 %v8910_v14 }
 0x4a9   :  { %5500 = vmatprep.mubr.msk.bf16.mxu0 %vm2662_vm2, %v8673_v15  ;;  %v6421_v15 = vld [vmem:[%s9630_s3 + $0x324] ss:$8 sps:$4 sm:$0xff]  }
 0x4b0   :  { %3815 = vmatmul.mubr.bf16.vlgmr.msra.gmra.mrb[60].mxu0 %v8667_v35  ;;  %v6424_v35 = vld [vmem:[%s9630_s3 + $0x334] ss:$8 sps:$4 sm:$0xff]  }
 0x4b1   :  { %5501 = vmatprep.mubr.msk.bf16.mxu0 %vm2662_vm2, %v8712_v6  ;;  %4191 = vmatpush1.bf16.msra.mxu0 %v6413_v43  ;;  %v6422_v6 = vld [vmem:[%s9630_s3 + $0x330] ss:$8 sps:$4 sm:$0xff]  }
 0x4b2   :  { %4192 = vmatprep.subr.bf16.mxu0 %v6418_v40 }
 0x4b5   :  { %4193 = vmatpush1.bf16.msra.mxu0 %v6416_v49 }
 0x4b6   :  { %4194 = vmatprep.subr.bf16.mxu0 %v6421_v15 }
 0x4b8   :  { %3825 = vmatmul.mubr.bf16.gmra.mrb[64].mxu0 %v8706_v59  ;;  %v6430_v59 = vld [vmem:[%s9630_s3 + $0x354] ss:$8 sps:$4 sm:$0xff]  }
 0x4b9   :  { %5502 = vmatprep.mubr.msk.bf16.mxu0 %vm2662_vm2, %v8751_v47  ;;  %4195 = vmatpush1.bf16.msra.mxu0 %v6419_v60 }
 0x4ba   :  { %4196 = vmatprep.subr.bf16.mxu0 %v6424_v35 }
 0x4bd   :  { %4197 = vmatpush1.bf16.msra.mxu0 %v6422_v6 }
 0x4be   :  { %4198 = vmatprep.subr.bf16.mxu0 %v6427_v57 }
 0x4c0   :  { %3835 = vmatmul.mubr.bf16.gmra.mrb[68].mxu0 %v8745_v10 }
 0x4c1   :  { %5503 = vmatprep.mubr.msk.bf16.mxu0 %vm2662_vm2, %v8790_v18  ;;  %4199 = vmatpush1.bf16.msra.mxu0 %v6425_v12 }
 0x4c2   :  { %4200 = vmatprep.subr.bf16.mxu0 %v6430_v59 }
 0x4c5   :  { %4201 = vmatpush1.bf16.msra.mxu0 %v6428_v34 }
 0x4c6   :  { %4202 = vmatprep.subr.bf16.mxu0 %v6434_v52 }
 0x4c8   :  { %3845 = vmatmul.mubr.bf16.gmra.mrb[72].mxu0 %v8784_v38 }
 0x4c9   :  { %5504 = vmatprep.mubr.msk.bf16.mxu0 %vm2662_vm2, %v8829_v54  ;;  %4203 = vmatpush1.bf16.msra.mxu0 %v6432_v21 }
 0x4ca   :  { %4204 = vmatprep.subr.bf16.mxu0 %v6437_v53 }
 0x4cd   :  { %4205 = vmatpush1.bf16.msra.mxu0 %v6435_v13 }
 0x4ce   :  { %4206 = vmatprep.subr.bf16.mxu0 %v6440_v29 }
 0x4d0   :  { %3855 = vmatmul.mubr.bf16.gmra.mrb[76].mxu0 %v8823_v4 }
 0x4d1   :  { %5505 = vmatprep.mubr.msk.bf16.mxu0 %vm2662_vm2, %v8856_v22  ;;  %4207 = vmatpush1.bf16.msra.mxu0 %v6438_v45 }
 0x4d2   :  { %4208 = vmatprep.subr.bf16.mxu0 %v6443_v58 }
 0x4d5   :  { %4209 = vmatpush1.bf16.msra.mxu0 %v6441_v16 }
 0x4d6   :  { %4210 = vmatprep.subr.bf16.mxu0 %v6447_v48 }
 0x4d8   :  { %3865 = vmatmul.mubr.bf16.gmra.mrb[80].mxu0 %v8850_v27 }
 0x4d9   :  { %5506 = vmatprep.mubr.msk.bf16.mxu0 %vm2662_vm2, %v8885_v31  ;;  %4211 = vmatpush1.bf16.msra.mxu0 %v6445_v32 }
 0x4da   :  { %4212 = vmatprep.subr.bf16.mxu0 %v6450_v26  ;;  %v9485_v26 = vld [vmem:[%s9631_s4] ss:$0 sm:$0xff] }
 0x4dd   :  { %4213 = vmatpush1.bf16.msra.mxu0 %v6448_v56 }
 0x4e0   :  { %3875 = vmatmul.mubr.bf16.gmra.mrb[84].mxu0 %v8883_v33 }
 0x4e1   :  { %5507 = vmatprep.mubr.msk.bf16.mxu0 %vm2662_vm2, %v8912_v41 }
 0x4e8   :  { %3885 = vmatmul.mubr.bf16.gmra.mrb[88].mxu0 %v8910_v14 }
 0x4e9   :  { %5508 = vmatprep.mubr.msk.bf16.mxu0 %vm2662_vm2, %v10416_v11 }
 0x4f0   :  { %3895 = vmatmul.mubr.bf16.gmra.mrb[92].mxu0 %v10432_v42 }
 0x4f1   :  { %5509 = vmatprep.mubr.msk.bf16.mxu0 %vm2662_vm2, %v10433_v3 }
 0x4f8   :  { %3905 = vmatmul.mubr.bf16.gmra.mrb[96].mxu0 %v10434_v55 }
 0x4f9   :  { %5510 = vmatprep.mubr.msk.bf16.mxu0 %vm2662_vm2, %v10435_v39 }
 0x500   :  { %3915 = vmatmul.mubr.bf16.gmra.mrb[100].mxu0 %v10436_v19 }
 0x501   :  { %5511 = vmatprep.mubr.msk.bf16.mxu0 %vm2662_vm2, %v10437_v0 }
 0x508   :  { %3925 = vmatmul.mubr.bf16.gmra.mrb[104].mxu0 %v10438_v1 }
 0x509   :  { %5512 = vmatprep.mubr.msk.bf16.mxu0 %vm2662_vm2, %v10439_v28 }
 0x510   :  { %3935 = vmatmul.mubr.bf16.gmra.mrb[108].mxu0 %v10440_v2 }
 0x511   :  { %5513 = vmatprep.mubr.msk.bf16.mxu0 %vm2662_vm2, %v10441_v20 }
 0x518   :  { %3945 = vmatmul.mubr.bf16.gmra.mrb[112].mxu0 %v10442_v46 }
 0x519   :  { %5514 = vmatprep.mubr.msk.bf16.mxu0 %vm2662_vm2, %v10447_v63 }
 0x520   :  { %3955 = vmatmul.mubr.bf16.gmra.mrb[116].mxu0 %v10448_v24 }
 0x521   :  { %5515 = vmatprep.mubr.msk.bf16.mxu0 %vm2662_vm2, %v10449_v36 }
 0x528   :  { %3965 = vmatmul.mubr.bf16.gmra.mrb[120].mxu0 %v10450_v44 }
 0x529   :  { %5564 = vmatprep.mubr.msk.bf16.mxu0 %vm2662_vm2, %v10416_v11  ;;  %v6455_v11 = vld [vmem:[%s9632_s5 + $0x70] sm:$0xff]  }
 0x52a   :  { %5714 = vmatprep.subr.bf16.mxu1 %v6455_v11 }
 0x52b   :  { %5715 = vmatpush3.bf16.msra.mxu1 %v6455_v11 }
 0x530   :  { %4223 = vmatmul.mubr.bf16.vlgmr.msra.gmra.mrb[60].mxu0 %v10432_v42 }
 0x531   :  { %5565 = vmatprep.mubr.msk.bf16.mxu0 %vm2662_vm2, %v10433_v3 }
 0x538   :  { %4233 = vmatmul.mubr.bf16.gmra.mrb[64].mxu0 %v10434_v55 }
 0x539   :  { %5566 = vmatprep.mubr.msk.bf16.mxu0 %vm2662_vm2, %v10435_v39 }
 0x540   :  { %4243 = vmatmul.mubr.bf16.gmra.mrb[68].mxu0 %v10436_v19 }
 0x541   :  { %5567 = vmatprep.mubr.msk.bf16.mxu0 %vm2662_vm2, %v10437_v0 }
 0x548   :  { %4253 = vmatmul.mubr.bf16.gmra.mrb[72].mxu0 %v10438_v1 }
 0x549   :  { %5568 = vmatprep.mubr.msk.bf16.mxu0 %vm2662_vm2, %v10439_v28 }
 0x550   :  { %4263 = vmatmul.mubr.bf16.gmra.mrb[76].mxu0 %v10440_v2 }
 0x551   :  { %5569 = vmatprep.mubr.msk.bf16.mxu0 %vm2662_vm2, %v10441_v20 }
 0x558   :  { %4273 = vmatmul.mubr.bf16.gmra.mrb[80].mxu0 %v10442_v46 }
 0x559   :  { %5570 = vmatprep.mubr.msk.bf16.mxu0 %vm2662_vm2, %v10447_v63 }
 0x560   :  { %4283 = vmatmul.mubr.bf16.gmra.mrb[84].mxu0 %v10448_v24 }
 0x561   :  { %5571 = vmatprep.mubr.msk.bf16.mxu0 %vm2662_vm2, %v10449_v36 }
 0x568   :  { %4293 = vmatmul.mubr.bf16.gmra.mrb[88].mxu0 %v10450_v44 }
 0x569   :  { %5572 = vmatprep.mubr.msk.bf16.mxu0 %vm2662_vm2, %v8751_v47  ;;  %v9407_v47 = vld [vmem:[%s9632_s5] sm:$0xff]  }
 0x570   :  { %4303 = vmatmul.mubr.bf16.gmra.mrb[92].mxu0 %v8745_v10  ;;  %v6456_v10 = vld [vmem:[%s9632_s5 + $0x78] sm:$0xff]  }
 0x571   :  { %5573 = vmatprep.mubr.msk.bf16.mxu0 %vm2662_vm2, %v8790_v18  ;;  %5716 = vmatprep.subr.bf16.mxu1 %v6456_v10 }
 0x572   :  { %5717 = vmatpush3.bf16.msra.mxu1 %v6456_v10 }
 0x573   :  { %5722 = vmatprep.subr.bf16.mxu1 %v9407_v47 }
 0x578   :  { %4313 = vmatmul.mubr.bf16.gmra.mrb[96].mxu0 %v8784_v38 }
 0x579   :  { %5574 = vmatprep.mubr.msk.bf16.mxu0 %vm2662_vm2, %v8829_v54 }
 0x580   :  { %4323 = vmatmul.mubr.bf16.gmra.mrb[100].mxu0 %v8823_v4 }
 0x581   :  { %5575 = vmatprep.mubr.msk.bf16.mxu0 %vm2662_vm2, %v8856_v22 }
 0x588   :  { %4333 = vmatmul.mubr.bf16.gmra.mrb[104].mxu0 %v8850_v27 }
 0x589   :  { %5576 = vmatprep.mubr.msk.bf16.mxu0 %vm2662_vm2, %v8885_v31 }
 0x590   :  { %4343 = vmatmul.mubr.bf16.gmra.mrb[108].mxu0 %v8883_v33 }
 0x591   :  { %5577 = vmatprep.mubr.msk.bf16.mxu0 %vm2662_vm2, %v8912_v41 }
 0x598   :  { %4353 = vmatmul.mubr.bf16.gmra.mrb[112].mxu0 %v8910_v14 }
 0x599   :  { %5578 = vmatprep.mubr.msk.bf16.mxu0 %vm2662_vm2, %v8939_v7 }
 0x5a0   :  { %4363 = vmatmul.mubr.bf16.gmra.mrb[116].mxu0 %v8937_v62 }
 0x5a1   :  { %5579 = vmatprep.mubr.msk.bf16.mxu0 %vm2662_vm2, %v8960_v23 }
 0x5a8   :  { %4373 = vmatmul.mubr.bf16.gmra.mrb[120].mxu0 %v8958_v30 }
 0x603   :  { %v4224_v38 = vpop.f32.mrb[60].mxu0 }
 0x604   :  { %v4226_v18 = vpop.f32.mrb[61].mxu0 }
 0x605   :  { %v4447_v4 = vmax.f32 %v4224_v38, %v4226_v18  ;;  %v4228_v54 = vpop.f32.mrb[62].mxu0 }
 0x606   :  { %v4230_v27 = vpop.f32.mrb[63].mxu0 }
 0x607   :  { %v4448_v22 = vmax.f32 %v4228_v54, %v4230_v27 }
 0x60b   :  { %v4234_v33 = vpop.f32.mrb[64].mxu0 }
 0x60c   :  { %v4236_v31 = vpop.f32.mrb[65].mxu0 }
 0x60d   :  { %v4449_v14 = vmax.f32 %v4234_v33, %v4236_v31  ;;  %v4238_v41 = vpop.f32.mrb[66].mxu0 }
 0x60e   :  { %v4240_v62 = vpop.f32.mrb[67].mxu0 }
 0x60f   :  { %v4450_v7 = vmax.f32 %v4238_v41, %v4240_v62 }
 0x613   :  { %v9410_v42 = vpop.f32.mrb[68].mxu0 }
 0x614   :  { %v9412_v3 = vpop.f32.mrb[69].mxu0 }
 0x615   :  { %v4451_v30 = vmax.f32 %v9410_v42, %v9412_v3  ;;  %v9416_v23 = vpop.f32.mrb[70].mxu0 }
 0x616   :  { %v9418_v55 = vpop.f32.mrb[71].mxu0 }
 0x617   :  { %v4452_v39 = vmax.f32 %v9416_v23, %v9418_v55 }
 0x61b   :  { %v9422_v19 = vpop.f32.mrb[72].mxu0 }
 0x61c   :  { %v9424_v0 = vpop.f32.mrb[73].mxu0 }
 0x61d   :  { %v4453_v1 = vmax.f32 %v9422_v19, %v9424_v0  ;;  %v9428_v28 = vpop.f32.mrb[74].mxu0 }
 0x61e   :  { %v9430_v2 = vpop.f32.mrb[75].mxu0 }
 0x61f   :  { %v4454_v20 = vmax.f32 %v9428_v28, %v9430_v2  ;;  %v6458_v28 = vld [vmem:[%s9632_s5 + $0x8] sm:$0xff]  }
 0x623   :  { %v9434_v46 = vpop.f32.mrb[76].mxu0 }
 0x624   :  { %v9436_v61 = vpop.f32.mrb[77].mxu0 }
 0x625   :  { %v4455_v8 = vmax.f32 %v9434_v46, %v9436_v61  ;;  %v9440_v17 = vpop.f32.mrb[78].mxu0  ;;  %v6459_v46 = vld [vmem:[%s9632_s5 + $0x10] sm:$0xff]  }
 0x626   :  { %v9442_v25 = vpop.f32.mrb[79].mxu0 }
 0x627   :  { %v4456_v51 = vmax.f32 %v9440_v17, %v9442_v25 }
 0x62b   :  { %v9446_v43 = vpop.f32.mrb[80].mxu0 }
 0x62c   :  { %v9448_v40 = vpop.f32.mrb[81].mxu0 }
 0x62d   :  { %v4457_v49 = vmax.f32 %v9446_v43, %v9448_v40  ;;  %v9452_v15 = vpop.f32.mrb[82].mxu0  ;;  %v6461_v43 = vld [vmem:[%s9632_s5 + $0x20] sm:$0xff]  }
 0x62e   :  { %v9454_v60 = vpop.f32.mrb[83].mxu0 }
 0x62f   :  { %v4458_v35 = vmax.f32 %v9452_v15, %v9454_v60 }
 0x633   :  { %v9458_v6 = vpop.f32.mrb[84].mxu0 }
 0x634   :  { %v9460_v57 = vpop.f32.mrb[85].mxu0 }
 0x635   :  { %v4459_v12 = vmax.f32 %v9458_v6, %v9460_v57  ;;  %v9464_v59 = vpop.f32.mrb[86].mxu0  ;;  %v6463_v6 = vld [vmem:[%s9632_s5 + $0x30] sm:$0xff]  }
 0x636   :  { %v9466_v34 = vpop.f32.mrb[87].mxu0 }
 0x637   :  { %v4460_v52 = vmax.f32 %v9464_v59, %v9466_v34 }
 0x63b   :  { %v9470_v21 = vpop.f32.mrb[88].mxu0 }
 0x63c   :  { %v9472_v53 = vpop.f32.mrb[89].mxu0 }
 0x63d   :  { %v4461_v13 = vmax.f32 %v9470_v21, %v9472_v53  ;;  %v9476_v9 = vpop.f32.mrb[90].mxu0  ;;  %v6465_v21 = vld [vmem:[%s9632_s5 + $0x80] sm:$0xff]  }
 0x63e   :  { %v9478_v29 = vpop.f32.mrb[91].mxu0 }
 0x63f   :  { %v4462_v45 = vmax.f32 %v9476_v9, %v9478_v29  ;;  %v6467_v9 = vld [vmem:[%s9632_s5 + $0x90] sm:$0xff]   ;;  %v6468_v29 = vld [vmem:[%s9632_s5 + $0x98] sm:$0xff]  }
 0x643   :  { %v4304_v58 = vpop.f32.mrb[92].mxu0 }
 0x644   :  { %v4306_v16 = vpop.f32.mrb[93].mxu0 }
 0x645   :  { %v4463_v48 = vmax.f32 %v4304_v58, %v4306_v16  ;;  %v4308_v32 = vpop.f32.mrb[94].mxu0 }
 0x646   :  { %v4310_v56 = vpop.f32.mrb[95].mxu0 }
 0x647   :  { %v4479_v5 = vmax.f32 %v4447_v4, %v4463_v48  ;;  %v4464_v63 = vmax.f32 %v4308_v32, %v4310_v56 }
 0x649   :  { %v4502_v24 = vadd.f32 %v9485_v26, %v4479_v5  ;;  %v4480_v36 = vmax.f32 %v4448_v22, %v4464_v63 }
 0x64b   :  { %v4503_v44 = vadd.f32 %v9485_v26, %v4480_v36  ;;  %v4314_v37 = vpop.f32.mrb[96].mxu0  ;;  %v4518_v11 = vmax.f32 %v4502_v24, 0.0 }
 0x64c   :  { %v4316_v50 = vpop.f32.mrb[97].mxu0 }
 0x64d   :  { %v4519_v10 = vmax.f32 %v4503_v44, 0.0  ;;  %v4465_v38 = vmax.f32 %v4314_v37, %v4316_v50  ;;  %v4318_v18 = vpop.f32.mrb[98].mxu0 }
 0x64e   :  { %v4320_v54 = vpop.f32.mrb[99].mxu0 }
 0x64f   :  { %v4481_v27 = vmax.f32 %v4449_v14, %v4465_v38  ;;  %v4466_v33 = vmax.f32 %v4318_v18, %v4320_v54  ;;  %v4534_v31 = vpack.c.bf16 %v4519_v10, %v4518_v11 }
 0x651   :  { %v4504_v41 = vadd.f32 %v9485_v26, %v4481_v27  ;;  %v4482_v62 = vmax.f32 %v4450_v7, %v4466_v33 }
 0x653   :  { %v4505_v4 = vadd.f32 %v9485_v26, %v4482_v62  ;;  %v4324_v58 = vpop.f32.mrb[100].mxu0  ;;  %v4520_v22 = vmax.f32 %v4504_v41, 0.0 }
 0x654   :  { %v4326_v16 = vpop.f32.mrb[101].mxu0 }
 0x655   :  { %v4521_v48 = vmax.f32 %v4505_v4, 0.0  ;;  %v4467_v32 = vmax.f32 %v4324_v58, %v4326_v16  ;;  %v4328_v56 = vpop.f32.mrb[102].mxu0 }
 0x656   :  { %v4330_v5 = vpop.f32.mrb[103].mxu0 }
 0x657   :  { %v9491_v63 = vpack.c.bf16 %v4521_v48, %v4520_v22  ;;  %v4483_v14 = vmax.f32 %v4451_v30, %v4467_v32  ;;  %v4468_v24 = vmax.f32 %v4328_v56, %v4330_v5 }
 0x659   :  { %v4506_v36 = vadd.f32 %v9485_v26, %v4483_v14  ;;  %v4484_v7 = vmax.f32 %v4452_v39, %v4468_v24 }
 0x65b   :  { %v4507_v44 = vadd.f32 %v9485_v26, %v4484_v7  ;;  %v4334_v37 = vpop.f32.mrb[104].mxu0  ;;  %v4522_v11 = vmax.f32 %v4506_v36, 0.0 }
 0x65c   :  { %v4336_v50 = vpop.f32.mrb[105].mxu0 }
 0x65d   :  { %v4523_v10 = vmax.f32 %v4507_v44, 0.0  ;;  %v4469_v38 = vmax.f32 %v4334_v37, %v4336_v50  ;;  %v4338_v18 = vpop.f32.mrb[106].mxu0 }
 0x65e   :  { %v4340_v54 = vpop.f32.mrb[107].mxu0 }
 0x65f   :  { %v4485_v42 = vmax.f32 %v4453_v1, %v4469_v38  ;;  %v4470_v3 = vmax.f32 %v4338_v18, %v4340_v54  ;;  %v4536_v30 = vpack.c.bf16 %v4523_v10, %v4522_v11 }
 0x661   :  { %v4508_v27 = vadd.f32 %v9485_v26, %v4485_v42  ;;  %v4486_v23 = vmax.f32 %v4454_v20, %v4470_v3  ;;  %5718 = vmatprep.mubr.bf16.mxu1 %v4536_v30 }
 0x663   :  { %v4509_v55 = vadd.f32 %v9485_v26, %v4486_v23  ;;  %v4344_v39 = vpop.f32.mrb[108].mxu0  ;;  %v4524_v41 = vmax.f32 %v4508_v27, 0.0 }
 0x664   :  { %v4346_v33 = vpop.f32.mrb[109].mxu0 }
 0x665   :  { %v4525_v62 = vmax.f32 %v4509_v55, 0.0  ;;  %v4471_v4 = vmax.f32 %v4344_v39, %v4346_v33  ;;  %v4348_v58 = vpop.f32.mrb[110].mxu0 }
 0x666   :  { %v4350_v16 = vpop.f32.mrb[111].mxu0 }
 0x667   :  { %v4537_v19 = vpack.c.bf16 %v4525_v62, %v4524_v41  ;;  %v4487_v0 = vmax.f32 %v4455_v8, %v4471_v4  ;;  %v4472_v1 = vmax.f32 %v4348_v58, %v4350_v16  ;;  %v6466_v4 = vld [vmem:[%s9632_s5 + $0x88] sm:$0xff]   ;;  %v6472_v58 = vld [vmem:[%s9632_s5 + $0xb8] sm:$0xff]   ;;  %v6473_v16 = vld [vmem:[%s9632_s5 + $0xc0] sm:$0xff]  }
 0x669   :  { %v4510_v2 = vadd.f32 %v9485_v26, %v4487_v0  ;;  %v4488_v20 = vmax.f32 %v4456_v51, %v4472_v1  ;;  %5719 = vmatmul.mubr.bf16.vlgmr.msra.gmra.mrb[68].mxu1 %v4537_v19  ;;  %v6460_v51 = vld [vmem:[%s9632_s5 + $0x18] sm:$0xff]   ;;  %v6474_v19 = vld [vmem:[%s9632_s5 + $0xc8] sm:$0xff]   ;;  %v6475_v0 = vld [vmem:[%s9632_s5 + $0xd0] sm:$0xff]  }
 0x66a   :  { %5723 = vmatpush3.bf16.msra.mxu1 %v9407_v47  ;;  %5738 = vmatprep.mubr.bf16.mxu1 %v4534_v31  ;;  %v6476_v1 = vld [vmem:[%s9632_s5 + $0xd8] sm:$0xff]  }
 0x66b   :  { %v4511_v22 = vadd.f32 %v9485_v26, %v4488_v20  ;;  %v4354_v48 = vpop.f32.mrb[112].mxu0  ;;  %5724 = vmatprep.subr.bf16.mxu1 %v6458_v28  ;;  %v4526_v8 = vmax.f32 %v4510_v2, 0.0  ;;  %v6478_v2 = vld [vmem:[%s9632_s5 + $0xe8] sm:$0xff]   ;;  %v6479_v20 = vld [vmem:[%s9632_s5 + $0xf0] sm:$0xff]  }
 0x66c   :  { %v4356_v61 = vpop.f32.mrb[113].mxu0 }
 0x66d   :  { %v4527_v32 = vmax.f32 %v4511_v22, 0.0  ;;  %v4473_v56 = vmax.f32 %v4354_v48, %v4356_v61  ;;  %v4358_v5 = vpop.f32.mrb[114].mxu0  ;;  %v6480_v22 = vld [vmem:[%s9632_s5 + $0xf8] sm:$0xff]   ;;  %v5661_v48 = vld [vmem:[%s9633_s6] ss:$0 sm:$0xff] }
 0x66e   :  { %5725 = vmatpush3.bf16.msra.mxu1 %v6458_v28  ;;  %v4360_v17 = vpop.f32.mrb[115].mxu0  ;;  %v6477_v28 = vld [vmem:[%s9632_s5 + $0xe0] sm:$0xff]  }
 0x66f   :  { %v4489_v47 = vmax.f32 %v4457_v49, %v4473_v56  ;;  %v4474_v25 = vmax.f32 %v4358_v5, %v4360_v17  ;;  %5726 = vmatprep.subr.bf16.mxu1 %v6459_v46  ;;  %v4538_v31 = vpack.c.bf16 %v4527_v32, %v4526_v8 }
 0x671   :  { %v4512_v14 = vadd.f32 %v9485_v26, %v4489_v47  ;;  %v4490_v24 = vmax.f32 %v4458_v35, %v4474_v25  ;;  %v6462_v35 = vld [vmem:[%s9632_s5 + $0x28] sm:$0xff]  }
 0x672   :  { %5727 = vmatpush3.bf16.msra.mxu1 %v6459_v46 }
 0x673   :  { %v4513_v36 = vadd.f32 %v9485_v26, %v4490_v24  ;;  %v4364_v7 = vpop.f32.mrb[116].mxu0  ;;  %5728 = vmatprep.subr.bf16.mxu1 %v6460_v51  ;;  %v4528_v49 = vmax.f32 %v4512_v14, 0.0 }
 0x674   :  { %v4366_v40 = vpop.f32.mrb[117].mxu0 }
 0x675   :  { %v4529_v44 = vmax.f32 %v4513_v36, 0.0  ;;  %v4475_v37 = vmax.f32 %v4364_v7, %v4366_v40  ;;  %v4368_v50 = vpop.f32.mrb[118].mxu0 }
 0x676   :  { %5729 = vmatpush3.bf16.msra.mxu1 %v6460_v51  ;;  %v4370_v11 = vpop.f32.mrb[119].mxu0 }
 0x677   :  { %v4539_v10 = vpack.c.bf16 %v4529_v44, %v4528_v49  ;;  %v4491_v15 = vmax.f32 %v4459_v12, %v4475_v37  ;;  %v4476_v60 = vmax.f32 %v4368_v50, %v4370_v11  ;;  %5730 = vmatprep.subr.bf16.mxu1 %v6461_v43 }
 0x679   :  { %v4514_v38 = vadd.f32 %v9485_v26, %v4491_v15  ;;  %v4492_v18 = vmax.f32 %v4460_v52, %v4476_v60  ;;  %v6464_v52 = vld [vmem:[%s9632_s5 + $0x38] sm:$0xff]  }
 0x67a   :  { %5731 = vmatpush3.bf16.msra.mxu1 %v6461_v43 }
 0x67b   :  { %v4515_v54 = vadd.f32 %v9485_v26, %v4492_v18  ;;  %v4374_v42 = vpop.f32.mrb[120].mxu0  ;;  %5732 = vmatprep.subr.bf16.mxu1 %v6462_v35  ;;  %v4530_v12 = vmax.f32 %v4514_v38, 0.0 }
 0x67c   :  { %v4376_v57 = vpop.f32.mrb[121].mxu0 }
 0x67d   :  { %v4531_v3 = vmax.f32 %v4515_v54, 0.0  ;;  %v4477_v30 = vmax.f32 %v4374_v42, %v4376_v57  ;;  %v4378_v27 = vpop.f32.mrb[122].mxu0 }
 0x67e   :  { %5733 = vmatpush3.bf16.msra.mxu1 %v6462_v35  ;;  %v4380_v23 = vpop.f32.mrb[123].mxu0 }
 0x67f   :  { %v4493_v59 = vmax.f32 %v4461_v13, %v4477_v30  ;;  %v4478_v34 = vmax.f32 %v4378_v27, %v4380_v23  ;;  %5734 = vmatprep.subr.bf16.mxu1 %v6463_v6  ;;  %v4540_v55 = vpack.c.bf16 %v4531_v3, %v4530_v12 }
 0x681   :  { %v4516_v39 = vadd.f32 %v9485_v26, %v4493_v59  ;;  %v4494_v33 = vmax.f32 %v4462_v45, %v4478_v34  ;;  %v6469_v45 = vld [vmem:[%s9632_s5 + $0xa0] sm:$0xff]  }
 0x682   :  { %5735 = vmatpush3.bf16.msra.mxu1 %v6463_v6 }
 0x683   :  { %v4517_v41 = vadd.f32 %v9485_v26, %v4494_v33  ;;  %5736 = vmatprep.subr.bf16.mxu1 %v6464_v52  ;;  %v4532_v53 = vmax.f32 %v4516_v39, 0.0  ;;  %v6470_v26 = vld [vmem:[%s9632_s5 + $0xa8] sm:$0xff]  }
 0x685   :  { %v4533_v13 = vmax.f32 %v4517_v41, 0.0 }
 0x686   :  { %5737 = vmatpush3.bf16.msra.mxu1 %v6464_v52 }
 0x687   :  { %v4541_v62 = vpack.c.bf16 %v4533_v13, %v4532_v53  ;;  %5742 = vmatprep.subr.bf16.mxu1 %v6465_v21 }
 0x689   :  { %5739 = vmatmul.mubr.bf16.vlgmr.msra.gmra.mrb[68].mxu1 %v9491_v63  ;;  %v6471_v63 = vld [vmem:[%s9632_s5 + $0xb0] sm:$0xff]   ;;  %s6509_s5 = scalar_lea.vmem %s5026_s10, 512 }
 0x68a   :  { %5743 = vmatpush3.bf16.msra.mxu1 %v6465_v21  ;;  %5758 = vmatprep.mubr.bf16.mxu1 %v4538_v31  ;;  %p6510_p0 = scmp.ne.s32.totalorder %s5026_s10, %s6509_s5  ;;  %p6515_p2 = scmp.lt.s32.totalorder %s6509_s5, %s6509_s5 }
 0x68b   :  { %5744 = vmatprep.subr.bf16.mxu1 %v6466_v4 }
 0x68c   :  { %p6516_p3 = por %p6515_p2, %p6514_p1 }
 0x68e   :  { %5745 = vmatpush3.bf16.msra.mxu1 %v6466_v4  ;;  %p6517_p4 = pnand %p6516_p3, %p6510_p0 }
 0x68f   :  { %5746 = vmatprep.subr.bf16.mxu1 %v6467_v9 }
 0x692   :  { %5747 = vmatpush3.bf16.msra.mxu1 %v6467_v9 }
 0x693   :  { %5748 = vmatprep.subr.bf16.mxu1 %v6468_v29 }
 0x696   :  { %5749 = vmatpush3.bf16.msra.mxu1 %v6468_v29 }
 0x697   :  { %5750 = vmatprep.subr.bf16.mxu1 %v6469_v45 }
 0x69a   :  { %5751 = vmatpush3.bf16.msra.mxu1 %v6469_v45 }
 0x69b   :  { %5752 = vmatprep.subr.bf16.mxu1 %v6470_v26 }
 0x69e   :  { %5753 = vmatpush3.bf16.msra.mxu1 %v6470_v26 }
 0x69f   :  { %5754 = vmatprep.subr.bf16.mxu1 %v6471_v63 }
 0x6a2   :  { %5755 = vmatpush3.bf16.msra.mxu1 %v6471_v63 }
 0x6a3   :  { %5756 = vmatprep.subr.bf16.mxu1 %v6472_v58 }
 0x6a6   :  { %5757 = vmatpush3.bf16.msra.mxu1 %v6472_v58 }
 0x6a7   :  { %5762 = vmatprep.subr.bf16.mxu1 %v6473_v16 }
 0x6a9   :  { %5759 = vmatmul.mubr.bf16.vlgmr.msra.gmra.mrb[68].mxu1 %v4539_v10 }
 0x6aa   :  { %5763 = vmatpush3.bf16.msra.mxu1 %v6473_v16  ;;  %5778 = vmatprep.mubr.bf16.mxu1 %v4540_v55 }
 0x6ab   :  { %5764 = vmatprep.subr.bf16.mxu1 %v6474_v19 }
 0x6ae   :  { %5765 = vmatpush3.bf16.msra.mxu1 %v6474_v19 }
 0x6af   :  { %5766 = vmatprep.subr.bf16.mxu1 %v6475_v0 }
 0x6b2   :  { %5767 = vmatpush3.bf16.msra.mxu1 %v6475_v0 }
 0x6b3   :  { %5768 = vmatprep.subr.bf16.mxu1 %v6476_v1 }
 0x6b6   :  { %5769 = vmatpush3.bf16.msra.mxu1 %v6476_v1 }
 0x6b7   :  { %5770 = vmatprep.subr.bf16.mxu1 %v6477_v28 }
 0x6ba   :  { %5771 = vmatpush3.bf16.msra.mxu1 %v6477_v28 }
 0x6bb   :  { %5772 = vmatprep.subr.bf16.mxu1 %v6478_v2 }
 0x6be   :  { %5773 = vmatpush3.bf16.msra.mxu1 %v6478_v2 }
 0x6bf   :  { %5774 = vmatprep.subr.bf16.mxu1 %v6479_v20 }
 0x6c2   :  { %5775 = vmatpush3.bf16.msra.mxu1 %v6479_v20 }
 0x6c3   :  { %5776 = vmatprep.subr.bf16.mxu1 %v6480_v22 }
 0x6c6   :  { %5777 = vmatpush3.bf16.msra.mxu1 %v6480_v22 }
 0x6c9   :  { %5779 = vmatmul.mubr.bf16.vlgmr.msra.gmra.mrb[68].mxu1 %v4541_v62 }
 0x79c   :  { %v5780_v46 = vpop.f32.mrb[68].mxu1 }
 0x79d   :  { %v5014_v61 = vadd.f32 %v5780_v46, %v5661_v48  ;;  %v4986_v8 = vpop.f32.mrb[69].mxu1 }
 0x79e   :  { %v5012_v32 = vadd.f32 %v5661_v48, %v4986_v8  ;;  %v5781_v56 = vpop.f32.mrb[70].mxu1 }
 0x79f   :  { %5018 = vst [vmem:[#allocation2 + $0x10] sm:$0xff] %v5014_v61  ;;  %v5015_v5 = vadd.f32 %v5781_v56, %v5661_v48  ;;  %v4989_v17 = vpop.f32.mrb[71].mxu1 }
 0x7a0   :  { %5016 = vst [vmem:[#allocation2] sm:$0xff] %v5012_v32  ;;  %v5013_v47 = vadd.f32 %v5661_v48, %v4989_v17 }
 0x7a1   :  { %5019 = vst [vmem:[#allocation2 + $0x18] sm:$0xff] %v5015_v5 }
 0x7a2   :  { %5017 = vst [vmem:[#allocation2 + $0x8] sm:$0xff] %v5013_v47 }
 0x7a3   :  { %6520 = shalt.err (!%p6517_p4)
}
 0x7a4   :  { %s6521_s0 = scalar_lea.hbm %s9634_s7, 512 }
 0x7a5   :  { %p6522_p5 = scmp.ne.s32.totalorder %s9634_s7, %s6521_s0  ;;  %p6525_p6 = scmp.lt.u32.totalorder %s6521_s0, %s9634_s7 }
 0x7a7   :  { %p6527_p7 = pnand %p6525_p6, %p6522_p5 }
 0x7a9   :  { %6530 = shalt.err (!%p6527_p7)
}
 0x7aa   :  { %s6534_s4 = smov 128   ;;  %s6535_s15 = smov 8  }
 0x7ab   :  { %5031 = dma.vmem_to_hbm [thread:$0]  %s5026_s10, 512, %s9634_s7, [#allocation3], %s6534_s4, %s6534_s4, %s6535_s15  }
 0x7ac   :  { %6531 = dma.done.wait [#allocation3], 512  }
 0x7ad   :  { %6532 = vsyncadd [#allocation3], 4294966784 }
 0x7ae   :  { %5035 = vsyncpa [#allocation3], 1 }

</bundles_post_ra>
